<compile_context>
chip_gen: v5e
topology: v5e:2x2
jax: 0.10.0
libtpu: 0.0.40
codegen_flags: <defaults>
</compile_context>

<pallas_src>
import functools

import jax
import jax.numpy as jnp
import numpy as np
from jax import lax
from jax.experimental import pallas as pl
from jax.experimental.pallas import tpu as pltpu

_F32_EPS = float(np.finfo(np.float32).eps)


def _softplus(x):
    # numerically stable softplus; identical formula in kernel and reference
    return jnp.maximum(x, 0.0) + jnp.log1p(jnp.exp(-jnp.abs(x)))


# ----------------------------- Pallas kernel --------------------------------
def _prior_kernel(y_sref, e_sref,                     # scalar-prefetch (SMEM)
                  mu_tab_ref, diag_tab_ref, lrT_tab_ref,  # VMEM-resident tables
                  mu_ref, cov_ref,                    # (TB, ...) output blocks
                  *, z, tb, n_envs):
    step = pl.program_id(0)
    z2 = 2 * z

    # Masks hoisted out of the per-sample loop: computed once per grid step.
    rows = lax.broadcasted_iota(jnp.int32, (z2, z2), 0)
    cols = lax.broadcasted_iota(jnp.int32, (z2, z2), 1)
    diag_mask = rows == cols
    block_mask = (rows < z) == (cols < z)             # block-diagonal selector

    def body(i, carry):
        g = step * tb + i                             # global sample index
        ye = y_sref[g] * n_envs + e_sref[g]           # flat (y, e) table row

        lrT = lrT_tab_ref[ye]                         # (rank, 2z), lane-dense
        d_row = diag_tab_ref[ye]                      # (1, 2z)

        # One MXU product for both covariance blocks: (2z, 2z) = lrT.T @ lrT,
        # off-diagonal 64x64 blocks masked to zero afterwards.
        cov_full = lax.dot_general(
            lrT, lrT, (((0,), (0,)), ((), ())),
            precision=lax.Precision.HIGHEST,
            preferred_element_type=jnp.float32)
        diag = jnp.where(diag_mask, _softplus(d_row) + _F32_EPS, 0.0)
        cov_ref[i] = jnp.where(block_mask, cov_full, 0.0) + diag

        mu_ref[i] = mu_tab_ref[ye]                    # (1, 2z) dense store
        return carry

    lax.fori_loop(0, tb, body, 0, unroll=True)


def _pick_tile(b):
    # >=2 grid steps when possible (v7x has 2 TensorCores sharded over the
    # "parallel" axis); cap at 64 so the double-buffered cov block stays small.
    if b <= 1:
        return 1
    upper = min(b // 2, 64)
    for tb in range(upper, 0, -1):
        if b % tb == 0:
            return tb
    return 1


# ------------------------------ wrapper --------------------------------------
@jax.jit
def prior_forward(params, y, e):
    mu_c = params["mu_causal"]          # (E, Z)
    lr_c = params["low_rank_causal"]    # (E, Z, R)
    d_c = params["diag_causal"]         # (E, Z)
    mu_s = params["mu_spurious"]        # (C, E, Z)
    lr_s = params["low_rank_spurious"]  # (C, E, Z, R)
    d_s = params["diag_spurious"]       # (C, E, Z)

    n_envs, z = mu_c.shape
    rank = lr_c.shape[-1]
    n_classes = mu_s.shape[0]
    ce = n_classes * n_envs
    b = y.shape[0]
    z2 = 2 * z
    tb = _pick_tile(b)

    # Combine the causal/spurious parameter tables into (y,e)-indexed tables
    # (layout plumbing on a few-KiB arrays, done once per call):
    #   row ye = y * E + e  ->  [causal | spurious] concatenated on the lane dim.
    mu_c_b = jnp.broadcast_to(mu_c[None], (n_classes, n_envs, z))
    d_c_b = jnp.broadcast_to(d_c[None], (n_classes, n_envs, z))
    lr_c_t = jnp.swapaxes(lr_c, -1, -2)                               # (E, R, Z)
    lr_c_b = jnp.broadcast_to(lr_c_t[None], (n_classes, n_envs, rank, z))
    lr_s_t = jnp.swapaxes(lr_s, -1, -2)                               # (C, E, R, Z)

    mu_tab = jnp.concatenate([mu_c_b, mu_s], -1).reshape(ce, 1, z2)
    d_tab = jnp.concatenate([d_c_b, d_s], -1).reshape(ce, 1, z2)
    lrT_tab = jnp.concatenate([lr_c_b, lr_s_t], -1).reshape(ce, rank, z2)

    const_idx = lambda i, y_ref, e_ref: (0, 0, 0)        # tables: DMA'd once
    out_idx = lambda i, y_ref, e_ref: (i, 0, 0)

    grid_spec = pltpu.PrefetchScalarGridSpec(
        num_scalar_prefetch=2,
        grid=(b // tb,),
        in_specs=[
            pl.BlockSpec((ce, 1, z2), const_idx),        # mu table
            pl.BlockSpec((ce, 1, z2), const_idx),        # diag table
            pl.BlockSpec((ce, rank, z2), const_idx),     # low-rank^T table
        ],
        out_specs=[
            pl.BlockSpec((tb, 1, z2), out_idx),
            pl.BlockSpec((tb, z2, z2), out_idx),
        ],
    )

    cost = pl.CostEstimate(
        flops=2 * b * z2 * z2 * rank,
        transcendentals=2 * b * z2,
        bytes_accessed=4 * (b * (z2 * z2 + 2 * z2) + ce * (rank + 2) * z2) + 8 * b,
    )

    mu_out, cov_out = pl.pallas_call(
        functools.partial(_prior_kernel, z=z, tb=tb, n_envs=n_envs),
        grid_spec=grid_spec,
        out_shape=(
            jax.ShapeDtypeStruct((b, 1, z2), jnp.float32),
            jax.ShapeDtypeStruct((b, z2, z2), jnp.float32),
        ),
        cost_estimate=cost,
        compiler_params=pltpu.CompilerParams(
            dimension_semantics=("parallel",)),
    )(y.astype(jnp.int32), e.astype(jnp.int32), mu_tab, d_tab, lrT_tab)

    return mu_out.reshape(b, z2), cov_out


# ------------------------- deterministic params ------------------------------
def init_params(key, z, rank, n_envs, n_classes, sd):
    ks = jax.random.split(key, 6)
    return {
        "mu_causal": sd * jax.random.normal(ks[0], (n_envs, z), jnp.float32),
        "low_rank_causal": sd * jax.random.normal(ks[1], (n_envs, z, rank), jnp.float32),
        "diag_causal": sd * jax.random.normal(ks[2], (n_envs, z), jnp.float32),
        "mu_spurious": sd * jax.random.normal(ks[3], (n_classes, n_envs, z), jnp.float32),
        "low_rank_spurious": sd * jax.random.normal(ks[4], (n_classes, n_envs, z, rank), jnp.float32),
        "diag_spurious": sd * jax.random.normal(ks[5], (n_classes, n_envs, z), jnp.float32),
    }


# ------------------------- pure-JAX reference --------------------------------
def prior_reference(params, y, e):
    mu_c = params["mu_causal"][e]
    lr_c = params["low_rank_causal"][e]
    d_c = params["diag_causal"][e]
    mu_s = params["mu_spurious"][y, e]
    lr_s = params["low_rank_spurious"][y, e]
    d_s = params["diag_spurious"][y, e]

    def arr_to_cov(lr, d):
        llt = jnp.einsum("bir,bjr->bij", lr, lr, precision=lax.Precision.HIGHEST)
        return llt + jax.vmap(jnp.diag)(_softplus(d) + _F32_EPS)

    cov_c = arr_to_cov(lr_c, d_c)
    cov_s = arr_to_cov(lr_s, d_s)
    mu = jnp.concatenate([mu_c, mu_s], axis=-1)
    bsz, z = mu_c.shape
    cov = jnp.zeros((bsz, 2 * z, 2 * z), jnp.float32)
    cov = cov.at[:, :z, :z].set(cov_c)
    cov = cov.at[:, z:, z:].set(cov_s)
    return mu, cov


if __name__ == "__main__":
    Z_SIZE, RANK, N_ENVS, N_CLASSES, BATCH = 64, 8, 2, 2, 8
    PRIOR_INIT_SD = 0.1

    key = jax.random.PRNGKey(0)
    k_p, k_y, k_e = jax.random.split(key, 3)
    params = init_params(k_p, Z_SIZE, RANK, N_ENVS, N_CLASSES, PRIOR_INIT_SD)
    y = jax.random.randint(k_y, (BATCH,), 0, N_CLASSES, dtype=jnp.int32)
    e = jax.random.randint(k_e, (BATCH,), 0, N_ENVS, dtype=jnp.int32)

    mu, cov = jax.block_until_ready(prior_forward(params, y, e))
    assert mu.shape == (BATCH, 2 * Z_SIZE), mu.shape
    assert cov.shape == (BATCH, 2 * Z_SIZE, 2 * Z_SIZE), cov.shape

    mu_ref, cov_ref = jax.block_until_ready(prior_reference(params, y, e))
    np.testing.assert_allclose(np.asarray(mu), np.asarray(mu_ref), rtol=1e-5, atol=1e-5)
    np.testing.assert_allclose(np.asarray(cov), np.asarray(cov_ref), rtol=1e-5, atol=1e-5)

    print("KERNEL_OK")
</pallas_src>

<mosaic_0001>
module attributes {stable_mosaic.version = 11 : i64} {
  func.func @_prior_kernel(%arg0: i32, %arg1: memref<8xi32, #tpu.memory_space<smem>>, %arg2: memref<8xi32, #tpu.memory_space<smem>>, %arg3: memref<4x1x128xf32, #tpu.memory_space<vmem>>, %arg4: memref<4x1x128xf32, #tpu.memory_space<vmem>>, %arg5: memref<4x8x128xf32, #tpu.memory_space<vmem>>, %arg6: memref<4x1x128xf32, #tpu.memory_space<vmem>>, %arg7: memref<4x128x128xf32, #tpu.memory_space<vmem>>) attributes {dimension_semantics = [#tpu.dimension_semantics<parallel>], iteration_bounds = array<i64: 2>, scalar_prefetch = 2 : i64, scratch_operands = 0 : i64, tpu.core_type = #tpu.core_type<tc>, window_params = [{pipeline_mode = #tpu.pipeline_mode<synchronous>, transform_indices = @transform_0, window_bounds = array<i64: 4, 1, 128>}, {pipeline_mode = #tpu.pipeline_mode<synchronous>, transform_indices = @transform_1, window_bounds = array<i64: 4, 1, 128>}, {pipeline_mode = #tpu.pipeline_mode<synchronous>, transform_indices = @transform_2, window_bounds = array<i64: 4, 8, 128>}, {transform_indices = @transform_3, window_bounds = array<i64: 4, 1, 128>}, {transform_indices = @transform_4, window_bounds = array<i64: 4, 128, 128>}]} {
    %0 = tpu.iota {dimensions = array<i32: 0>} : vector<128x128xi32>
    %1 = tpu.iota {dimensions = array<i32: 1>} : vector<128x128xi32>
    %2 = arith.cmpi eq, %0, %1 : vector<128x128xi32>
    %c64_i32 = arith.constant 64 : i32
    %3 = vector.broadcast %c64_i32 : i32 to vector<128x128xi32>
    %4 = arith.cmpi slt, %0, %3 : vector<128x128xi32>
    %c64_i32_0 = arith.constant 64 : i32
    %5 = vector.broadcast %c64_i32_0 : i32 to vector<128x128xi32>
    %6 = arith.cmpi slt, %1, %5 : vector<128x128xi32>
    %7 = arith.xori %4, %6 : vector<128x128xi1>
    %cst = arith.constant dense<true> : vector<128x128xi1>
    %8 = arith.xori %7, %cst : vector<128x128xi1>
    %c0_i32 = arith.constant 0 : i32
    %c4_i32 = arith.constant 4 : i32
    %9 = arith.muli %arg0, %c4_i32 : i32
    %10 = arith.addi %9, %c0_i32 : i32
    %11 = arith.index_cast %10 : i32 to index
    %12 = memref.load %arg1[%11] : memref<8xi32, #tpu.memory_space<smem>>
    %c2_i32 = arith.constant 2 : i32
    %13 = arith.muli %12, %c2_i32 : i32
    %14 = arith.index_cast %10 : i32 to index
    %15 = memref.load %arg2[%14] : memref<8xi32, #tpu.memory_space<smem>>
    %16 = arith.addi %13, %15 : i32
    %17 = arith.index_cast %16 : i32 to index
    %c0 = arith.constant 0 : index
    %c0_1 = arith.constant 0 : index
    %18 = vector.load %arg5[%17, %c0, %c0_1] : memref<4x8x128xf32, #tpu.memory_space<vmem>>, vector<1x8x128xf32>
    %19 = vector.shape_cast %18 : vector<1x8x128xf32> to vector<8x128xf32>
    %20 = arith.index_cast %16 : i32 to index
    %c0_2 = arith.constant 0 : index
    %c0_3 = arith.constant 0 : index
    %21 = vector.load %arg4[%20, %c0_2, %c0_3] : memref<4x1x128xf32, #tpu.memory_space<vmem>>, vector<1x1x128xf32>
    %22 = vector.shape_cast %21 : vector<1x1x128xf32> to vector<1x128xf32>
    %cst_4 = arith.constant dense<0.000000e+00> : vector<128x128xf32>
    %23 = tpu.matmul %19, %19, %cst_4 {dimension_numbers = #tpu.dot_dimension_numbers<[0], [0], [1], [1], [0, 1, 1, 1], [], []>, precision = #tpu.contract_precision<fp32>} : vector<8x128xf32>, vector<8x128xf32>, vector<128x128xf32> -> vector<128x128xf32>
    %cst_5 = arith.constant 0.000000e+00 : f32
    %24 = vector.broadcast %cst_5 : f32 to vector<1x128xf32>
    %25 = arith.maximumf %22, %24 : vector<1x128xf32>
    %26 = math.absf %22 : vector<1x128xf32>
    %cst_6 = arith.constant 0.000000e+00 : f32
    %27 = vector.broadcast %cst_6 : f32 to vector<1x128xf32>
    %28 = arith.subf %27, %26 : vector<1x128xf32>
    %29 = math.exp %28 : vector<1x128xf32>
    %30 = math.log1p %29 : vector<1x128xf32>
    %31 = arith.addf %25, %30 : vector<1x128xf32>
    %cst_7 = arith.constant 1.1920929E-7 : f32
    %32 = vector.broadcast %cst_7 : f32 to vector<1x128xf32>
    %33 = arith.addf %31, %32 : vector<1x128xf32>
    %cst_8 = arith.constant 0.000000e+00 : f32
    %34 = vector.shape_cast %33 : vector<1x128xf32> to vector<1x128xf32>
    %35 = vector.broadcast %34 : vector<1x128xf32> to vector<128x128xf32>
    %36 = vector.broadcast %cst_8 : f32 to vector<128x128xf32>
    %37 = arith.select %2, %35, %36 : vector<128x128xi1>, vector<128x128xf32>
    %cst_9 = arith.constant 0.000000e+00 : f32
    %38 = vector.broadcast %cst_9 : f32 to vector<128x128xf32>
    %39 = arith.select %8, %23, %38 : vector<128x128xi1>, vector<128x128xf32>
    %40 = arith.addf %39, %37 : vector<128x128xf32>
    %41 = arith.index_cast %c0_i32 : i32 to index
    %c0_10 = arith.constant 0 : index
    %c0_11 = arith.constant 0 : index
    %42 = vector.load %arg7[%41, %c0_10, %c0_11] : memref<4x128x128xf32, #tpu.memory_space<vmem>>, vector<1x128x128xf32>
    %43 = vector.shape_cast %42 : vector<1x128x128xf32> to vector<128x128xf32>
    %44 = vector.shape_cast %40 : vector<128x128xf32> to vector<1x128x128xf32>
    tpu.vector_store %arg7[%41, %c0_10, %c0_11], %44 {strides = array<i32>} : memref<4x128x128xf32, #tpu.memory_space<vmem>>, vector<1x128x128xf32>,
    %45 = arith.index_cast %16 : i32 to index
    %c0_12 = arith.constant 0 : index
    %c0_13 = arith.constant 0 : index
    %46 = vector.load %arg3[%45, %c0_12, %c0_13] : memref<4x1x128xf32, #tpu.memory_space<vmem>>, vector<1x1x128xf32>
    %47 = vector.shape_cast %46 : vector<1x1x128xf32> to vector<1x128xf32>
    %48 = arith.index_cast %c0_i32 : i32 to index
    %c0_14 = arith.constant 0 : index
    %c0_15 = arith.constant 0 : index
    %49 = vector.load %arg6[%48, %c0_14, %c0_15] : memref<4x1x128xf32, #tpu.memory_space<vmem>>, vector<1x1x128xf32>
    %50 = vector.shape_cast %49 : vector<1x1x128xf32> to vector<1x128xf32>
    %51 = vector.shape_cast %47 : vector<1x128xf32> to vector<1x1x128xf32>
    tpu.vector_store %arg6[%48, %c0_14, %c0_15], %51 {strides = array<i32>} : memref<4x1x128xf32, #tpu.memory_space<vmem>>, vector<1x1x128xf32>,
    %c1_i32 = arith.constant 1 : i32
    %c4_i32_16 = arith.constant 4 : i32
    %52 = arith.muli %arg0, %c4_i32_16 : i32
    %53 = arith.addi %52, %c1_i32 : i32
    %54 = arith.index_cast %53 : i32 to index
    %55 = memref.load %arg1[%54] : memref<8xi32, #tpu.memory_space<smem>>
    %c2_i32_17 = arith.constant 2 : i32
    %56 = arith.muli %55, %c2_i32_17 : i32
    %57 = arith.index_cast %53 : i32 to index
    %58 = memref.load %arg2[%57] : memref<8xi32, #tpu.memory_space<smem>>
    %59 = arith.addi %56, %58 : i32
    %60 = arith.index_cast %59 : i32 to index
    %c0_18 = arith.constant 0 : index
    %c0_19 = arith.constant 0 : index
    %61 = vector.load %arg5[%60, %c0_18, %c0_19] : memref<4x8x128xf32, #tpu.memory_space<vmem>>, vector<1x8x128xf32>
    %62 = vector.shape_cast %61 : vector<1x8x128xf32> to vector<8x128xf32>
    %63 = arith.index_cast %59 : i32 to index
    %c0_20 = arith.constant 0 : index
    %c0_21 = arith.constant 0 : index
    %64 = vector.load %arg4[%63, %c0_20, %c0_21] : memref<4x1x128xf32, #tpu.memory_space<vmem>>, vector<1x1x128xf32>
    %65 = vector.shape_cast %64 : vector<1x1x128xf32> to vector<1x128xf32>
    %cst_22 = arith.constant dense<0.000000e+00> : vector<128x128xf32>
    %66 = tpu.matmul %62, %62, %cst_22 {dimension_numbers = #tpu.dot_dimension_numbers<[0], [0], [1], [1], [0, 1, 1, 1], [], []>, precision = #tpu.contract_precision<fp32>} : vector<8x128xf32>, vector<8x128xf32>, vector<128x128xf32> -> vector<128x128xf32>
    %cst_23 = arith.constant 0.000000e+00 : f32
    %67 = vector.broadcast %cst_23 : f32 to vector<1x128xf32>
    %68 = arith.maximumf %65, %67 : vector<1x128xf32>
    %69 = math.absf %65 : vector<1x128xf32>
    %cst_24 = arith.constant 0.000000e+00 : f32
    %70 = vector.broadcast %cst_24 : f32 to vector<1x128xf32>
    %71 = arith.subf %70, %69 : vector<1x128xf32>
    %72 = math.exp %71 : vector<1x128xf32>
    %73 = math.log1p %72 : vector<1x128xf32>
    %74 = arith.addf %68, %73 : vector<1x128xf32>
    %cst_25 = arith.constant 1.1920929E-7 : f32
    %75 = vector.broadcast %cst_25 : f32 to vector<1x128xf32>
    %76 = arith.addf %74, %75 : vector<1x128xf32>
    %cst_26 = arith.constant 0.000000e+00 : f32
    %77 = vector.shape_cast %76 : vector<1x128xf32> to vector<1x128xf32>
    %78 = vector.broadcast %77 : vector<1x128xf32> to vector<128x128xf32>
    %79 = vector.broadcast %cst_26 : f32 to vector<128x128xf32>
    %80 = arith.select %2, %78, %79 : vector<128x128xi1>, vector<128x128xf32>
    %cst_27 = arith.constant 0.000000e+00 : f32
    %81 = vector.broadcast %cst_27 : f32 to vector<128x128xf32>
    %82 = arith.select %8, %66, %81 : vector<128x128xi1>, vector<128x128xf32>
    %83 = arith.addf %82, %80 : vector<128x128xf32>
    %84 = arith.index_cast %c1_i32 : i32 to index
    %c0_28 = arith.constant 0 : index
    %c0_29 = arith.constant 0 : index
    %85 = vector.load %arg7[%84, %c0_28, %c0_29] : memref<4x128x128xf32, #tpu.memory_space<vmem>>, vector<1x128x128xf32>
    %86 = vector.shape_cast %85 : vector<1x128x128xf32> to vector<128x128xf32>
    %87 = vector.shape_cast %83 : vector<128x128xf32> to vector<1x128x128xf32>
    tpu.vector_store %arg7[%84, %c0_28, %c0_29], %87 {strides = array<i32>} : memref<4x128x128xf32, #tpu.memory_space<vmem>>, vector<1x128x128xf32>,
    %88 = arith.index_cast %59 : i32 to index
    %c0_30 = arith.constant 0 : index
    %c0_31 = arith.constant 0 : index
    %89 = vector.load %arg3[%88, %c0_30, %c0_31] : memref<4x1x128xf32, #tpu.memory_space<vmem>>, vector<1x1x128xf32>
    %90 = vector.shape_cast %89 : vector<1x1x128xf32> to vector<1x128xf32>
    %91 = arith.index_cast %c1_i32 : i32 to index
    %c0_32 = arith.constant 0 : index
    %c0_33 = arith.constant 0 : index
    %92 = vector.load %arg6[%91, %c0_32, %c0_33] : memref<4x1x128xf32, #tpu.memory_space<vmem>>, vector<1x1x128xf32>
    %93 = vector.shape_cast %92 : vector<1x1x128xf32> to vector<1x128xf32>
    %94 = vector.shape_cast %90 : vector<1x128xf32> to vector<1x1x128xf32>
    tpu.vector_store %arg6[%91, %c0_32, %c0_33], %94 {strides = array<i32>} : memref<4x1x128xf32, #tpu.memory_space<vmem>>, vector<1x1x128xf32>,
    %c2_i32_34 = arith.constant 2 : i32
    %c4_i32_35 = arith.constant 4 : i32
    %95 = arith.muli %arg0, %c4_i32_35 : i32
    %96 = arith.addi %95, %c2_i32_34 : i32
    %97 = arith.index_cast %96 : i32 to index
    %98 = memref.load %arg1[%97] : memref<8xi32, #tpu.memory_space<smem>>
    %c2_i32_36 = arith.constant 2 : i32
    %99 = arith.muli %98, %c2_i32_36 : i32
    %100 = arith.index_cast %96 : i32 to index
    %101 = memref.load %arg2[%100] : memref<8xi32, #tpu.memory_space<smem>>
    %102 = arith.addi %99, %101 : i32
    %103 = arith.index_cast %102 : i32 to index
    %c0_37 = arith.constant 0 : index
    %c0_38 = arith.constant 0 : index
    %104 = vector.load %arg5[%103, %c0_37, %c0_38] : memref<4x8x128xf32, #tpu.memory_space<vmem>>, vector<1x8x128xf32>
    %105 = vector.shape_cast %104 : vector<1x8x128xf32> to vector<8x128xf32>
    %106 = arith.index_cast %102 : i32 to index
    %c0_39 = arith.constant 0 : index
    %c0_40 = arith.constant 0 : index
    %107 = vector.load %arg4[%106, %c0_39, %c0_40] : memref<4x1x128xf32, #tpu.memory_space<vmem>>, vector<1x1x128xf32>
    %108 = vector.shape_cast %107 : vector<1x1x128xf32> to vector<1x128xf32>
    %cst_41 = arith.constant dense<0.000000e+00> : vector<128x128xf32>
    %109 = tpu.matmul %105, %105, %cst_41 {dimension_numbers = #tpu.dot_dimension_numbers<[0], [0], [1], [1], [0, 1, 1, 1], [], []>, precision = #tpu.contract_precision<fp32>} : vector<8x128xf32>, vector<8x128xf32>, vector<128x128xf32> -> vector<128x128xf32>
    %cst_42 = arith.constant 0.000000e+00 : f32
    %110 = vector.broadcast %cst_42 : f32 to vector<1x128xf32>
    %111 = arith.maximumf %108, %110 : vector<1x128xf32>
    %112 = math.absf %108 : vector<1x128xf32>
    %cst_43 = arith.constant 0.000000e+00 : f32
    %113 = vector.broadcast %cst_43 : f32 to vector<1x128xf32>
    %114 = arith.subf %113, %112 : vector<1x128xf32>
    %115 = math.exp %114 : vector<1x128xf32>
    %116 = math.log1p %115 : vector<1x128xf32>
    %117 = arith.addf %111, %116 : vector<1x128xf32>
    %cst_44 = arith.constant 1.1920929E-7 : f32
    %118 = vector.broadcast %cst_44 : f32 to vector<1x128xf32>
    %119 = arith.addf %117, %118 : vector<1x128xf32>
    %cst_45 = arith.constant 0.000000e+00 : f32
    %120 = vector.shape_cast %119 : vector<1x128xf32> to vector<1x128xf32>
    %121 = vector.broadcast %120 : vector<1x128xf32> to vector<128x128xf32>
    %122 = vector.broadcast %cst_45 : f32 to vector<128x128xf32>
    %123 = arith.select %2, %121, %122 : vector<128x128xi1>, vector<128x128xf32>
    %cst_46 = arith.constant 0.000000e+00 : f32
    %124 = vector.broadcast %cst_46 : f32 to vector<128x128xf32>
    %125 = arith.select %8, %109, %124 : vector<128x128xi1>, vector<128x128xf32>
    %126 = arith.addf %125, %123 : vector<128x128xf32>
    %127 = arith.index_cast %c2_i32_34 : i32 to index
    %c0_47 = arith.constant 0 : index
    %c0_48 = arith.constant 0 : index
    %128 = vector.load %arg7[%127, %c0_47, %c0_48] : memref<4x128x128xf32, #tpu.memory_space<vmem>>, vector<1x128x128xf32>
    %129 = vector.shape_cast %128 : vector<1x128x128xf32> to vector<128x128xf32>
    %130 = vector.shape_cast %126 : vector<128x128xf32> to vector<1x128x128xf32>
    tpu.vector_store %arg7[%127, %c0_47, %c0_48], %130 {strides = array<i32>} : memref<4x128x128xf32, #tpu.memory_space<vmem>>, vector<1x128x128xf32>,
    %131 = arith.index_cast %102 : i32 to index
    %c0_49 = arith.constant 0 : index
    %c0_50 = arith.constant 0 : index
    %132 = vector.load %arg3[%131, %c0_49, %c0_50] : memref<4x1x128xf32, #tpu.memory_space<vmem>>, vector<1x1x128xf32>
    %133 = vector.shape_cast %132 : vector<1x1x128xf32> to vector<1x128xf32>
    %134 = arith.index_cast %c2_i32_34 : i32 to index
    %c0_51 = arith.constant 0 : index
    %c0_52 = arith.constant 0 : index
    %135 = vector.load %arg6[%134, %c0_51, %c0_52] : memref<4x1x128xf32, #tpu.memory_space<vmem>>, vector<1x1x128xf32>
    %136 = vector.shape_cast %135 : vector<1x1x128xf32> to vector<1x128xf32>
    %137 = vector.shape_cast %133 : vector<1x128xf32> to vector<1x1x128xf32>
    tpu.vector_store %arg6[%134, %c0_51, %c0_52], %137 {strides = array<i32>} : memref<4x1x128xf32, #tpu.memory_space<vmem>>, vector<1x1x128xf32>,
    %c3_i32 = arith.constant 3 : i32
    %c4_i32_53 = arith.constant 4 : i32
    %138 = arith.muli %arg0, %c4_i32_53 : i32
    %139 = arith.addi %138, %c3_i32 : i32
    %140 = arith.index_cast %139 : i32 to index
    %141 = memref.load %arg1[%140] : memref<8xi32, #tpu.memory_space<smem>>
    %c2_i32_54 = arith.constant 2 : i32
    %142 = arith.muli %141, %c2_i32_54 : i32
    %143 = arith.index_cast %139 : i32 to index
    %144 = memref.load %arg2[%143] : memref<8xi32, #tpu.memory_space<smem>>
    %145 = arith.addi %142, %144 : i32
    %146 = arith.index_cast %145 : i32 to index
    %c0_55 = arith.constant 0 : index
    %c0_56 = arith.constant 0 : index
    %147 = vector.load %arg5[%146, %c0_55, %c0_56] : memref<4x8x128xf32, #tpu.memory_space<vmem>>, vector<1x8x128xf32>
    %148 = vector.shape_cast %147 : vector<1x8x128xf32> to vector<8x128xf32>
    %149 = arith.index_cast %145 : i32 to index
    %c0_57 = arith.constant 0 : index
    %c0_58 = arith.constant 0 : index
    %150 = vector.load %arg4[%149, %c0_57, %c0_58] : memref<4x1x128xf32, #tpu.memory_space<vmem>>, vector<1x1x128xf32>
    %151 = vector.shape_cast %150 : vector<1x1x128xf32> to vector<1x128xf32>
    %cst_59 = arith.constant dense<0.000000e+00> : vector<128x128xf32>
    %152 = tpu.matmul %148, %148, %cst_59 {dimension_numbers = #tpu.dot_dimension_numbers<[0], [0], [1], [1], [0, 1, 1, 1], [], []>, precision = #tpu.contract_precision<fp32>} : vector<8x128xf32>, vector<8x128xf32>, vector<128x128xf32> -> vector<128x128xf32>
    %cst_60 = arith.constant 0.000000e+00 : f32
    %153 = vector.broadcast %cst_60 : f32 to vector<1x128xf32>
    %154 = arith.maximumf %151, %153 : vector<1x128xf32>
    %155 = math.absf %151 : vector<1x128xf32>
    %cst_61 = arith.constant 0.000000e+00 : f32
    %156 = vector.broadcast %cst_61 : f32 to vector<1x128xf32>
    %157 = arith.subf %156, %155 : vector<1x128xf32>
    %158 = math.exp %157 : vector<1x128xf32>
    %159 = math.log1p %158 : vector<1x128xf32>
    %160 = arith.addf %154, %159 : vector<1x128xf32>
    %cst_62 = arith.constant 1.1920929E-7 : f32
    %161 = vector.broadcast %cst_62 : f32 to vector<1x128xf32>
    %162 = arith.addf %160, %161 : vector<1x128xf32>
    %cst_63 = arith.constant 0.000000e+00 : f32
    %163 = vector.shape_cast %162 : vector<1x128xf32> to vector<1x128xf32>
    %164 = vector.broadcast %163 : vector<1x128xf32> to vector<128x128xf32>
    %165 = vector.broadcast %cst_63 : f32 to vector<128x128xf32>
    %166 = arith.select %2, %164, %165 : vector<128x128xi1>, vector<128x128xf32>
    %cst_64 = arith.constant 0.000000e+00 : f32
    %167 = vector.broadcast %cst_64 : f32 to vector<128x128xf32>
    %168 = arith.select %8, %152, %167 : vector<128x128xi1>, vector<128x128xf32>
    %169 = arith.addf %168, %166 : vector<128x128xf32>
    %170 = arith.index_cast %c3_i32 : i32 to index
    %c0_65 = arith.constant 0 : index
    %c0_66 = arith.constant 0 : index
    %171 = vector.load %arg7[%170, %c0_65, %c0_66] : memref<4x128x128xf32, #tpu.memory_space<vmem>>, vector<1x128x128xf32>
    %172 = vector.shape_cast %171 : vector<1x128x128xf32> to vector<128x128xf32>
    %173 = vector.shape_cast %169 : vector<128x128xf32> to vector<1x128x128xf32>
    tpu.vector_store %arg7[%170, %c0_65, %c0_66], %173 {strides = array<i32>} : memref<4x128x128xf32, #tpu.memory_space<vmem>>, vector<1x128x128xf32>,
    %174 = arith.index_cast %145 : i32 to index
    %c0_67 = arith.constant 0 : index
    %c0_68 = arith.constant 0 : index
    %175 = vector.load %arg3[%174, %c0_67, %c0_68] : memref<4x1x128xf32, #tpu.memory_space<vmem>>, vector<1x1x128xf32>
    %176 = vector.shape_cast %175 : vector<1x1x128xf32> to vector<1x128xf32>
    %177 = arith.index_cast %c3_i32 : i32 to index
    %c0_69 = arith.constant 0 : index
    %c0_70 = arith.constant 0 : index
    %178 = vector.load %arg6[%177, %c0_69, %c0_70] : memref<4x1x128xf32, #tpu.memory_space<vmem>>, vector<1x1x128xf32>
    %179 = vector.shape_cast %178 : vector<1x1x128xf32> to vector<1x128xf32>
    %180 = vector.shape_cast %176 : vector<1x128xf32> to vector<1x1x128xf32>
    tpu.vector_store %arg6[%177, %c0_69, %c0_70], %180 {strides = array<i32>} : memref<4x1x128xf32, #tpu.memory_space<vmem>>, vector<1x1x128xf32>,
    %c4_i32_71 = arith.constant 4 : i32
    return
  }
  func.func @transform_0(%arg0: i32, %arg1: memref<8xi32, #tpu.memory_space<smem>>, %arg2: memref<8xi32, #tpu.memory_space<smem>>) -> (i32, i32, i32) {
    %c0_i32 = arith.constant 0 : i32
    %c0_i32_0 = arith.constant 0 : i32
    %c0_i32_1 = arith.constant 0 : i32
    %c0_i32_2 = arith.constant 0 : i32
    return %c0_i32, %c0_i32_0, %c0_i32_1 : i32, i32, i32
  }
  func.func @transform_1(%arg0: i32, %arg1: memref<8xi32, #tpu.memory_space<smem>>, %arg2: memref<8xi32, #tpu.memory_space<smem>>) -> (i32, i32, i32) {
    %c0_i32 = arith.constant 0 : i32
    %c0_i32_0 = arith.constant 0 : i32
    %c0_i32_1 = arith.constant 0 : i32
    %c0_i32_2 = arith.constant 0 : i32
    return %c0_i32, %c0_i32_0, %c0_i32_1 : i32, i32, i32
  }
  func.func @transform_2(%arg0: i32, %arg1: memref<8xi32, #tpu.memory_space<smem>>, %arg2: memref<8xi32, #tpu.memory_space<smem>>) -> (i32, i32, i32) {
    %c0_i32 = arith.constant 0 : i32
    %c0_i32_0 = arith.constant 0 : i32
    %c0_i32_1 = arith.constant 0 : i32
    %c0_i32_2 = arith.constant 0 : i32
    return %c0_i32, %c0_i32_0, %c0_i32_1 : i32, i32, i32
  }
  func.func @transform_3(%arg0: i32, %arg1: memref<8xi32, #tpu.memory_space<smem>>, %arg2: memref<8xi32, #tpu.memory_space<smem>>) -> (i32, i32, i32) {
    %c0_i32 = arith.constant 0 : i32
    %c0_i32_0 = arith.constant 0 : i32
    %c0_i32_1 = arith.constant 0 : i32
    return %arg0, %c0_i32, %c0_i32_0 : i32, i32, i32
  }
  func.func @transform_4(%arg0: i32, %arg1: memref<8xi32, #tpu.memory_space<smem>>, %arg2: memref<8xi32, #tpu.memory_space<smem>>) -> (i32, i32, i32) {
    %c0_i32 = arith.constant 0 : i32
    %c0_i32_0 = arith.constant 0 : i32
    %c0_i32_1 = arith.constant 0 : i32
    return %arg0, %c0_i32, %c0_i32_0 : i32, i32, i32
  }
}

</mosaic_0001>

<bundles_post_ra>
// kernel: prior_forward.1
= control target key start
LH: loop header
LB: loop body
LE: loop exit
PB: predicated region body
PF: predicated region fallthrough
CT: control target
= control target key end

     0   :  { %s3869_s27 = smov [#allocation3]   ;;  %s3870_s28 = smov [#allocation4]   ;;  %s5701_s0 = inlined_call_operand.vmem [shape: s32[8], index: 0, kind: input, shape index: {}]   ;;  %s5702_s2 = inlined_call_operand.vmem [shape: f32[4,1,128], index: 2, kind: input, shape index: {}]   ;;  %s5703_s3 = inlined_call_operand.vmem [shape: f32[4,1,128], index: 3, kind: input, shape index: {}]   ;;  %s5704_s4 = inlined_call_operand.vmem [shape: f32[4,8,128], index: 4, kind: input, shape index: {}]   ;;  %s5705_s5 = inlined_call_operand.hbm [shape: f32[8,1,128], index: 5, kind: output, shape index: {0}]   ;;  %s5706_s6 = inlined_call_operand.hbm [shape: f32[8,128,128], index: 6, kind: output, shape index: {1}]   ;;  %s5707_s1 = inlined_call_operand.vmem [shape: s32[8], index: 1, kind: input, shape index: {}]  }
   0x1   :  { %s13_s23 = sshll.u32 %s5701_s0, 4  ;;  %s18_s26 = sshll.u32 %s5707_s1, 4  ;;  %s14_s23 = int_to_ptr.vmem [resolvable:$true] %s13_s23  ;;  %s19_s26 = int_to_ptr.vmem [resolvable:$true] %s18_s26 }
   0x2   :  { %16 = dma.vmem_to_smem %s14_s23, 16, %s3869_s27, [#allocation2] }
   0x3   :  { %21 = dma.vmem_to_smem %s19_s26, 16, %s3870_s28, [#allocation2] }
   0x4   :  { %3843 = dma.done.wait [#allocation2], 32 }
   0x5   :  { %3844 = vsyncadd [#allocation2], 4294967264 }
   0x6   :  { %24 = sfence }
   0x7   :  { %25 = vsyncpa [#allocation6], 0 }
   0x8   :  { %27 = vsyncpa [#allocation6 + $0x1], 0 }
   0x9   :  { %28 = vsyncpa [#allocation8], 0 }
   0xa   :  { %30 = vsyncpa [#allocation8 + $0x1], 0  ;;  %s3917_s29 = smov 0   ;;  %s3919_s0 = smov 0  }
   0xb   :  { %s3921_s30 = smov 0   ;;  %s3923_s1 = smov 0  }
   0xc LB: > { %s3938_s7 = sadd.s32 4294967295, %s3867_s1   ;;  %s3604_s8 = sadd.s32 4294967294, %s3867_s1   ;;  %s3867_s1 = sphi %s3923_s1, %s5905_s1   ;;  %s3863_s30 = sphi %s3921_s30, %s5904_s30   ;;  %s3859_s0 = sphi %s3919_s0, %s5903_s0   ;;  %s3855_s29 = sphi %s3917_s29, %s5902_s29  }
   0xd   : > { %s3942_s9 = sadd.s32 1, %s3867_s1   ;;  %s106_s10 = sadd.s32 1, %s3863_s30 }
   0xe   : > { %s103_s11 = ssub.s32 %s3867_s1, %s3942_s9  ;;  %p116_p0 = scmp.ne.s32.totalorder %s3863_s30, %s3859_s0 }
   0xf   : > { %p104_p1 = scmp.eq.s32.totalorder %s103_s11, 0  ;;  %p117_p2 = scmp.eq.s32.totalorder %s3938_s7, 1 }
  0x10   : > { %p122_p3 = scmp.ne.s32.totalorder %s3859_s0, %s3855_s29  ;;  %p123_p4 = scmp.eq.s32.totalorder %s3604_s8, 1 }
  0x11   : > { %s3953_s12 = scalar_select %p104_p1, %s3863_s30, %s106_s10  }
  0x12   : > { %p3955_p5 = por %p117_p2, %p116_p0  ;;  %p3959_p6 = por %p123_p4, %p122_p3 }
  0x13   : > { %5790 = sst [smem:[#allocation12_spill]] %s3953_s12  ;;  %p3606_p7 = scmp.ge.s32.totalorder %s3867_s1, 1 }
  0x14   : > { %p176_p8 = scmp.lt.s32.totalorder %s3867_s1, 3 }
  0x16   : > { %p177_p9 = pnand %p3606_p7, %p176_p8 }
  0x18   : > { %180 = sbr.rel (%p177_p9) target bundleno = 1121 (0x461), region = 32 }
  0x1d   : > { %s3966_s15 = sshll.u32 %s3938_s7, 2  ;;  %s3972_s19 = sand.u32 1, %s3859_s0   ;;  %vm330_vm0 = vcmask 64512   ;;  %vm3871_vm3 = vmmov 1  }
  0x1e   : > { %s289_s16 = sld [smem:[#allocation3 + %s3966_s15]]  ;;  %s1076_s18 = sadd.s32 1, %s3966_s15 }
  0x1f   : > { %s291_s17 = sld [smem:[#allocation4 + %s3966_s15]]  ;;  %s3607_s21 = sshll.u32 %s3972_s19, 2 }
  0x20   : > { %s1077_s20 = sld [smem:[#allocation3 + %s1076_s18]]  ;;  %s3985_s12 = scalar_lea.vmem [#allocation5], %s3607_s21 }
  0x21   : > { %s1079_s22 = sld [smem:[#allocation4 + %s1076_s18]] }
  0x24   : > { %s3610_s23 = sshll.u32 %s289_s16, 1 }
  0x25   : > { %s3975_s24 = sadd.s32 %s3610_s23, %s291_s17 }
  0x26   : > { %s3611_s25 = sshll.u32 %s3975_s24, 3  ;;  %s1073_s11 = scalar_lea.vmem %s5702_s2, %s3975_s24 }
  0x27   : > { %s294_s28 = scalar_lea.vmem %s5704_s4, %s3611_s25  ;;  %v1074_v1 = vld [vmem:[%s1073_s11] sm:$0x1]  ;;  %s3612_s16 = sshll.u32 %s1077_s20, 1 }
  0x28   : > { %v295_v0 = vld [vmem:[%s294_s28] sm:$0xff]  ;;  %1075 = vst [vmem:[%s3985_s12] sm:$0x1] %v1074_v1  ;;  %s3988_s17 = sadd.s32 %s3612_s16, %s1079_s22  ;;  %s1865_s20 = sadd.s32 2, %s3966_s15 }
  0x29   : > { %298 = vxpose.xlu0.b32.start.end [1/1] (short) %v295_v0, 128  ;;  %v394_v2 = vand.u32 4294901760, %v295_v0  ;;  %s3613_s18 = sshll.u32 %s3988_s17, 3  ;;  %s1861_s21 = scalar_lea.vmem %s5702_s2, %s3988_s17 }
  0x2a   : > { %s1082_s26 = scalar_lea.vmem %s5704_s4, %s3613_s18  ;;  %v1862_v5 = vld [vmem:[%s1861_s21] sm:$0x1]  ;;  %s1866_s22 = sld [smem:[#allocation3 + %s1865_s20]] }
  0x2b   : > { %v541_v3 = vsub.f32 %v295_v0, %v394_v2  ;;  %726 = vmatpush.msra.mxu3 %v394_v2  ;;  %395 = vmatpush.msra.mxu0 %v394_v2  ;;  %v1083_v4 = vld [vmem:[%s1082_s26] sm:$0xff]  ;;  %3630 = vst [vmem:[%s3985_s12 + $0x1] sm:$0x1] %v1862_v5  ;;  %s1868_s8 = sld [smem:[#allocation4 + %s1865_s20]]  ;;  %s3459_s20 = scalar_lea.hbm %s5705_s5, %s3966_s15 }
  0x2c   : > { %v1181_v6 = vand.u32 4294901760, %v1083_v4 }
  0x2d   : > { %628 = vmatpush.msra.mxu2 %v541_v3  ;;  %v542_v7 = vand.u32 4294901760, %v541_v3 }
  0x2e   : > { %v1328_v10 = vsub.f32 %v1083_v4, %v1181_v6 }
  0x2f   : > { %1182 = vmatpush.msrb.mxu2 %v1181_v6  ;;  %v543_v8 = vsub.f32 %v541_v3, %v542_v7  ;;  %842 = vmatpush.msrb.mxu0 %v542_v7 }
  0x30   : > { %v1329_v11 = vand.u32 4294901760, %v1328_v10  ;;  %s3631_s10 = sshll.u32 %s1866_s22, 1  ;;  %s296_s22 = scalar_lea.vmem %s5703_s3, %s3975_s24 }
  0x31   : > { %v544_v9 = vand.u32 4294901760, %v543_v8  ;;  %s4160_s11 = sadd.s32 %s3631_s10, %s1868_s8  ;;  %s3608_s24 = sshll.u32 %s3972_s19, 9 }
  0x32   : > { %v1330_v12 = vsub.f32 %v1328_v10, %v1329_v11  ;;  %s3632_s16 = sshll.u32 %s4160_s11, 3  ;;  %s2650_s28 = scalar_lea.vmem %s5702_s2, %s4160_s11 }
  0x33   : > { %545 = vmatpush.msra.mxu1 %v544_v9  ;;  %s1871_s25 = scalar_lea.vmem %s5704_s4, %s3632_s16  ;;  %s4396_s8 = scalar_lea.vmem [#allocation7], %s3608_s24 }
  0x34   : > { %v1331_v13 = vand.u32 4294901760, %v1330_v12  ;;  %s2654_s10 = sadd.s32 3, %s3966_s15 }
  0x35   : > { %924 = vmatpush.msrb.mxu1 %v394_v2  ;;  %s2655_s16 = sld [smem:[#allocation3 + %s2654_s10]] }
  0x36   : > { %1332 = vmatpush.msrb.mxu3 %v1331_v13  ;;  %s2657_s18 = sld [smem:[#allocation4 + %s2654_s10]] }
  0x3b   : > { %s3650_s23 = sshll.u32 %s2655_s16, 1 }
  0xa9   : > { %1086 = vxpose.xlu0.b32.start.end [1/1] (short) %v1083_v4, 128 }
  0xcd   : > { %v314_v14 = vpop.trf.xlu0 }
  0xce   : > { %v332_v15 = vsel %vm330_vm0, %v314_v14, 0 }
  0xcf   : > { %v4000_v16 = vand.u32 4294901760, %v332_v15 }
  0xd1   : > { %v397_v17 = vsub.f32 %v332_v15, %v4000_v16  ;;  %547 = vmatmul.f32.vlgmr.msra.gmra.mxu1 %v4000_v16 }
  0xd2   : > { %1513 = vmatpush.msra.mxu1 %v1181_v6 }
  0xd3   : > { %631 = vmatmul.f32.vlgmr.msra.gmra.mxu2 %v397_v17  ;;  %v398_v18 = vand.u32 4294901760, %v397_v17 }
  0xd4   : > { %1629 = vmatpush.msra.mxu2 %v1329_v11 }
  0xd5   : > { %v315_v19 = vpop.trf.xlu0  ;;  %730 = vmatmul.f32.vlgmr.msra.gmra.mxu3 %v398_v18  ;;  %v399_v20 = vsub.f32 %v397_v17, %v398_v18 }
  0xd6   : > { %v335_v21 = vsel %vm330_vm0, %v315_v19, 0  ;;  %1711 = vmatpush.msra.mxu3 %v1181_v6 }
  0xd7   : > { %v4005_v22 = vand.u32 4294901760, %v335_v21  ;;  %v400_v23 = vand.u32 4294901760, %v399_v20 }
  0xd9   : > { %v405_v24 = vsub.f32 %v335_v21, %v4005_v22  ;;  %401 = vmatmul.f32.vlgmr.msra.gmra.mxu0 %v400_v23  ;;  %551 = vmatmul.f32.gmra.mxu1 %v4005_v22 }
  0xda   : > { %1415 = vmatpush.msra.mxu0 %v1328_v10 }
  0xdb   : > { %636 = vmatmul.f32.gmra.mxu2 %v405_v24  ;;  %v406_v25 = vand.u32 4294901760, %v405_v24 }
  0xdd   : > { %v316_v26 = vpop.trf.xlu0  ;;  %736 = vmatmul.f32.gmra.mxu3 %v406_v25  ;;  %v407_v27 = vsub.f32 %v405_v24, %v406_v25 }
  0xde   : > { %v338_v28 = vsel %vm330_vm0, %v316_v26, 0 }
  0xdf   : > { %v4010_v29 = vand.u32 4294901760, %v338_v28  ;;  %v408_v30 = vand.u32 4294901760, %v407_v27 }
  0xe1   : > { %v413_v31 = vsub.f32 %v338_v28, %v4010_v29  ;;  %409 = vmatmul.f32.gmra.mxu0 %v408_v30  ;;  %555 = vmatmul.f32.gmra.mxu1 %v4010_v29 }
  0xe3   : > { %641 = vmatmul.f32.gmra.mxu2 %v413_v31  ;;  %v414_v32 = vand.u32 4294901760, %v413_v31 }
  0xe5   : > { %v317_v33 = vpop.trf.xlu0  ;;  %742 = vmatmul.f32.gmra.mxu3 %v414_v32  ;;  %v415_v34 = vsub.f32 %v413_v31, %v414_v32 }
  0xe6   : > { %v341_v35 = vsel %vm330_vm0, %v317_v33, 0 }
  0xe7   : > { %v4015_v36 = vand.u32 4294901760, %v341_v35  ;;  %v416_v37 = vand.u32 4294901760, %v415_v34 }
  0xe9   : > { %v421_v38 = vsub.f32 %v341_v35, %v4015_v36  ;;  %417 = vmatmul.f32.gmra.mxu0 %v416_v37  ;;  %559 = vmatmul.f32.gmra.mxu1 %v4015_v36 }
  0xeb   : > { %646 = vmatmul.f32.gmra.mxu2 %v421_v38  ;;  %v422_v39 = vand.u32 4294901760, %v421_v38 }
  0xed   : > { %v318_v40 = vpop.trf.xlu0  ;;  %748 = vmatmul.f32.gmra.mxu3 %v422_v39  ;;  %v423_v41 = vsub.f32 %v421_v38, %v422_v39 }
  0xee   : > { %v344_v42 = vsel %vm330_vm0, %v318_v40, 0 }
  0xef   : > { %v4020_v43 = vand.u32 4294901760, %v344_v42  ;;  %v424_v44 = vand.u32 4294901760, %v423_v41 }
  0xf1   : > { %v429_v45 = vsub.f32 %v344_v42, %v4020_v43  ;;  %425 = vmatmul.f32.gmra.mxu0 %v424_v44  ;;  %563 = vmatmul.f32.gmra.mxu1 %v4020_v43 }
  0xf3   : > { %651 = vmatmul.f32.gmra.mxu2 %v429_v45  ;;  %v430_v46 = vand.u32 4294901760, %v429_v45 }
  0xf5   : > { %v319_v47 = vpop.trf.xlu0  ;;  %754 = vmatmul.f32.gmra.mxu3 %v430_v46  ;;  %v431_v48 = vsub.f32 %v429_v45, %v430_v46 }
  0xf6   : > { %v347_v49 = vsel %vm330_vm0, %v319_v47, 0 }
  0xf7   : > { %v4025_v50 = vand.u32 4294901760, %v347_v49  ;;  %v432_v51 = vand.u32 4294901760, %v431_v48 }
  0xf9   : > { %v437_v52 = vsub.f32 %v347_v49, %v4025_v50  ;;  %433 = vmatmul.f32.gmra.mxu0 %v432_v51  ;;  %567 = vmatmul.f32.gmra.mxu1 %v4025_v50 }
  0xfb   : > { %656 = vmatmul.f32.gmra.mxu2 %v437_v52  ;;  %v438_v53 = vand.u32 4294901760, %v437_v52 }
  0xfd   : > { %v320_v54 = vpop.trf.xlu0  ;;  %760 = vmatmul.f32.gmra.mxu3 %v438_v53  ;;  %v439_v55 = vsub.f32 %v437_v52, %v438_v53 }
  0xfe   : > { %v350_v56 = vsel %vm330_vm0, %v320_v54, 0 }
  0xff   : > { %v4030_v57 = vand.u32 4294901760, %v350_v56  ;;  %v440_v58 = vand.u32 4294901760, %v439_v55 }
 0x101   : > { %v445_v59 = vsub.f32 %v350_v56, %v4030_v57  ;;  %441 = vmatmul.f32.gmra.mxu0 %v440_v58  ;;  %571 = vmatmul.f32.gmra.mxu1 %v4030_v57 }
 0x103   : > { %661 = vmatmul.f32.gmra.mxu2 %v445_v59  ;;  %v446_v60 = vand.u32 4294901760, %v445_v59 }
 0x105   : > { %v321_v61 = vpop.trf.xlu0  ;;  %766 = vmatmul.f32.gmra.mxu3 %v446_v60  ;;  %v447_v62 = vsub.f32 %v445_v59, %v446_v60 }
 0x106   : > { %v353_v63 = vsel %vm330_vm0, %v321_v61, 0 }
 0x107   : > { %v4035_v0 = vand.u32 4294901760, %v353_v63  ;;  %v448_v1 = vand.u32 4294901760, %v447_v62 }
 0x109   : > { %v453_v2 = vsub.f32 %v353_v63, %v4035_v0  ;;  %449 = vmatmul.f32.gmra.mxu0 %v448_v1  ;;  %575 = vmatmul.f32.gmra.mxu1 %v4035_v0 }
 0x10b   : > { %666 = vmatmul.f32.gmra.mxu2 %v453_v2  ;;  %v454_v3 = vand.u32 4294901760, %v453_v2 }
 0x10d   : > { %v322_v4 = vpop.trf.xlu0  ;;  %772 = vmatmul.f32.gmra.mxu3 %v454_v3  ;;  %v455_v5 = vsub.f32 %v453_v2, %v454_v3 }
 0x10e   : > { %v356_v6 = vsel %vm330_vm0, %v322_v4, 0 }
 0x10f   : > { %v4040_v7 = vand.u32 4294901760, %v356_v6  ;;  %v456_v8 = vand.u32 4294901760, %v455_v5 }
 0x111   : > { %v461_v9 = vsub.f32 %v356_v6, %v4040_v7  ;;  %457 = vmatmul.f32.gmra.mxu0 %v456_v8  ;;  %579 = vmatmul.f32.gmra.mxu1 %v4040_v7 }
 0x113   : > { %671 = vmatmul.f32.gmra.mxu2 %v461_v9  ;;  %v462_v10 = vand.u32 4294901760, %v461_v9 }
 0x115   : > { %v323_v11 = vpop.trf.xlu0  ;;  %778 = vmatmul.f32.gmra.mxu3 %v462_v10  ;;  %v463_v12 = vsub.f32 %v461_v9, %v462_v10 }
 0x116   : > { %v359_v13 = vsel %vm330_vm0, %v323_v11, 0 }
 0x117   : > { %v4045_v14 = vand.u32 4294901760, %v359_v13  ;;  %v464_v15 = vand.u32 4294901760, %v463_v12 }
 0x119   : > { %v469_v17 = vsub.f32 %v359_v13, %v4045_v14  ;;  %465 = vmatmul.f32.gmra.mxu0 %v464_v15  ;;  %583 = vmatmul.f32.gmra.mxu1 %v4045_v14 }
 0x11b   : > { %676 = vmatmul.f32.gmra.mxu2 %v469_v17  ;;  %v470_v18 = vand.u32 4294901760, %v469_v17 }
 0x11d   : > { %v324_v19 = vpop.trf.xlu0  ;;  %784 = vmatmul.f32.gmra.mxu3 %v470_v18  ;;  %v471_v20 = vsub.f32 %v469_v17, %v470_v18 }
 0x11e   : > { %v362_v21 = vsel %vm330_vm0, %v324_v19, 0 }
 0x11f   : > { %v4050_v23 = vand.u32 4294901760, %v362_v21  ;;  %v472_v24 = vand.u32 4294901760, %v471_v20 }
 0x121   : > { %v477_v25 = vsub.f32 %v362_v21, %v4050_v23  ;;  %473 = vmatmul.f32.gmra.mxu0 %v472_v24  ;;  %587 = vmatmul.f32.gmra.mxu1 %v4050_v23 }
 0x123   : > { %681 = vmatmul.f32.gmra.mxu2 %v477_v25  ;;  %v478_v26 = vand.u32 4294901760, %v477_v25 }
 0x125   : > { %v325_v27 = vpop.trf.xlu0  ;;  %790 = vmatmul.f32.gmra.mxu3 %v478_v26  ;;  %v479_v28 = vsub.f32 %v477_v25, %v478_v26 }
 0x126   : > { %v365_v30 = vsel %vm330_vm0, %v325_v27, 0 }
 0x127   : > { %v4055_v31 = vand.u32 4294901760, %v365_v30  ;;  %v480_v32 = vand.u32 4294901760, %v479_v28 }
 0x129   : > { %v485_v33 = vsub.f32 %v365_v30, %v4055_v31  ;;  %481 = vmatmul.f32.gmra.mxu0 %v480_v32  ;;  %591 = vmatmul.f32.gmra.mxu1 %v4055_v31 }
 0x12b   : > { %686 = vmatmul.f32.gmra.mxu2 %v485_v33  ;;  %v486_v34 = vand.u32 4294901760, %v485_v33 }
 0x12d   : > { %v326_v35 = vpop.trf.xlu0  ;;  %796 = vmatmul.f32.gmra.mxu3 %v486_v34  ;;  %v487_v37 = vsub.f32 %v485_v33, %v486_v34 }
 0x12e   : > { %v368_v38 = vsel %vm330_vm0, %v326_v35, 0 }
 0x12f   : > { %v4060_v39 = vand.u32 4294901760, %v368_v38  ;;  %v488_v40 = vand.u32 4294901760, %v487_v37 }
 0x131   : > { %v493_v41 = vsub.f32 %v368_v38, %v4060_v39  ;;  %489 = vmatmul.f32.gmra.mxu0 %v488_v40  ;;  %595 = vmatmul.f32.gmra.mxu1 %v4060_v39 }
 0x133   : > { %691 = vmatmul.f32.gmra.mxu2 %v493_v41  ;;  %v494_v42 = vand.u32 4294901760, %v493_v41 }
 0x135   : > { %v327_v44 = vpop.trf.xlu0  ;;  %802 = vmatmul.f32.gmra.mxu3 %v494_v42  ;;  %v495_v45 = vsub.f32 %v493_v41, %v494_v42 }
 0x136   : > { %v371_v46 = vsel %vm330_vm0, %v327_v44, 0 }
 0x137   : > { %v4065_v47 = vand.u32 4294901760, %v371_v46  ;;  %v496_v48 = vand.u32 4294901760, %v495_v45 }
 0x139   : > { %v501_v49 = vsub.f32 %v371_v46, %v4065_v47  ;;  %497 = vmatmul.f32.gmra.mxu0 %v496_v48  ;;  %599 = vmatmul.f32.gmra.mxu1 %v4065_v47 }
 0x13b   : > { %696 = vmatmul.f32.gmra.mxu2 %v501_v49  ;;  %v502_v51 = vand.u32 4294901760, %v501_v49 }
 0x13d   : > { %v328_v52 = vpop.trf.xlu0  ;;  %808 = vmatmul.f32.gmra.mxu3 %v502_v51  ;;  %v503_v53 = vsub.f32 %v501_v49, %v502_v51 }
 0x13e   : > { %v374_v54 = vsel %vm330_vm0, %v328_v52, 0 }
 0x13f   : > { %v4070_v55 = vand.u32 4294901760, %v374_v54  ;;  %v504_v56 = vand.u32 4294901760, %v503_v53 }
 0x141   : > { %v509_v58 = vsub.f32 %v374_v54, %v4070_v55  ;;  %505 = vmatmul.f32.gmra.mxu0 %v504_v56  ;;  %603 = vmatmul.f32.gmra.mxu1 %v4070_v55 }
 0x143   : > { %701 = vmatmul.f32.gmra.mxu2 %v509_v58  ;;  %v510_v59 = vand.u32 4294901760, %v509_v58 }
 0x145   : > { %v329_v60 = vpop.trf.xlu0  ;;  %814 = vmatmul.f32.gmra.mxu3 %v510_v59  ;;  %v511_v61 = vsub.f32 %v509_v58, %v510_v59 }
 0x146   : > { %v377_v62 = vsel %vm330_vm0, %v329_v60, 0 }
 0x147   : > { %v4075_v63 = vand.u32 4294901760, %v377_v62  ;;  %v512_v1 = vand.u32 4294901760, %v511_v61 }
 0x149   : > { %v517_v2 = vsub.f32 %v377_v62, %v4075_v63  ;;  %513 = vmatmul.f32.gmra.mxu0 %v512_v1  ;;  %607 = vmatmul.f32.gmra.mxu1 %v4075_v63 }
 0x14b   : > { %706 = vmatmul.f32.gmra.mxu2 %v517_v2  ;;  %v518_v3 = vand.u32 4294901760, %v517_v2 }
 0x14d   : > { %v1102_v4 = vpop.trf.xlu0  ;;  %820 = vmatmul.f32.gmra.mxu3 %v518_v3  ;;  %v519_v5 = vsub.f32 %v517_v2, %v518_v3 }
 0x14e   : > { %v1119_v6 = vsel %vm330_vm0, %v1102_v4, 0  ;;  %v548_v8 = vpop.f32.mrf.mxu1 }
 0x14f   : > { %v4080_v9 = vand.u32 4294901760, %v1119_v6  ;;  %v520_v10 = vand.u32 4294901760, %v519_v5 }
 0x151   : > { %v4083_v11 = vsub.f32 %v1119_v6, %v4080_v9  ;;  %521 = vmatmul.f32.gmra.mxu0 %v520_v10  ;;  %926 = vmatmul.f32.vlgmr.msrb.gmra.mxu1 %v4000_v16 }
 0x153   : > { %v5720_v12 = vand.u32 4294901760, %v4083_v11 }
 0x155   : > { %v1103_v13 = vpop.trf.xlu0  ;;  %1334 = vmatmul.f32.vlgmr.msrb.gmra.mxu3 %v4080_v9  ;;  %v1186_v15 = vsub.f32 %v4083_v11, %v5720_v12 }
 0x156   : > { %v1122_v17 = vsel %vm330_vm0, %v1103_v13, 0  ;;  %v402_v18 = vpop.f32.mrf.mxu0  ;;  %v552_v19 = vpop.f32.mrf.mxu1 }
 0x157   : > { %v4092_v20 = vand.u32 4294901760, %v1122_v17  ;;  %v549_v21 = vadd.f32 %v548_v8, %v402_v18  ;;  %v632_v24 = vpop.f32.mrf.mxu2  ;;  %v1187_v25 = vand.u32 4294901760, %v1186_v15 }
 0x158   : > { %v731_v26 = vpop.f32.mrf.mxu3 }
 0x159   : > { %v4095_v27 = vsub.f32 %v1122_v17, %v4092_v20  ;;  %v633_v28 = vadd.f32 %v632_v24, %v549_v21  ;;  %844 = vmatmul.f32.vlgmr.msrb.gmra.mxu0 %v4000_v16  ;;  %930 = vmatmul.f32.gmra.mxu1 %v4005_v22 }
 0x15a   : > { %1188 = vmatmul.f32.vlgmr.msrb.gmra.mxu2 %v1187_v25 }
 0x15b   : > { %v4099_v30 = vadd.f32 %v731_v26, %v633_v28  ;;  %v5719_v32 = vand.u32 4294901760, %v4095_v27 }
 0x15d   : > { %v1104_v33 = vpop.trf.xlu0  ;;  %1338 = vmatmul.f32.gmra.mxu3 %v4092_v20  ;;  %v1194_v34 = vsub.f32 %v4095_v27, %v5719_v32 }
 0x15e   : > { %v1125_v35 = vsel %vm330_vm0, %v1104_v33, 0  ;;  %v410_v37 = vpop.f32.mrf.mxu0  ;;  %v556_v38 = vpop.f32.mrf.mxu1 }
 0x15f   : > { %v4107_v40 = vand.u32 4294901760, %v1125_v35  ;;  %v553_v16 = vadd.f32 %v552_v19, %v410_v37  ;;  %v637_v41 = vpop.f32.mrf.mxu2  ;;  %v1195_v42 = vand.u32 4294901760, %v1194_v34 }
 0x160   : > { %v737_v44 = vpop.f32.mrf.mxu3 }
 0x161   : > { %v4110_v45 = vsub.f32 %v1125_v35, %v4107_v40  ;;  %v638_v46 = vadd.f32 %v637_v41, %v553_v16  ;;  %848 = vmatmul.f32.gmra.mxu0 %v4005_v22  ;;  %934 = vmatmul.f32.gmra.mxu1 %v4010_v29 }
 0x162   : > { %1196 = vmatmul.f32.gmra.mxu2 %v1195_v42 }
 0x163   : > { %v4114_v48 = vadd.f32 %v737_v44, %v638_v46  ;;  %v5718_v49 = vand.u32 4294901760, %v4110_v45 }
 0x165   : > { %v1105_v51 = vpop.trf.xlu0  ;;  %1342 = vmatmul.f32.gmra.mxu3 %v4107_v40  ;;  %v1202_v52 = vsub.f32 %v4110_v45, %v5718_v49 }
 0x166   : > { %v1128_v53 = vsel %vm330_vm0, %v1105_v51, 0  ;;  %v418_v54 = vpop.f32.mrf.mxu0  ;;  %v560_v56 = vpop.f32.mrf.mxu1 }
 0x167   : > { %v4122_v22 = vand.u32 4294901760, %v1128_v53  ;;  %v557_v58 = vadd.f32 %v556_v38, %v418_v54  ;;  %v642_v59 = vpop.f32.mrf.mxu2  ;;  %v1203_v60 = vand.u32 4294901760, %v1202_v52 }
 0x168   : > { %v743_v61 = vpop.f32.mrf.mxu3 }
 0x169   : > { %v4125_v62 = vsub.f32 %v1128_v53, %v4122_v22  ;;  %v643_v1 = vadd.f32 %v642_v59, %v557_v58  ;;  %852 = vmatmul.f32.gmra.mxu0 %v4010_v29  ;;  %938 = vmatmul.f32.gmra.mxu1 %v4015_v36 }
 0x16a   : > { %1204 = vmatmul.f32.gmra.mxu2 %v1203_v60 }
 0x16b   : > { %v4129_v2 = vadd.f32 %v743_v61, %v643_v1  ;;  %v5716_v3 = vand.u32 4294901760, %v4125_v62 }
 0x16d   : > { %v1106_v4 = vpop.trf.xlu0  ;;  %1346 = vmatmul.f32.gmra.mxu3 %v4122_v22  ;;  %v1210_v5 = vsub.f32 %v4125_v62, %v5716_v3 }
 0x16e   : > { %v1131_v6 = vsel %vm330_vm0, %v1106_v4, 0  ;;  %v426_v8 = vpop.f32.mrf.mxu0  ;;  %v564_v10 = vpop.f32.mrf.mxu1 }
 0x16f   : > { %v4138_v29 = vand.u32 4294901760, %v1131_v6  ;;  %v561_v13 = vadd.f32 %v560_v56, %v426_v8  ;;  %v647_v15 = vpop.f32.mrf.mxu2  ;;  %v1211_v17 = vand.u32 4294901760, %v1210_v5 }
 0x170   : > { %v749_v18 = vpop.f32.mrf.mxu3 }
 0x171   : > { %v4141_v19 = vsub.f32 %v1131_v6, %v4138_v29  ;;  %v648_v21 = vadd.f32 %v647_v15, %v561_v13  ;;  %856 = vmatmul.f32.gmra.mxu0 %v4015_v36  ;;  %942 = vmatmul.f32.gmra.mxu1 %v4020_v43  ;;  %v2651_v13 = vld [vmem:[%s2650_s28] sm:$0x1] }
 0x172   : > { %1212 = vmatmul.f32.gmra.mxu2 %v1211_v17  ;;  %3649 = vst [vmem:[%s3985_s12 + $0x2] sm:$0x1] %v2651_v13 }
 0x173   : > { %v4145_v24 = vadd.f32 %v749_v18, %v648_v21  ;;  %v5715_v25 = vand.u32 4294901760, %v4141_v19 }
 0x175   : > { %v1107_v26 = vpop.trf.xlu0  ;;  %1350 = vmatmul.f32.gmra.mxu3 %v4138_v29  ;;  %v1218_v28 = vsub.f32 %v4141_v19, %v5715_v25 }
 0x176   : > { %v1134_v33 = vsel %vm330_vm0, %v1107_v26, 0  ;;  %v434_v34 = vpop.f32.mrf.mxu0  ;;  %v568_v35 = vpop.f32.mrf.mxu1 }
 0x177   : > { %v4153_v36 = vand.u32 4294901760, %v1134_v33  ;;  %v565_v37 = vadd.f32 %v564_v10, %v434_v34  ;;  %v652_v38 = vpop.f32.mrf.mxu2  ;;  %v1219_v16 = vand.u32 4294901760, %v1218_v28  ;;  %v1872_v10 = vld [vmem:[%s1871_s25] sm:$0xff]  ;;  %s4485_s25 = sadd.s32 %s3650_s23, %s2657_s18  ;;  %s1084_s18 = scalar_lea.vmem %s5703_s3, %s3988_s17 }
 0x178   : > { %v755_v41 = vpop.f32.mrf.mxu3  ;;  %1875 = vxpose.xlu1.b32.start.end [1/1] (short) %v1872_v10, 128  ;;  %v4188_v15 = vand.u32 4294901760, %v1872_v10  ;;  %s3651_s26 = sshll.u32 %s4485_s25, 3  ;;  %s3439_s24 = scalar_lea.vmem %s5702_s2, %s4485_s25 }
 0x179   : > { %v4156_v42 = vsub.f32 %v1134_v33, %v4153_v36  ;;  %v653_v44 = vadd.f32 %v652_v38, %v565_v37  ;;  %860 = vmatmul.f32.gmra.mxu0 %v4020_v43  ;;  %946 = vmatmul.f32.gmra.mxu1 %v4025_v50  ;;  %s2660_s21 = scalar_lea.vmem %s5704_s4, %s3651_s26  ;;  %s1873_s26 = scalar_lea.vmem %s5703_s3, %s4160_s11 }
 0x17a   : > { %1220 = vmatmul.f32.gmra.mxu2 %v1219_v16  ;;  %v4197_v28 = vsub.f32 %v1872_v10, %v4188_v15  ;;  %1971 = vmatpush.msrb.mxu0 %v4188_v15  ;;  %s2662_s28 = scalar_lea.vmem %s5703_s3, %s4485_s25  ;;  %s3791_s17 = scalar_lea.hbm %s5705_s5, 8 }
 0x17b   : > { %v4162_v46 = vadd.f32 %v755_v41, %v653_v44  ;;  %v5713_v51 = vand.u32 4294901760, %v4156_v42  ;;  %2302 = vmatpush.msrb.mxu3 %v4188_v15 }
 0x17c   : > { %2204 = vmatpush.msrb.mxu2 %v4197_v28 }
 0x17d   : > { %v1108_v52 = vpop.trf.xlu0  ;;  %1354 = vmatmul.f32.gmra.mxu3 %v4153_v36  ;;  %v1226_v53 = vsub.f32 %v4156_v42, %v5713_v51 }
 0x17e   : > { %v1137_v43 = vsel %vm330_vm0, %v1108_v52, 0  ;;  %v442_v54 = vpop.f32.mrf.mxu0  ;;  %v572_v56 = vpop.f32.mrf.mxu1 }
 0x17f   : > { %v4171_v58 = vand.u32 4294901760, %v1137_v43  ;;  %v569_v59 = vadd.f32 %v568_v35, %v442_v54  ;;  %v657_v60 = vpop.f32.mrf.mxu2  ;;  %v1227_v61 = vand.u32 4294901760, %v1226_v53 }
 0x180   : > { %v761_v1 = vpop.f32.mrf.mxu3 }
 0x181   : > { %v4181_v4 = vsub.f32 %v1137_v43, %v4171_v58  ;;  %v658_v5 = vadd.f32 %v657_v60, %v569_v59  ;;  %864 = vmatmul.f32.gmra.mxu0 %v4025_v50  ;;  %950 = vmatmul.f32.gmra.mxu1 %v4030_v57 }
 0x182   : > { %1228 = vmatmul.f32.gmra.mxu2 %v1227_v61 }
 0x183   : > { %v4185_v6 = vadd.f32 %v761_v1, %v658_v5  ;;  %v5712_v8 = vand.u32 4294901760, %v4181_v4 }
 0x185   : > { %v1109_v17 = vpop.trf.xlu0  ;;  %1358 = vmatmul.f32.gmra.mxu3 %v4171_v58  ;;  %v1234_v50 = vsub.f32 %v4181_v4, %v5712_v8 }
 0x186   : > { %v1140_v18 = vsel %vm330_vm0, %v1109_v17, 0  ;;  %v450_v21 = vpop.f32.mrf.mxu0  ;;  %v576_v26 = vpop.f32.mrf.mxu1 }
 0x187   : > { %v4201_v33 = vand.u32 4294901760, %v1140_v18  ;;  %v573_v34 = vadd.f32 %v572_v56, %v450_v21  ;;  %v662_v35 = vpop.f32.mrf.mxu2  ;;  %v1235_v37 = vand.u32 4294901760, %v1234_v50 }
 0x188   : > { %v767_v38 = vpop.f32.mrf.mxu3 }
 0x189   : > { %v4205_v16 = vsub.f32 %v1140_v18, %v4201_v33  ;;  %v663_v41 = vadd.f32 %v662_v35, %v573_v34  ;;  %868 = vmatmul.f32.gmra.mxu0 %v4030_v57  ;;  %954 = vmatmul.f32.gmra.mxu1 %v4035_v0 }
 0x18a   : > { %1236 = vmatmul.f32.gmra.mxu2 %v1235_v37 }
 0x18b   : > { %v4209_v44 = vadd.f32 %v767_v38, %v663_v41  ;;  %v5710_v52 = vand.u32 4294901760, %v4205_v16 }
 0x18d   : > { %v1110_v53 = vpop.trf.xlu0  ;;  %1362 = vmatmul.f32.gmra.mxu3 %v4201_v33  ;;  %v1242_v43 = vsub.f32 %v4205_v16, %v5710_v52 }
 0x18e   : > { %v1143_v54 = vsel %vm330_vm0, %v1110_v53, 0  ;;  %v458_v56 = vpop.f32.mrf.mxu0  ;;  %v580_v59 = vpop.f32.mrf.mxu1 }
 0x18f   : > { %v4217_v60 = vand.u32 4294901760, %v1143_v54  ;;  %v577_v57 = vadd.f32 %v576_v26, %v458_v56  ;;  %v667_v61 = vpop.f32.mrf.mxu2  ;;  %v1243_v1 = vand.u32 4294901760, %v1242_v43 }
 0x190   : > { %v773_v5 = vpop.f32.mrf.mxu3 }
 0x191   : > { %v4220_v10 = vsub.f32 %v1143_v54, %v4217_v60  ;;  %v668_v13 = vadd.f32 %v667_v61, %v577_v57  ;;  %872 = vmatmul.f32.gmra.mxu0 %v4035_v0  ;;  %958 = vmatmul.f32.gmra.mxu1 %v4040_v7 }
 0x192   : > { %1244 = vmatmul.f32.gmra.mxu2 %v1243_v1 }
 0x193   : > { %v5709_v17 = vand.u32 4294901760, %v4220_v10  ;;  %v4225_v50 = vadd.f32 %v773_v5, %v668_v13 }
 0x195   : > { %v1111_v18 = vpop.trf.xlu0  ;;  %1366 = vmatmul.f32.gmra.mxu3 %v4217_v60  ;;  %v1250_v21 = vsub.f32 %v4220_v10, %v5709_v17 }
 0x196   : > { %v1146_v26 = vsel %vm330_vm0, %v1111_v18, 0  ;;  %v466_v34 = vpop.f32.mrf.mxu0  ;;  %v584_v35 = vpop.f32.mrf.mxu1 }
 0x197   : > { %v4232_v0 = vand.u32 4294901760, %v1146_v26  ;;  %v581_v37 = vadd.f32 %v580_v59, %v466_v34  ;;  %v672_v38 = vpop.f32.mrf.mxu2  ;;  %v1251_v41 = vand.u32 4294901760, %v1250_v21 }
 0x198   : > { %v779_v53 = vpop.f32.mrf.mxu3 }
 0x199   : > { %v4235_v43 = vsub.f32 %v1146_v26, %v4232_v0  ;;  %v673_v54 = vadd.f32 %v672_v38, %v581_v37  ;;  %876 = vmatmul.f32.gmra.mxu0 %v4040_v7  ;;  %962 = vmatmul.f32.gmra.mxu1 %v4045_v14  ;;  %v4253_v37 = vld [vmem:[%s296_s22] sm:$0x1]  ;;  %s3460_s22 = sshll.u32 %s3985_s12, 4  ;;  %s3461_s22 = int_to_ptr.vmem [resolvable:$true] %s3460_s22 }
 0x19a   : > { %1252 = vmatmul.f32.gmra.mxu2 %v1251_v41 }
 0x19b   : > { %v5708_v56 = vand.u32 4294901760, %v4235_v43  ;;  %v4240_v57 = vadd.f32 %v779_v53, %v673_v54 }
 0x19d   : > { %v1112_v61 = vpop.trf.xlu0  ;;  %1370 = vmatmul.f32.gmra.mxu3 %v4232_v0  ;;  %v1258_v59 = vsub.f32 %v4235_v43, %v5708_v56 }
 0x19e   : > { %v1149_v7 = vsel %vm330_vm0, %v1112_v61, 0  ;;  %v474_v1 = vpop.f32.mrf.mxu0  ;;  %v588_v5 = vpop.f32.mrf.mxu1 }
 0x19f   : > { %v4251_v13 = vand.u32 4294901760, %v1149_v7  ;;  %v585_v18 = vadd.f32 %v584_v35, %v474_v1  ;;  %v677_v21 = vpop.f32.mrf.mxu2  ;;  %v1259_v26 = vand.u32 4294901760, %v1258_v59  ;;  %v991_v35 = vand.u32 2147483647, %v4253_v37 }
 0x1a0   : > { %v785_v34 = vpop.f32.mrf.mxu3 }
 0x1a1   : > { %v4256_v38 = vsub.f32 %v1149_v7, %v4251_v13  ;;  %v678_v41 = vadd.f32 %v677_v21, %v585_v18  ;;  %880 = vmatmul.f32.gmra.mxu0 %v4045_v14  ;;  %966 = vmatmul.f32.gmra.mxu1 %v4050_v23 }
 0x1a2   : > { %1260 = vmatmul.f32.gmra.mxu2 %v1259_v26 }
 0x1a3   : > { %v5711_v53 = vand.u32 4294901760, %v4256_v38  ;;  %v4261_v54 = vadd.f32 %v785_v34, %v678_v41  ;;  %v992_v34 = vsub.f32 0.0, %v991_v35 }
 0x1a5   : > { %v1113_v61 = vpop.trf.xlu0  ;;  %1374 = vmatmul.f32.gmra.mxu3 %v4251_v13  ;;  %v1266_v59 = vsub.f32 %v4256_v38, %v5711_v53  ;;  %v993_v8 = vmul.f32 1.442695, %v992_v34 }
 0x1a6   : > { %v1152_v7 = vsel %vm330_vm0, %v1113_v61, 0  ;;  %v482_v1 = vpop.f32.mrf.mxu0  ;;  %v592_v14 = vpop.f32.mrf.mxu1 }
 0x1a7   : > { %v4269_v18 = vand.u32 4294901760, %v1152_v7  ;;  %v589_v21 = vadd.f32 %v588_v5, %v482_v1  ;;  %v682_v26 = vpop.f32.mrf.mxu2  ;;  %v1267_v56 = vand.u32 4294901760, %v1266_v59  ;;  %3731 = vpow2.f32 %v993_v8 }
 0x1a8   : > { %v791_v41 = vpop.f32.mrf.mxu3 }
 0x1a9   : > { %v4272_v17 = vsub.f32 %v1152_v7, %v4269_v18  ;;  %v683_v52 = vadd.f32 %v682_v26, %v589_v21  ;;  %884 = vmatmul.f32.gmra.mxu0 %v4050_v23  ;;  %970 = vmatmul.f32.gmra.mxu1 %v4055_v31 }
 0x1aa   : > { %1268 = vmatmul.f32.gmra.mxu2 %v1267_v56 }
 0x1ab   : > { %v5714_v61 = vand.u32 4294901760, %v4272_v17  ;;  %v4277_v53 = vadd.f32 %v791_v41, %v683_v52 }
 0x1ad   : > { %v1114_v51 = vpop.trf.xlu0  ;;  %1378 = vmatmul.f32.gmra.mxu3 %v4269_v18  ;;  %v1274_v5 = vsub.f32 %v4272_v17, %v5714_v61 }
 0x1ae   : > { %v1155_v35 = vsel %vm330_vm0, %v1114_v51, 0  ;;  %v490_v59 = vpop.f32.mrf.mxu0  ;;  %v596_v7 = vpop.f32.mrf.mxu1 }
 0x1af   : > { %v4284_v23 = vand.u32 4294901760, %v1155_v35  ;;  %v593_v1 = vadd.f32 %v592_v14, %v490_v59  ;;  %v687_v56 = vpop.f32.mrf.mxu2  ;;  %v1275_v21 = vand.u32 4294901760, %v1274_v5  ;;  %v3732_v14 = vpop.eup %3731 }
 0x1b0   : > { %v797_v52 = vpop.f32.mrf.mxu3 }
 0x1b1   : > { %v4287_v26 = vsub.f32 %v1155_v35, %v4284_v23  ;;  %v688_v34 = vadd.f32 %v687_v56, %v593_v1  ;;  %888 = vmatmul.f32.gmra.mxu0 %v4055_v31  ;;  %974 = vmatmul.f32.gmra.mxu1 %v4060_v39 }
 0x1b2   : > { %1276 = vmatmul.f32.gmra.mxu2 %v1275_v21 }
 0x1b3   : > { %v5717_v51 = vand.u32 4294901760, %v4287_v26  ;;  %v4292_v41 = vadd.f32 %v797_v52, %v688_v34  ;;  %v995_v52 = vadd.f32 1.0, %v3732_v14 }
 0x1b5   : > { %v1115_v61 = vpop.trf.xlu0  ;;  %1382 = vmatmul.f32.gmra.mxu3 %v4284_v23  ;;  %v1282_v8 = vsub.f32 %v4287_v26, %v5717_v51  ;;  %v5726_v51 = vand.u32 4294901760, %v4197_v28  ;;  %3733 = vlog2.f32 %v995_v52 }
 0x1b6   : > { %v1158_v5 = vsel %vm330_vm0, %v1115_v61, 0  ;;  %v498_v35 = vpop.f32.mrf.mxu0  ;;  %v600_v59 = vpop.f32.mrf.mxu1 }
 0x1b7   : > { %v4299_v31 = vand.u32 4294901760, %v1158_v5  ;;  %v597_v1 = vadd.f32 %v596_v7, %v498_v35  ;;  %v692_v56 = vpop.f32.mrf.mxu2  ;;  %v1283_v21 = vand.u32 4294901760, %v1282_v8 }
 0x1b8   : > { %v803_v25 = vpop.f32.mrf.mxu3 }
 0x1b9   : > { %5793 = vst [vmem:[#allocation13_spill] sm:$0xff] %v4299_v31  ;;  %v4302_v34 = vsub.f32 %v1158_v5, %v4299_v31  ;;  %v693_v3 = vadd.f32 %v692_v56, %v597_v1  ;;  %892 = vmatmul.f32.gmra.mxu0 %v4060_v39  ;;  %978 = vmatmul.f32.gmra.mxu1 %v4065_v47  ;;  %v998_v5 = vmul.f32 -0.5, %v3732_v14 }
 0x1ba   : > { %1284 = vmatmul.f32.gmra.mxu2 %v1283_v21  ;;  %v2119_v56 = vsub.f32 %v4197_v28, %v5726_v51  ;;  %v1001_v51 = vand.u32 2147483647, %v3732_v14 }
 0x1bb   : > { %5794 = vst [vmem:[#allocation14_spill] sm:$0xff] %v4302_v34  ;;  %v5723_v61 = vand.u32 4294901760, %v4302_v34  ;;  %v4308_v49 = vadd.f32 %v803_v25, %v693_v3 }
 0x1bc   : > { %v2120_v12 = vand.u32 4294901760, %v2119_v56  ;;  %vm4333_vm1 = vcmp.lt.f32.partialorder %v1001_v51, 0.0004427343 }
 0x1bd   : > { %5795 = vst [vmem:[#allocation15_spill] sm:$0xff] %v4308_v49  ;;  %v1116_v7 = vpop.trf.xlu0  ;;  %1386 = vmatmul.f32.gmra.mxu3 %v4299_v31  ;;  %v1290_v8 = vsub.f32 %v4302_v34, %v5723_v61  ;;  %v3734_v34 = vpop.eup %3733 }
 0x1be   : > { %v1161_v39 = vsel %vm330_vm0, %v1116_v7, 0  ;;  %v506_v35 = vpop.f32.mrf.mxu0  ;;  %v604_v1 = vpop.f32.mrf.mxu1  ;;  %v999_v7 = vadd.f32 1.0, %v998_v5  ;;  %2121 = vmatpush.msrb.mxu1 %v2120_v12 }
 0x1bf   : > { %v4318_v21 = vand.u32 4294901760, %v1161_v39  ;;  %v601_v3 = vadd.f32 %v600_v59, %v506_v35  ;;  %v697_v25 = vpop.f32.mrf.mxu2  ;;  %v1291_v52 = vand.u32 4294901760, %v1290_v8  ;;  %v997_v35 = vmul.f32 0.6931472, %v3734_v34 }
 0x1c0   : > { %v809_v32 = vpop.f32.mrf.mxu3  ;;  %v204_v34 = vlaneseq }
 0x1c1   : > { %5796 = vst [vmem:[#allocation16_spill] sm:$0xff] %v4318_v21  ;;  %v4321_v31 = vsub.f32 %v1161_v39, %v4318_v21  ;;  %v698_v61 = vadd.f32 %v697_v25, %v601_v3  ;;  %896 = vmatmul.f32.gmra.mxu0 %v4065_v47  ;;  %982 = vmatmul.f32.gmra.mxu1 %v4070_v55 }
 0x1c2   : > { %1292 = vmatmul.f32.gmra.mxu2 %v1291_v52  ;;  %v1000_v47 = vmul.f32 %v3732_v14, %v999_v7 }
 0x1c3   : > { %v5729_v49 = vand.u32 4294901760, %v4321_v31  ;;  %v4326_v59 = vadd.f32 %v809_v32, %v698_v61 }
 0x1c4   : > { %v1003_v51 = vsel %vm4333_vm1, %v1000_v47, %v997_v35 }
 0x1c5   : > { %5797 = vst [vmem:[#allocation17_spill] sm:$0xff] %v4326_v59  ;;  %v1117_v8 = vpop.trf.xlu0  ;;  %1390 = vmatmul.f32.gmra.mxu3 %v4318_v21  ;;  %v1298_v39 = vsub.f32 %v4321_v31, %v5729_v49  ;;  %v990_v59 = vmax.f32 %v4253_v37, 0.0 }
 0x1c6   : > { %v1164_v56 = vsel %vm330_vm0, %v1117_v8, 0  ;;  %v514_v5 = vpop.f32.mrf.mxu0  ;;  %v608_v3 = vpop.f32.mrf.mxu1 }
 0x1c7   : > { %v4337_v25 = vand.u32 4294901760, %v1164_v56  ;;  %v605_v32 = vadd.f32 %v604_v1, %v514_v5  ;;  %v702_v61 = vpop.f32.mrf.mxu2  ;;  %v1299_v52 = vand.u32 4294901760, %v1298_v39  ;;  %v1004_v8 = vadd.f32 %v1003_v51, %v990_v59 }
 0x1c8   : > { %v815_v21 = vpop.f32.mrf.mxu3  ;;  %v4359_v59 = vshrl.u32 %v204_v34, 7 }
 0x1c9   : > { %v4341_v49 = vsub.f32 %v1164_v56, %v4337_v25  ;;  %v703_v14 = vadd.f32 %v702_v61, %v605_v32  ;;  %900 = vmatmul.f32.gmra.mxu0 %v4070_v55  ;;  %986 = vmatmul.f32.gmra.mxu1 %v4075_v63  ;;  %v4354_v56 = vand.u32 127, %v204_v34  ;;  %v1005_v32 = vadd.f32 1.1920929e-07, %v1004_v8 }
 0x1ca   : > { %1300 = vmatmul.f32.gmra.mxu2 %v1299_v52 }
 0x1cb   : > { %v1305_v1 = vand.u32 4294901760, %v4341_v49  ;;  %v4348_v7 = vadd.f32 %v815_v21, %v703_v14  ;;  %v5800_v21 = vand.u32 4294901760, %v4083_v11  ;;  %vm255_vm2 = vcmp.lt.s32.totalorder %v4354_v56, 64 }
 0x1cc   : > { %vm256_vm4 = vmxor %vm3871_vm3, %vm255_vm2  ;;  %vm223_vm5 = vcmp.eq.s32.totalorder %v4359_v59, %v4354_v56 }
 0x1cd   : > { %1394 = vmatmul.f32.gmra.mxu3 %v4337_v25  ;;  %v1306_v37 = vsub.f32 %v4341_v49, %v1305_v1  ;;  %vm4376_vm6 = vmxor %vm256_vm4, %vm3871_vm3 }
 0x1ce   : > { %v522_v39 = vpop.f32.mrf.mxu0  ;;  %v927_v55 = vpop.f32.mrf.mxu1  ;;  %vm4467_vm11 = vmxor %vm255_vm2, %vm3871_vm3 }
 0x1cf   : > { %v609_v5 = vadd.f32 %v608_v3, %v522_v39  ;;  %v1307_v12 = vand.u32 4294901760, %v1306_v37  ;;  %v707_v35 = vpop.f32.mrf.mxu2  ;;  %v4365_v3 = vperm.slane %v1005_v32, 0  ;;  %v5803_v39 = vand.u32 4294901760, %v4095_v27 }
 0x1d0   : > { %v821_v47 = vpop.f32.mrf.mxu3 }
 0x1d1   : > { %v708_v61 = vadd.f32 %v707_v35, %v609_v5  ;;  %904 = vmatmul.f32.gmra.mxu0 %v4075_v63  ;;  %1517 = vmatmul.f32.vlgmr.msra.gmra.mxu1 %v5800_v21  ;;  %v1009_v37 = vsel %vm223_vm5, %v4365_v3, 0.0  ;;  %v5804_v5 = vand.u32 4294901760, %v4197_v28 }
 0x1d2   : > { %1308 = vmatmul.f32.gmra.mxu2 %v1307_v12  ;;  %2500 = vmatpush.msra.mxu1 %v4188_v15 }
 0x1d3   : > { %v4363_v52 = vadd.f32 %v821_v47, %v708_v61 }
 0x1d5   : > { %1713 = vmatmul.f32.vlgmr.msra.gmra.mxu3 %v4080_v9 }
 0x1d6   : > { %v845_v63 = vpop.f32.mrf.mxu0  ;;  %v931_v14 = vpop.f32.mrf.mxu1 }
 0x1d7   : > { %v846_v51 = vadd.f32 %v845_v63, %v4099_v30  ;;  %v4389_v30 = vadd.s32 8, %v4359_v59  ;;  %v5805_v63 = vand.u32 4294901760, %v4110_v45 }
 0x1d8   : > { %v1335_v34 = vpop.f32.mrf.mxu3 }
 0x1d9   : > { %v928_v8 = vadd.f32 %v927_v55, %v846_v51  ;;  %1418 = vmatmul.f32.vlgmr.msra.gmra.mxu0 %v4083_v11  ;;  %1523 = vmatmul.f32.gmra.mxu1 %v5803_v39  ;;  %vm224_vm7 = vcmp.eq.s32.totalorder %v4389_v30, %v4354_v56  ;;  %v4413_v51 = vadd.s32 16, %v4359_v59 }
 0x1da   : > { %1631 = vmatmul.f32.vlgmr.msra.gmra.mxu2 %v4080_v9  ;;  %2418 = vmatpush.msra.mxu0 %v5804_v5  ;;  %v1010_v21 = vsel %vm224_vm7, %v4365_v3, 0.0 }
 0x1db   : > { %v1025_v55 = vsel %vm4376_vm6, %v928_v8, 0.0  ;;  %vm225_vm8 = vcmp.eq.s32.totalorder %v4413_v51, %v4354_v56 }
 0x1dc   : > { %v1041_v12 = vadd.f32 %v1025_v55, %v1009_v37  ;;  %v1011_v55 = vsel %vm225_vm8, %v4365_v3, 0.0 }
 0x1dd   : > { %v1189_v35 = vpop.f32.mrf.mxu2  ;;  %1717 = vmatmul.f32.gmra.mxu3 %v4092_v20 }
 0x1de   : > { %1057 = vst [vmem:[%s4396_s8] sm:$0xff] %v1041_v12  ;;  %v4399_v11 = vadd.f32 %v1335_v34, %v1189_v35  ;;  %v849_v9 = vpop.f32.mrf.mxu0  ;;  %v935_v28 = vpop.f32.mrf.mxu1  ;;  %v5806_v12 = vand.u32 4294901760, %v4125_v62  ;;  %v4433_v35 = vadd.s32 24, %v4359_v59 }
 0x1df   : > { %v850_v47 = vadd.f32 %v849_v9, %v4114_v48 }
 0x1e0   : > { %v1339_v32 = vpop.f32.mrf.mxu3  ;;  %vm226_vm9 = vcmp.eq.s32.totalorder %v4433_v35, %v4354_v56 }
 0x1e1   : > { %v932_v61 = vadd.f32 %v931_v14, %v850_v47  ;;  %1423 = vmatmul.f32.gmra.mxu0 %v4095_v27  ;;  %1529 = vmatmul.f32.gmra.mxu1 %v5805_v63  ;;  %v1012_v63 = vsel %vm226_vm9, %v4365_v3, 0.0 }
 0x1e2   : > { %1635 = vmatmul.f32.gmra.mxu2 %v4092_v20 }
 0x1e3   : > { %v1026_v48 = vsel %vm4376_vm6, %v932_v61, 0.0 }
 0x1e4   : > { %v1042_v34 = vadd.f32 %v1026_v48, %v1010_v21  ;;  %v5807_v48 = vand.u32 4294901760, %v4141_v19 }
 0x1e5   : > { %v1197_v14 = vpop.f32.mrf.mxu2  ;;  %1721 = vmatmul.f32.gmra.mxu3 %v4107_v40 }
 0x1e6   : > { %1058 = vst [vmem:[%s4396_s8 + $0x8] sm:$0xff] %v1042_v34  ;;  %v4419_v8 = vadd.f32 %v1339_v32, %v1197_v14  ;;  %v853_v27 = vpop.f32.mrf.mxu0  ;;  %v939_v37 = vpop.f32.mrf.mxu1  ;;  %v4454_v34 = vadd.s32 32, %v4359_v59 }
 0x1e7   : > { %v854_v20 = vadd.f32 %v853_v27, %v4129_v2 }
 0x1e8   : > { %v1343_v39 = vpop.f32.mrf.mxu3  ;;  %vm227_vm10 = vcmp.eq.s32.totalorder %v4454_v34, %v4354_v56 }
 0x1e9   : > { %v936_v5 = vadd.f32 %v935_v28, %v854_v20  ;;  %1428 = vmatmul.f32.gmra.mxu0 %v4110_v45  ;;  %1535 = vmatmul.f32.gmra.mxu1 %v5806_v12  ;;  %v1013_v12 = vsel %vm227_vm10, %v4365_v3, 0.0 }
 0x1ea   : > { %1639 = vmatmul.f32.gmra.mxu2 %v4107_v40 }
 0x1eb   : > { %v1027_v2 = vsel %vm4376_vm6, %v936_v5, 0.0 }
 0x1ec   : > { %v1043_v9 = vadd.f32 %v1027_v2, %v1011_v55  ;;  %v5811_v2 = vand.u32 4294901760, %v4156_v42 }
 0x1ed   : > { %v1205_v28 = vpop.f32.mrf.mxu2  ;;  %1725 = vmatmul.f32.gmra.mxu3 %v4122_v22 }
 0x1ee   : > { %1059 = vst [vmem:[%s4396_s8 + $0x10] sm:$0xff] %v1043_v9  ;;  %v4439_v47 = vadd.f32 %v1343_v39, %v1205_v28  ;;  %v857_v45 = vpop.f32.mrf.mxu0  ;;  %v943_v32 = vpop.f32.mrf.mxu1  ;;  %v4481_v9 = vadd.s32 40, %v4359_v59 }
 0x1ef   : > { %v858_v40 = vadd.f32 %v857_v45, %v4145_v24 }
 0x1f0   : > { %v1347_v61 = vpop.f32.mrf.mxu3  ;;  %vm228_vm12 = vcmp.eq.s32.totalorder %v4481_v9, %v4354_v56 }
 0x1f1   : > { %v940_v21 = vadd.f32 %v939_v37, %v858_v40  ;;  %1433 = vmatmul.f32.gmra.mxu0 %v4125_v62  ;;  %1541 = vmatmul.f32.gmra.mxu1 %v5807_v48  ;;  %v5812_v48 = vand.u32 4294901760, %v4181_v4 }
 0x1f2   : > { %1643 = vmatmul.f32.gmra.mxu2 %v4122_v22  ;;  %v5808_v22 = vmov 0 }
 0x1f3   : > { %v1028_v24 = vsel %vm4376_vm6, %v940_v21, 0.0  ;;  %v5809_v22 = vsel %vm4467_vm11, 4294967295, %v5808_v22 }
 0x1f4   : > { %v1044_v14 = vadd.f32 %v1028_v24, %v1012_v63  ;;  %5810 = vst [vmem:[#allocation18_spill] sm:$0xff] %v5809_v22  ;;  %v1014_v63 = vsel %vm228_vm12, %v4365_v3, 0.0  ;;  %v4504_v24 = vadd.s32 48, %v4359_v59 }
 0x1f5   : > { %v1213_v27 = vpop.f32.mrf.mxu2  ;;  %1729 = vmatmul.f32.gmra.mxu3 %v4138_v29 }
 0x1f6   : > { %1060 = vst [vmem:[%s4396_s8 + $0x18] sm:$0xff] %v1044_v14  ;;  %v4460_v37 = vadd.f32 %v1347_v61, %v1213_v27  ;;  %v861_v62 = vpop.f32.mrf.mxu0  ;;  %v947_v20 = vpop.f32.mrf.mxu1  ;;  %vm229_vm13 = vcmp.eq.s32.totalorder %v4504_v24, %v4354_v56 }
 0x1f7   : > { %v862_v39 = vadd.f32 %v861_v62, %v4162_v46 }
 0x1f8   : > { %v1351_v5 = vpop.f32.mrf.mxu3 }
 0x1f9   : > { %v944_v55 = vadd.f32 %v943_v32, %v862_v39  ;;  %1438 = vmatmul.f32.gmra.mxu0 %v4141_v19  ;;  %1547 = vmatmul.f32.gmra.mxu1 %v5811_v2 }
 0x1fa   : > { %1647 = vmatmul.f32.gmra.mxu2 %v4138_v29 }
 0x1fb   : > { %v1029_v46 = vsel %vm4376_vm6, %v944_v55, 0.0 }
 0x1fc   : > { %v1045_v28 = vadd.f32 %v1029_v46, %v1013_v12  ;;  %v1015_v46 = vsel %vm229_vm13, %v4365_v3, 0.0 }
 0x1fd   : > { %v1221_v45 = vpop.f32.mrf.mxu2  ;;  %1733 = vmatmul.f32.gmra.mxu3 %v4153_v36 }
 0x1fe   : > { %1061 = vst [vmem:[%s4396_s8 + $0x20] sm:$0xff] %v1045_v28  ;;  %v4489_v19 = vadd.f32 %v1351_v5, %v1221_v45  ;;  %v865_v29 = vpop.f32.mrf.mxu0  ;;  %v951_v32 = vpop.f32.mrf.mxu1  ;;  %v3440_v5 = vld [vmem:[%s3439_s24] sm:$0x1]  ;;  %v5813_v28 = vand.u32 4294901760, %v4205_v16  ;;  %v4539_v45 = vadd.s32 56, %v4359_v59  ;;  %s5527_s24 = sshll.u32 %s3459_s20, 4  ;;  %s3463_s24 = int_to_ptr.hbm [resolvable:$true] %s5527_s24 }
 0x1ff   : > { %v866_v40 = vadd.f32 %v865_v29, %v4185_v6  ;;  %3668 = vst [vmem:[%s3985_s12 + $0x3] sm:$0x1] %v3440_v5  ;;  %s3444_s12 = scalar_lea.sflag [#allocation6], %s3972_s19  ;;  %s3785_s15 = sshra.s32 %s3463_s24, 4  ;;  %s3786_s15 = int_to_ptr.hbm [resolvable:$true] %s3785_s15 }
 0x200   : > { %v1355_v61 = vpop.f32.mrf.mxu3  ;;  %vm230_vm14 = vcmp.eq.s32.totalorder %v4539_v45, %v4354_v56  ;;  %s3787_s10 = scalar_lea.hbm %s3786_s15, 4  ;;  %p3792_p13 = scmp.lt.s32.totalorder %s3786_s15, %s5705_s5 }
 0x201   : > { %v948_v21 = vadd.f32 %v947_v20, %v866_v40  ;;  %1443 = vmatmul.f32.gmra.mxu0 %v4156_v42  ;;  %1553 = vmatmul.f32.gmra.mxu1 %v5812_v48  ;;  %v1016_v48 = vsel %vm230_vm14, %v4365_v3, 0.0  ;;  %p3788_p10 = scmp.ne.s32.totalorder %s3786_s15, %s3787_s10  ;;  %p3793_p0 = scmp.lt.s32.totalorder %s3791_s17, %s3787_s10 }
 0x202   : > { %1651 = vmatmul.f32.gmra.mxu2 %v4153_v36  ;;  %v4516_v36 = vld [vmem:[%s2660_s21] sm:$0xff] }
 0x203   : > { %v1030_v6 = vsel %vm4376_vm6, %v948_v21, 0.0  ;;  %v4524_v39 = vand.u32 4294901760, %v4516_v36  ;;  %2664 = vxpose.xlu1.b32.start.end [1/1] (short) %v4516_v36, 128  ;;  %p3789_p11 = pnand %p3788_p10, %p3955_p5  ;;  %p3794_p1 = por %p3793_p0, %p3792_p13 }
 0x204   : > { %v1046_v42 = vadd.f32 %v1030_v6, %v1014_v63  ;;  %v5814_v6 = vand.u32 4294901760, %v4220_v10 }
 0x205   : > { %v1229_v14 = vpop.f32.mrf.mxu2  ;;  %1737 = vmatmul.f32.gmra.mxu3 %v4171_v58  ;;  %2760 = vmatpush.msra.mxu2 %v4524_v39  ;;  %p3790_p12 = pneg %p3789_p11 }
 0x206   : > { %1062 = vst [vmem:[%s4396_s8 + $0x28] sm:$0xff] %v1046_v42  ;;  %v4519_v27 = vadd.f32 %v1355_v61, %v1229_v14  ;;  %v869_v62 = vpop.f32.mrf.mxu0  ;;  %v955_v20 = vpop.f32.mrf.mxu1  ;;  %v4559_v42 = vadd.s32 64, %v4359_v59 }
 0x207   : > { %v870_v55 = vadd.f32 %v869_v62, %v4209_v44  ;;  %p3795_p2 = pnand %p3794_p1, %p3790_p12 }
 0x208   : > { %v1359_v12 = vpop.f32.mrf.mxu3  ;;  %5815 = vst [vmem:[#allocation19_spill] sm:$0xff] %v4559_v42  ;;  %vm231_vm15 = vcmp.eq.s32.totalorder %v4559_v42, %v4354_v56 }
 0x209   : > { %v952_v2 = vadd.f32 %v951_v32, %v870_v55  ;;  %1448 = vmatmul.f32.gmra.mxu0 %v4181_v4  ;;  %1559 = vmatmul.f32.gmra.mxu1 %v5813_v28  ;;  %v4579_v28 = vadd.s32 72, %v4359_v59 }
 0x20a   : > { %1655 = vmatmul.f32.gmra.mxu2 %v4171_v58 }
 0x20b   : > { %v1031_v44 = vsel %vm4376_vm6, %v952_v2, 0.0  ;;  %v1017_v2 = vsel %vm231_vm15, %v4365_v3, 0.0  ;;  %5817 = vst [vmem:[#allocation20_spill] sm:$0xff] %v4579_v28  ;;  %vm232_vm1 = vcmp.eq.s32.totalorder %v4579_v28, %v4354_v56 }
 0x20c   : > { %v1047_v29 = vadd.f32 %v1031_v44, %v1015_v46  ;;  %v5816_v46 = vand.u32 4294901760, %v4235_v43 }
 0x20d   : > { %v1237_v32 = vpop.f32.mrf.mxu2  ;;  %1741 = vmatmul.f32.gmra.mxu3 %v4201_v33 }
 0x20e   : > { %1063 = vst [vmem:[%s4396_s8 + $0x30] sm:$0xff] %v1047_v29  ;;  %v4545_v40 = vadd.f32 %v1359_v12, %v1237_v32  ;;  %v873_v4 = vpop.f32.mrf.mxu0  ;;  %v959_v61 = vpop.f32.mrf.mxu1 }
 0x20f   : > { %v874_v58 = vadd.f32 %v873_v4, %v4225_v50 }
 0x210   : > { %v1363_v21 = vpop.f32.mrf.mxu3 }
 0x211   : > { %v956_v63 = vadd.f32 %v955_v20, %v874_v58  ;;  %1453 = vmatmul.f32.gmra.mxu0 %v4205_v16  ;;  %1565 = vmatmul.f32.gmra.mxu1 %v5814_v6 }
 0x212   : > { %1659 = vmatmul.f32.gmra.mxu2 %v4201_v33 }
 0x213   : > { %v1032_v50 = vsel %vm4376_vm6, %v956_v63, 0.0  ;;  %v5818_v63 = vand.u32 4294901760, %v4256_v38 }
 0x214   : > { %v1048_v14 = vadd.f32 %v1032_v50, %v1016_v48  ;;  %v4599_v48 = vadd.s32 80, %v4359_v59 }
 0x215   : > { %v1245_v62 = vpop.f32.mrf.mxu2  ;;  %1745 = vmatmul.f32.gmra.mxu3 %v4217_v60 }
 0x216   : > { %1064 = vst [vmem:[%s4396_s8 + $0x38] sm:$0xff] %v1048_v14  ;;  %v4565_v20 = vadd.f32 %v1363_v21, %v1245_v62  ;;  %v877_v16 = vpop.f32.mrf.mxu0  ;;  %v963_v5 = vpop.f32.mrf.mxu1  ;;  %v1018_v21 = vsel %vm232_vm1, %v4365_v3, 0.0  ;;  %vm233_vm2 = vcmp.eq.s32.totalorder %v4599_v48, %v4354_v56 }
 0x217   : > { %v878_v33 = vadd.f32 %v877_v16, %v4240_v57  ;;  %5819 = vst [vmem:[#allocation21_spill] sm:$0xff] %v4599_v48  ;;  %v4614_v16 = vld [vmem:[%s1084_s18] sm:$0x1] }
 0x218   : > { %v1367_v55 = vpop.f32.mrf.mxu3 }
 0x219   : > { %v960_v12 = vadd.f32 %v959_v61, %v878_v33  ;;  %1458 = vmatmul.f32.gmra.mxu0 %v4220_v10  ;;  %1571 = vmatmul.f32.gmra.mxu1 %v5816_v46  ;;  %v1778_v46 = vand.u32 2147483647, %v4614_v16 }
 0x21a   : > { %1663 = vmatmul.f32.gmra.mxu2 %v4217_v60 }
 0x21b   : > { %v1033_v57 = vsel %vm4467_vm11, %v960_v12, 0.0  ;;  %v5820_v12 = vand.u32 4294901760, %v4272_v17 }
 0x21c   : > { %v1049_v44 = vadd.f32 %v1033_v57, %v1017_v2  ;;  %v4625_v2 = vadd.s32 88, %v4359_v59 }
 0x21d   : > { %v1253_v29 = vpop.f32.mrf.mxu2  ;;  %1749 = vmatmul.f32.gmra.mxu3 %v4232_v0 }
 0x21e   : > { %1065 = vst [vmem:[%s4396_s8 + $0x40] sm:$0xff] %v1049_v44  ;;  %v4585_v32 = vadd.f32 %v1367_v55, %v1253_v29  ;;  %v881_v10 = vpop.f32.mrf.mxu0  ;;  %v967_v60 = vpop.f32.mrf.mxu1  ;;  %v1019_v55 = vsel %vm233_vm2, %v4365_v3, 0.0  ;;  %vm5733_vm3 = vcmp.eq.s32.totalorder %v4625_v2, %v4354_v56 }
 0x21f   : > { %v882_v4 = vadd.f32 %v881_v10, %v4261_v54  ;;  %5821 = vst [vmem:[#allocation22_spill] sm:$0xff] %v4625_v2 }
 0x220   : > { %v1371_v61 = vpop.f32.mrf.mxu3 }
 0x221   : > { %v964_v58 = vadd.f32 %v963_v5, %v882_v4  ;;  %1463 = vmatmul.f32.gmra.mxu0 %v4235_v43  ;;  %1577 = vmatmul.f32.gmra.mxu1 %v5818_v63  ;;  %v5822_v63 = vand.u32 4294901760, %v4287_v26 }
 0x222   : > { %1667 = vmatmul.f32.gmra.mxu2 %v4232_v0 }
 0x223   : > { %v1034_v54 = vsel %vm4467_vm11, %v964_v58, 0.0 }
 0x224   : > { %v1050_v6 = vadd.f32 %v1034_v54, %v1018_v21  ;;  %v1020_v21 = vsel %vm5733_vm3, %v4365_v3, 0.0  ;;  %v4648_v54 = vsub.f32 %v4516_v36, %v4524_v39 }
 0x225   : > { %v1261_v50 = vpop.f32.mrf.mxu2  ;;  %1753 = vmatmul.f32.gmra.mxu3 %v4251_v13 }
 0x226   : > { %1066 = vst [vmem:[%s4396_s8 + $0x48] sm:$0xff] %v1050_v6  ;;  %v4609_v43 = vadd.f32 %v1371_v61, %v1261_v50  ;;  %v885_v0 = vpop.f32.mrf.mxu0  ;;  %v971_v14 = vpop.f32.mrf.mxu1 }
 0x227   : > { %v886_v62 = vadd.f32 %v885_v0, %v4277_v53  ;;  %v4627_v53 = vpop.trf.xlu1 }
 0x228   : > { %v1375_v5 = vpop.f32.mrf.mxu3 }
 0x229   : > { %v968_v33 = vadd.f32 %v967_v60, %v886_v62  ;;  %1468 = vmatmul.f32.gmra.mxu0 %v4256_v38  ;;  %1583 = vmatmul.f32.gmra.mxu1 %v5820_v12  ;;  %v1779_v60 = vsub.f32 0.0, %v1778_v46  ;;  %v5734_v62 = vand.u32 4294901760, %v4648_v54 }
 0x22a   : > { %1671 = vmatmul.f32.gmra.mxu2 %v4251_v13 }
 0x22b   : > { %v1035_v57 = vsel %vm4467_vm11, %v968_v33, 0.0  ;;  %v1780_v50 = vmul.f32 1.442695, %v1779_v60  ;;  %v5824_v33 = vld [vmem:[#allocation15_spill] sm:$0xff] }
 0x22c   : > { %v1051_v44 = vadd.f32 %v1035_v57, %v1019_v55 }
 0x22d   : > { %v1269_v29 = vpop.f32.mrf.mxu2  ;;  %1757 = vmatmul.f32.gmra.mxu3 %v4269_v18  ;;  %3735 = vpow2.f32 %v1780_v50 }
 0x22e   : > { %1067 = vst [vmem:[%s4396_s8 + $0x50] sm:$0xff] %v1051_v44  ;;  %v4634_v38 = vadd.f32 %v1375_v5, %v1269_v29  ;;  %v889_v13 = vpop.f32.mrf.mxu0  ;;  %v975_v10 = vpop.f32.mrf.mxu1  ;;  %v5825_v44 = vld [vmem:[#allocation14_spill] sm:$0xff] }
 0x22f   : > { %v890_v4 = vadd.f32 %v889_v13, %v4292_v41  ;;  %v4652_v41 = vadd.s32 96, %v4359_v59  ;;  %v4654_v6 = vpop.trf.xlu1  ;;  %v5826_v29 = vand.u32 4294901760, %v5825_v44  ;;  %v4675_v13 = vadd.s32 104, %v4359_v59 }
 0x230   : > { %v1379_v61 = vpop.f32.mrf.mxu3 }
 0x231   : > { %v972_v58 = vadd.f32 %v971_v14, %v890_v4  ;;  %1473 = vmatmul.f32.gmra.mxu0 %v4272_v17  ;;  %1589 = vmatmul.f32.gmra.mxu1 %v5822_v63  ;;  %5823 = vst [vmem:[#allocation23_spill] sm:$0xff] %v4652_v41  ;;  %vm5730_vm4 = vcmp.eq.s32.totalorder %v4652_v41, %v4354_v56  ;;  %v5828_v63 = vld [vmem:[#allocation13_spill] sm:$0xff] }
 0x232   : > { %1675 = vmatmul.f32.gmra.mxu2 %v4269_v18  ;;  %v1021_v57 = vsel %vm5730_vm4, %v4365_v3, 0.0  ;;  %5827 = vst [vmem:[#allocation15_spill] sm:$0xff] %v4675_v13  ;;  %vm5731_vm4 = vcmp.eq.s32.totalorder %v4675_v13, %v4354_v56 }
 0x233   : > { %v1036_v0 = vsel %vm4467_vm11, %v972_v58, 0.0 }
 0x234   : > { %v1052_v14 = vadd.f32 %v1036_v0, %v1020_v21 }
 0x235   : > { %v1277_v17 = vpop.f32.mrf.mxu2  ;;  %1761 = vmatmul.f32.gmra.mxu3 %v4284_v23 }
 0x236   : > { %1068 = vst [vmem:[%s4396_s8 + $0x58] sm:$0xff] %v1052_v14  ;;  %v4661_v36 = vadd.f32 %v1379_v61, %v1277_v17  ;;  %v893_v18 = vpop.f32.mrf.mxu0  ;;  %v979_v5 = vpop.f32.mrf.mxu1  ;;  %v5829_v14 = vld [vmem:[#allocation17_spill] sm:$0xff] }
 0x237   : > { %v894_v55 = vadd.f32 %v893_v18, %v5824_v33  ;;  %v4677_v60 = vpop.trf.xlu1 }
 0x238   : > { %v1383_v12 = vpop.f32.mrf.mxu3 }
 0x239   : > { %v976_v46 = vadd.f32 %v975_v10, %v894_v55  ;;  %1478 = vmatmul.f32.gmra.mxu0 %v4287_v26  ;;  %1595 = vmatmul.f32.gmra.mxu1 %v5826_v29  ;;  %v2908_v10 = vsub.f32 %v4648_v54, %v5734_v62  ;;  %v3736_v26 = vpop.eup %3735 }
 0x23a   : > { %1679 = vmatmul.f32.gmra.mxu2 %v4284_v23  ;;  %v1782_v18 = vadd.f32 1.0, %v3736_v26 }
 0x23b   : > { %v1037_v4 = vsel %vm4467_vm11, %v976_v46, 0.0  ;;  %v2909_v58 = vand.u32 4294901760, %v2908_v10  ;;  %v1022_v46 = vsel %vm5731_vm4, %v4365_v3, 0.0 }
 0x23c   : > { %v1053_v61 = vadd.f32 %v1037_v4, %v1021_v57  ;;  %v4700_v57 = vadd.s32 112, %v4359_v59  ;;  %3737 = vlog2.f32 %v1782_v18  ;;  %v1908_v4 = vsel %vm330_vm0, %v4627_v53, 0 }
 0x23d   : > { %v1285_v21 = vpop.f32.mrf.mxu2  ;;  %1765 = vmatmul.f32.gmra.mxu3 %v5828_v63 }
 0x23e   : > { %1069 = vst [vmem:[%s4396_s8 + $0x60] sm:$0xff] %v1053_v61  ;;  %v4686_v23 = vadd.f32 %v1383_v12, %v1285_v21  ;;  %v897_v50 = vpop.f32.mrf.mxu0  ;;  %v983_v0 = vpop.f32.mrf.mxu1  ;;  %2910 = vmatpush.msra.mxu3 %v2909_v58  ;;  %v5830_v12 = vand.u32 4294901760, %v4321_v31  ;;  %v1785_v61 = vmul.f32 -0.5, %v3736_v26  ;;  %v5832_v58 = vld [vmem:[#allocation16_spill] sm:$0xff]  ;;  %vm5732_vm4 = vcmp.eq.s32.totalorder %v4700_v57, %v4354_v56 }
 0x23f   : > { %v898_v17 = vadd.f32 %v897_v50, %v5829_v14  ;;  %5831 = vst [vmem:[#allocation14_spill] sm:$0xff] %v4700_v57  ;;  %v4702_v29 = vpop.trf.xlu1  ;;  %v1023_v53 = vsel %vm5732_vm4, %v4365_v3, 0.0 }
 0x240   : > { %v1387_v33 = vpop.f32.mrf.mxu3 }
 0x241   : > { %v980_v55 = vadd.f32 %v979_v5, %v898_v17  ;;  %1483 = vmatmul.f32.gmra.mxu0 %v5825_v44  ;;  %1601 = vmatmul.f32.gmra.mxu1 %v5830_v12  ;;  %v4715_v17 = vand.u32 4294901760, %v1908_v4  ;;  %v1788_v12 = vand.u32 2147483647, %v3736_v26 }
 0x242   : > { %1683 = vmatmul.f32.gmra.mxu2 %v5828_v63 }
 0x243   : > { %v1038_v5 = vsel %vm4467_vm11, %v980_v55, 0.0  ;;  %v1786_v55 = vadd.f32 1.0, %v1785_v61  ;;  %vm4736_vm4 = vcmp.lt.f32.partialorder %v1788_v12, 0.0004427343 }
 0x244   : > { %v1054_v10 = vadd.f32 %v1038_v5, %v1022_v46 }
 0x245   : > { %v1293_v44 = vpop.f32.mrf.mxu2  ;;  %1769 = vmatmul.f32.gmra.mxu3 %v5832_v58 }
 0x246   : > { %1070 = vst [vmem:[%s4396_s8 + $0x68] sm:$0xff] %v1054_v10  ;;  %v4710_v21 = vadd.f32 %v1387_v33, %v1293_v44  ;;  %v901_v63 = vpop.f32.mrf.mxu0  ;;  %v987_v50 = vpop.f32.mrf.mxu1  ;;  %v1973_v10 = vsub.f32 %v1908_v4, %v4715_v17 }
 0x247   : > { %v902_v14 = vadd.f32 %v901_v63, %v4348_v7  ;;  %v3738_v33 = vpop.eup %3737  ;;  %v4726_v7 = vadd.s32 120, %v4359_v59  ;;  %v4728_v5 = vpop.trf.xlu1 }
 0x248   : > { %v1391_v18 = vpop.f32.mrf.mxu3  ;;  %v1784_v44 = vmul.f32 0.6931472, %v3738_v33 }
 0x249   : > { %v984_v46 = vadd.f32 %v983_v0, %v902_v14  ;;  %1488 = vmatmul.f32.gmra.mxu0 %v4321_v31  ;;  %1607 = vmatmul.f32.gmra.mxu1 %v1305_v1  ;;  %5833 = vst [vmem:[#allocation13_spill] sm:$0xff] %v4726_v7  ;;  %v1911_v31 = vsel %vm330_vm0, %v4654_v6, 0  ;;  %v1787_v1 = vmul.f32 %v3736_v26, %v1786_v55  ;;  %v1777_v26 = vmax.f32 %v4614_v16, 0.0 }
 0x24a   : > { %1687 = vmatmul.f32.gmra.mxu2 %v5832_v58  ;;  %vm238_vm3 = vcmp.eq.s32.totalorder %v4726_v7, %v4354_v56  ;;  %v4746_v33 = vand.u32 4294901760, %v1911_v31 }
 0x24b   : > { %v1039_v0 = vsel %vm4467_vm11, %v984_v46, 0.0  ;;  %v1790_v12 = vsel %vm4736_vm4, %v1787_v1, %v1784_v44  ;;  %vm5837_vm4 = vcmp.eq.s32.totalorder %v4625_v2, %v4354_v56 }
 0x24c   : > { %v1055_v61 = vadd.f32 %v1039_v0, %v1023_v53  ;;  %v1974_v53 = vand.u32 4294901760, %v1973_v10  ;;  %v1791_v44 = vadd.f32 %v1790_v12, %v1777_v26 }
 0x24d   : > { %v1301_v63 = vpop.f32.mrf.mxu2  ;;  %1773 = vmatmul.f32.gmra.mxu3 %v4337_v25 }
 0x24e   : > { %1071 = vst [vmem:[%s4396_s8 + $0x70] sm:$0xff] %v1055_v61  ;;  %v4741_v14 = vadd.f32 %v1391_v18, %v1301_v63  ;;  %v905_v4 = vpop.f32.mrf.mxu0  ;;  %v1518_v46 = vpop.f32.mrf.mxu1  ;;  %v1024_v18 = vsel %vm238_vm3, %v4365_v3, 0.0  ;;  %v1975_v16 = vsub.f32 %v1973_v10, %v1974_v53  ;;  %v1914_v3 = vsel %vm330_vm0, %v4677_v60, 0 }
 0x24f   : > { %v906_v6 = vadd.f32 %v905_v4, %v4363_v52  ;;  %v4758_v52 = vpop.trf.xlu1  ;;  %v1792_v62 = vadd.f32 1.1920929e-07, %v1791_v44 }
 0x250   : > { %v1395_v55 = vpop.f32.mrf.mxu3  ;;  %v1976_v4 = vand.u32 4294901760, %v1975_v16 }
 0x251   : > { %v988_v0 = vadd.f32 %v987_v50, %v906_v6  ;;  %1493 = vmatmul.f32.gmra.mxu0 %v4341_v49  ;;  %2123 = vmatmul.f32.vlgmr.msrb.gmra.mxu1 %v4715_v17  ;;  %v1981_v50 = vsub.f32 %v1911_v31, %v4746_v33  ;;  %v4770_v6 = vand.u32 4294901760, %v1914_v3  ;;  %v4780_v12 = vperm.slane %v1792_v62, 0 }
 0x252   : > { %1691 = vmatmul.f32.gmra.mxu2 %v4337_v25  ;;  %3091 = vmatpush.msrb.mxu1 %v4524_v39 }
 0x253   : > { %v1040_v61 = vsel %vm4467_vm11, %v988_v0, 0.0  ;;  %v1982_v0 = vand.u32 4294901760, %v1981_v50 }
 0x254   : > { %v1056_v1 = vadd.f32 %v1040_v61, %v1024_v18 }
 0x255   : > { %v1309_v49 = vpop.f32.mrf.mxu2  ;;  %2306 = vmatmul.f32.vlgmr.msrb.gmra.mxu3 %v1974_v53  ;;  %v1989_v53 = vsub.f32 %v1914_v3, %v4770_v6 }
 0x256   : > { %1072 = vst [vmem:[%s4396_s8 + $0x78] sm:$0xff] %v1056_v1  ;;  %v4767_v63 = vadd.f32 %v1395_v55, %v1309_v49  ;;  %v1419_v25 = vpop.f32.mrf.mxu0  ;;  %v1524_v58 = vpop.f32.mrf.mxu1  ;;  %3289 = vmatpush.msrb.mxu3 %v4524_v39  ;;  %v1983_v55 = vsub.f32 %v1981_v50, %v1982_v0  ;;  %v5836_v39 = vand.u32 4294901760, %v4648_v54 }
 0x257   : > { %v1420_v31 = vadd.f32 %v1419_v25, %v4399_v11  ;;  %v4774_v60 = vpop.trf.xlu1  ;;  %v1917_v11 = vsel %vm330_vm0, %v4702_v29, 0  ;;  %v1990_v3 = vand.u32 4294901760, %v1989_v53 }
 0x258   : > { %v1714_v26 = vpop.f32.mrf.mxu3  ;;  %v4784_v1 = vand.u32 4294901760, %v1917_v11  ;;  %v1984_v49 = vand.u32 4294901760, %v1983_v55 }
 0x259   : > { %1977 = vmatmul.f32.vlgmr.msrb.gmra.mxu0 %v1976_v4  ;;  %2127 = vmatmul.f32.gmra.mxu1 %v4746_v33  ;;  %v1519_v18 = vadd.f32 %v1518_v46, %v1420_v31 }
 0x25a   : > { %2207 = vmatmul.f32.vlgmr.msrb.gmra.mxu2 %v1973_v10  ;;  %2993 = vmatpush.msrb.mxu0 %v4648_v54  ;;  %v1796_v54 = vsel %vm223_vm5, %v4780_v12, 0.0  ;;  %v1997_v31 = vsub.f32 %v1917_v11, %v4784_v1 }
 0x25b   : > { %3207 = vmatpush.msrb.mxu2 %v5836_v39  ;;  %v1920_v39 = vsel %vm330_vm0, %v4728_v5, 0 }
 0x25d   : > { %v1632_v16 = vpop.f32.mrf.mxu2  ;;  %2312 = vmatmul.f32.gmra.mxu3 %v1982_v0 }
 0x25e   : > { %v1633_v61 = vadd.f32 %v1632_v16, %v1519_v18  ;;  %v1424_v10 = vpop.f32.mrf.mxu0  ;;  %v1530_v44 = vpop.f32.mrf.mxu1 }
 0x25f   : > { %v1425_v62 = vadd.f32 %v1424_v10, %v4419_v8  ;;  %v4794_v4 = vpop.trf.xlu1  ;;  %v4800_v10 = vand.u32 4294901760, %v1920_v39 }
 0x260   : > { %v1715_v25 = vadd.f32 %v1714_v26, %v1633_v61  ;;  %v1718_v46 = vpop.f32.mrf.mxu3  ;;  %v1991_v26 = vsub.f32 %v1989_v53, %v1990_v3 }
 0x261   : > { %1985 = vmatmul.f32.gmra.mxu0 %v1984_v49  ;;  %2131 = vmatmul.f32.gmra.mxu1 %v4770_v6  ;;  %v1525_v55 = vadd.f32 %v1524_v58, %v1425_v62  ;;  %v1797_v58 = vsel %vm224_vm7, %v4780_v12, 0.0 }
 0x262   : > { %v1812_v29 = vsel %vm4376_vm6, %v1715_v25, 0.0  ;;  %2212 = vmatmul.f32.gmra.mxu2 %v1981_v50  ;;  %v1992_v49 = vand.u32 4294901760, %v1991_v26  ;;  %v1998_v50 = vand.u32 4294901760, %v1997_v31  ;;  %v1923_v26 = vsel %vm330_vm0, %v4758_v52, 0 }
 0x263   : > { %v1828_v0 = vadd.f32 %v1812_v29, %v1796_v54 }
 0x264   : > { %v1999_v29 = vsub.f32 %v1997_v31, %v1998_v50 }
 0x265   : > { %3614 = vst [vmem:[%s4396_s8 + $0x80] sm:$0xff] %v1828_v0  ;;  %v1636_v8 = vpop.f32.mrf.mxu2  ;;  %2318 = vmatmul.f32.gmra.mxu3 %v1990_v3 }
 0x266   : > { %v1637_v18 = vadd.f32 %v1636_v8, %v1525_v55  ;;  %v1429_v16 = vpop.f32.mrf.mxu0  ;;  %v1536_v61 = vpop.f32.mrf.mxu1 }
 0x267   : > { %v1430_v11 = vadd.f32 %v1429_v16, %v4439_v47  ;;  %v4810_v54 = vpop.trf.xlu1  ;;  %v4816_v16 = vand.u32 4294901760, %v1923_v26 }
 0x268   : > { %v1719_v25 = vadd.f32 %v1718_v46, %v1637_v18  ;;  %v1722_v5 = vpop.f32.mrf.mxu3  ;;  %v2005_v46 = vsub.f32 %v1920_v39, %v4800_v10 }
 0x269   : > { %1993 = vmatmul.f32.gmra.mxu0 %v1992_v49  ;;  %2135 = vmatmul.f32.gmra.mxu1 %v4784_v1  ;;  %v1531_v0 = vadd.f32 %v1530_v44, %v1430_v11  ;;  %v2000_v49 = vand.u32 4294901760, %v1999_v29  ;;  %v1798_v44 = vsel %vm225_vm8, %v4780_v12, 0.0  ;;  %v1926_v29 = vsel %vm330_vm0, %v4774_v60, 0 }
 0x26a   : > { %v1813_v3 = vsel %vm4376_vm6, %v1719_v25, 0.0  ;;  %2217 = vmatmul.f32.gmra.mxu2 %v1989_v53  ;;  %v2006_v53 = vand.u32 4294901760, %v2005_v46 }
 0x26b   : > { %v1829_v62 = vadd.f32 %v1813_v3, %v1797_v58 }
 0x26c   : > { %v2007_v3 = vsub.f32 %v2005_v46, %v2006_v53 }
 0x26d   : > { %3615 = vst [vmem:[%s4396_s8 + $0x88] sm:$0xff] %v1829_v62  ;;  %v1640_v47 = vpop.f32.mrf.mxu2  ;;  %2324 = vmatmul.f32.gmra.mxu3 %v1998_v50 }
 0x26e   : > { %v1641_v55 = vadd.f32 %v1640_v47, %v1531_v0  ;;  %v1434_v8 = vpop.f32.mrf.mxu0  ;;  %v1542_v18 = vpop.f32.mrf.mxu1 }
 0x26f   : > { %v1435_v39 = vadd.f32 %v1434_v8, %v4460_v37  ;;  %v4826_v58 = vpop.trf.xlu1  ;;  %v4832_v8 = vand.u32 4294901760, %v1926_v29 }
 0x270   : > { %v1723_v25 = vadd.f32 %v1722_v5, %v1641_v55  ;;  %v1726_v52 = vpop.f32.mrf.mxu3  ;;  %v2013_v5 = vsub.f32 %v1923_v26, %v4816_v16 }
 0x271   : > { %2001 = vmatmul.f32.gmra.mxu0 %v2000_v49  ;;  %2139 = vmatmul.f32.gmra.mxu1 %v4800_v10  ;;  %v1537_v62 = vadd.f32 %v1536_v61, %v1435_v39  ;;  %v2008_v49 = vand.u32 4294901760, %v2007_v3  ;;  %v1799_v61 = vsel %vm226_vm9, %v4780_v12, 0.0  ;;  %v1929_v3 = vsel %vm330_vm0, %v4794_v4, 0 }
 0x272   : > { %v1814_v50 = vsel %vm4376_vm6, %v1723_v25, 0.0  ;;  %2222 = vmatmul.f32.gmra.mxu2 %v1997_v31  ;;  %v2014_v31 = vand.u32 4294901760, %v2013_v5 }
 0x273   : > { %v1830_v11 = vadd.f32 %v1814_v50, %v1798_v44 }
 0x274   : > { %v2015_v50 = vsub.f32 %v2013_v5, %v2014_v31 }
 0x275   : > { %3616 = vst [vmem:[%s4396_s8 + $0x90] sm:$0xff] %v1830_v11  ;;  %v1644_v37 = vpop.f32.mrf.mxu2  ;;  %2330 = vmatmul.f32.gmra.mxu3 %v2006_v53 }
 0x276   : > { %v1645_v0 = vadd.f32 %v1644_v37, %v1537_v62  ;;  %v1439_v47 = vpop.f32.mrf.mxu0  ;;  %v1548_v55 = vpop.f32.mrf.mxu1 }
 0x277   : > { %v1440_v26 = vadd.f32 %v1439_v47, %v4489_v19  ;;  %v4842_v44 = vpop.trf.xlu1  ;;  %v4848_v47 = vand.u32 4294901760, %v1929_v3 }
 0x278   : > { %v1727_v25 = vadd.f32 %v1726_v52, %v1645_v0  ;;  %v1730_v60 = vpop.f32.mrf.mxu3  ;;  %v2021_v52 = vsub.f32 %v1926_v29, %v4832_v8 }
 0x279   : > { %2009 = vmatmul.f32.gmra.mxu0 %v2008_v49  ;;  %2143 = vmatmul.f32.gmra.mxu1 %v4816_v16  ;;  %v1543_v11 = vadd.f32 %v1542_v18, %v1440_v26  ;;  %v2016_v49 = vand.u32 4294901760, %v2015_v50  ;;  %v1800_v18 = vsel %vm227_vm10, %v4780_v12, 0.0  ;;  %v1932_v50 = vsel %vm330_vm0, %v4810_v54, 0 }
 0x27a   : > { %v1815_v53 = vsel %vm4376_vm6, %v1727_v25, 0.0  ;;  %2227 = vmatmul.f32.gmra.mxu2 %v2005_v46  ;;  %v2022_v46 = vand.u32 4294901760, %v2021_v52 }
 0x27b   : > { %v1831_v39 = vadd.f32 %v1815_v53, %v1799_v61 }
 0x27c   : > { %v2023_v53 = vsub.f32 %v2021_v52, %v2022_v46 }
 0x27d   : > { %3617 = vst [vmem:[%s4396_s8 + $0x98] sm:$0xff] %v1831_v39  ;;  %v1648_v19 = vpop.f32.mrf.mxu2  ;;  %2336 = vmatmul.f32.gmra.mxu3 %v2014_v31 }
 0x27e   : > { %v1649_v62 = vadd.f32 %v1648_v19, %v1543_v11  ;;  %v1444_v37 = vpop.f32.mrf.mxu0  ;;  %v1554_v0 = vpop.f32.mrf.mxu1 }
 0x27f   : > { %v1445_v29 = vadd.f32 %v1444_v37, %v4519_v27  ;;  %v4858_v61 = vpop.trf.xlu1  ;;  %v4864_v37 = vand.u32 4294901760, %v1932_v50 }
 0x280   : > { %v1731_v25 = vadd.f32 %v1730_v60, %v1649_v62  ;;  %v1734_v4 = vpop.f32.mrf.mxu3  ;;  %v2029_v60 = vsub.f32 %v1929_v3, %v4848_v47 }
 0x281   : > { %2017 = vmatmul.f32.gmra.mxu0 %v2016_v49  ;;  %2147 = vmatmul.f32.gmra.mxu1 %v4832_v8  ;;  %v1549_v39 = vadd.f32 %v1548_v55, %v1445_v29  ;;  %v2024_v49 = vand.u32 4294901760, %v2023_v53  ;;  %v1801_v55 = vsel %vm228_vm12, %v4780_v12, 0.0  ;;  %v1935_v53 = vsel %vm330_vm0, %v4826_v58, 0 }
 0x282   : > { %v1816_v31 = vsel %vm4376_vm6, %v1731_v25, 0.0  ;;  %2232 = vmatmul.f32.gmra.mxu2 %v2013_v5  ;;  %v2030_v5 = vand.u32 4294901760, %v2029_v60 }
 0x283   : > { %v1832_v26 = vadd.f32 %v1816_v31, %v1800_v18 }
 0x284   : > { %v2031_v31 = vsub.f32 %v2029_v60, %v2030_v5 }
 0x285   : > { %3618 = vst [vmem:[%s4396_s8 + $0xa0] sm:$0xff] %v1832_v26  ;;  %v1652_v27 = vpop.f32.mrf.mxu2  ;;  %2342 = vmatmul.f32.gmra.mxu3 %v2022_v46 }
 0x286   : > { %v1653_v11 = vadd.f32 %v1652_v27, %v1549_v39  ;;  %v1449_v19 = vpop.f32.mrf.mxu0  ;;  %v1560_v62 = vpop.f32.mrf.mxu1 }
 0x287   : > { %v1450_v3 = vadd.f32 %v1449_v19, %v4545_v40  ;;  %v4874_v18 = vpop.trf.xlu1  ;;  %v4880_v19 = vand.u32 4294901760, %v1935_v53 }
 0x288   : > { %v1735_v25 = vadd.f32 %v1734_v4, %v1653_v11  ;;  %v1738_v54 = vpop.f32.mrf.mxu3  ;;  %v2037_v4 = vsub.f32 %v1932_v50, %v4864_v37 }
 0x289   : > { %2025 = vmatmul.f32.gmra.mxu0 %v2024_v49  ;;  %2151 = vmatmul.f32.gmra.mxu1 %v4848_v47  ;;  %v1555_v26 = vadd.f32 %v1554_v0, %v1450_v3  ;;  %v2032_v49 = vand.u32 4294901760, %v2031_v31  ;;  %v1802_v0 = vsel %vm229_vm13, %v4780_v12, 0.0  ;;  %v1938_v31 = vsel %vm330_vm0, %v4842_v44, 0 }
 0x28a   : > { %v1817_v46 = vsel %vm4376_vm6, %v1735_v25, 0.0  ;;  %2237 = vmatmul.f32.gmra.mxu2 %v2021_v52  ;;  %v2038_v52 = vand.u32 4294901760, %v2037_v4 }
 0x28b   : > { %v1833_v29 = vadd.f32 %v1817_v46, %v1801_v55 }
 0x28c   : > { %v2039_v46 = vsub.f32 %v2037_v4, %v2038_v52 }
 0x28d   : > { %3619 = vst [vmem:[%s4396_s8 + $0xa8] sm:$0xff] %v1833_v29  ;;  %v1656_v40 = vpop.f32.mrf.mxu2  ;;  %2348 = vmatmul.f32.gmra.mxu3 %v2030_v5 }
 0x28e   : > { %v1657_v39 = vadd.f32 %v1656_v40, %v1555_v26  ;;  %v1454_v27 = vpop.f32.mrf.mxu0  ;;  %v1566_v11 = vpop.f32.mrf.mxu1 }
 0x28f   : > { %v1455_v50 = vadd.f32 %v1454_v27, %v4565_v20  ;;  %v4890_v55 = vpop.trf.xlu1  ;;  %v4896_v27 = vand.u32 4294901760, %v1938_v31 }
 0x290   : > { %v1739_v25 = vadd.f32 %v1738_v54, %v1657_v39  ;;  %v1742_v58 = vpop.f32.mrf.mxu3  ;;  %v2045_v54 = vsub.f32 %v1935_v53, %v4880_v19 }
 0x291   : > { %2033 = vmatmul.f32.gmra.mxu0 %v2032_v49  ;;  %2155 = vmatmul.f32.gmra.mxu1 %v4864_v37  ;;  %v1561_v29 = vadd.f32 %v1560_v62, %v1455_v50  ;;  %v2040_v49 = vand.u32 4294901760, %v2039_v46  ;;  %v1803_v62 = vsel %vm230_vm14, %v4780_v12, 0.0  ;;  %v1941_v46 = vsel %vm330_vm0, %v4858_v61, 0 }
 0x292   : > { %v1818_v5 = vsel %vm4376_vm6, %v1739_v25, 0.0  ;;  %2242 = vmatmul.f32.gmra.mxu2 %v2029_v60  ;;  %v2046_v60 = vand.u32 4294901760, %v2045_v54 }
 0x293   : > { %v1834_v3 = vadd.f32 %v1818_v5, %v1802_v0 }
 0x294   : > { %v2047_v5 = vsub.f32 %v2045_v54, %v2046_v60 }
 0x295   : > { %3620 = vst [vmem:[%s4396_s8 + $0xb0] sm:$0xff] %v1834_v3  ;;  %v1660_v20 = vpop.f32.mrf.mxu2  ;;  %2354 = vmatmul.f32.gmra.mxu3 %v2038_v52 }
 0x296   : > { %v1661_v26 = vadd.f32 %v1660_v20, %v1561_v29  ;;  %v1459_v40 = vpop.f32.mrf.mxu0  ;;  %v1572_v39 = vpop.f32.mrf.mxu1 }
 0x297   : > { %v1460_v53 = vadd.f32 %v1459_v40, %v4585_v32  ;;  %v4906_v0 = vpop.trf.xlu1  ;;  %v4912_v40 = vand.u32 4294901760, %v1941_v46 }
 0x298   : > { %v1743_v25 = vadd.f32 %v1742_v58, %v1661_v26  ;;  %v1746_v44 = vpop.f32.mrf.mxu3  ;;  %v2053_v58 = vsub.f32 %v1938_v31, %v4896_v27 }
 0x299   : > { %2041 = vmatmul.f32.gmra.mxu0 %v2040_v49  ;;  %2159 = vmatmul.f32.gmra.mxu1 %v4880_v19  ;;  %v1567_v3 = vadd.f32 %v1566_v11, %v1460_v53  ;;  %v2048_v49 = vand.u32 4294901760, %v2047_v5  ;;  %v1804_v11 = vsel %vm231_vm15, %v4780_v12, 0.0  ;;  %v1944_v5 = vsel %vm330_vm0, %v4874_v18, 0 }
 0x29a   : > { %v1819_v52 = vsel %vm4376_vm6, %v1743_v25, 0.0  ;;  %2247 = vmatmul.f32.gmra.mxu2 %v2037_v4  ;;  %v2054_v4 = vand.u32 4294901760, %v2053_v58 }
 0x29b   : > { %v1835_v50 = vadd.f32 %v1819_v52, %v1803_v62 }
 0x29c   : > { %v2055_v52 = vsub.f32 %v2053_v58, %v2054_v4 }
 0x29d   : > { %3621 = vst [vmem:[%s4396_s8 + $0xb8] sm:$0xff] %v1835_v50  ;;  %v1664_v32 = vpop.f32.mrf.mxu2  ;;  %2360 = vmatmul.f32.gmra.mxu3 %v2046_v60 }
 0x29e   : > { %v1665_v29 = vadd.f32 %v1664_v32, %v1567_v3  ;;  %v1464_v20 = vpop.f32.mrf.mxu0  ;;  %v1578_v26 = vpop.f32.mrf.mxu1 }
 0x29f   : > { %v1465_v31 = vadd.f32 %v1464_v20, %v4609_v43  ;;  %v4922_v62 = vpop.trf.xlu1  ;;  %v4928_v20 = vand.u32 4294901760, %v1944_v5 }
 0x2a0   : > { %v1747_v25 = vadd.f32 %v1746_v44, %v1665_v29  ;;  %v1750_v61 = vpop.f32.mrf.mxu3  ;;  %v2061_v44 = vsub.f32 %v1941_v46, %v4912_v40 }
 0x2a1   : > { %2049 = vmatmul.f32.gmra.mxu0 %v2048_v49  ;;  %2163 = vmatmul.f32.gmra.mxu1 %v4896_v27  ;;  %v1573_v50 = vadd.f32 %v1572_v39, %v1465_v31  ;;  %v2056_v49 = vand.u32 4294901760, %v2055_v52  ;;  %v1805_v39 = vsel %vm232_vm1, %v4780_v12, 0.0  ;;  %v1947_v52 = vsel %vm330_vm0, %v4890_v55, 0 }
 0x2a2   : > { %v1820_v60 = vsel %vm4467_vm11, %v1747_v25, 0.0  ;;  %2252 = vmatmul.f32.gmra.mxu2 %v2045_v54  ;;  %v2062_v54 = vand.u32 4294901760, %v2061_v44 }
 0x2a3   : > { %v1836_v53 = vadd.f32 %v1820_v60, %v1804_v11 }
 0x2a4   : > { %v2063_v60 = vsub.f32 %v2061_v44, %v2062_v54 }
 0x2a5   : > { %3622 = vst [vmem:[%s4396_s8 + $0xc0] sm:$0xff] %v1836_v53  ;;  %v1668_v43 = vpop.f32.mrf.mxu2  ;;  %2366 = vmatmul.f32.gmra.mxu3 %v2054_v4 }
 0x2a6   : > { %v1669_v3 = vadd.f32 %v1668_v43, %v1573_v50  ;;  %v1469_v32 = vpop.f32.mrf.mxu0  ;;  %v1584_v29 = vpop.f32.mrf.mxu1 }
 0x2a7   : > { %v1470_v46 = vadd.f32 %v1469_v32, %v4634_v38  ;;  %v4938_v11 = vpop.trf.xlu1  ;;  %v4944_v32 = vand.u32 4294901760, %v1947_v52 }
 0x2a8   : > { %v1751_v25 = vadd.f32 %v1750_v61, %v1669_v3  ;;  %v1754_v18 = vpop.f32.mrf.mxu3  ;;  %v2069_v61 = vsub.f32 %v1944_v5, %v4928_v20 }
 0x2a9   : > { %2057 = vmatmul.f32.gmra.mxu0 %v2056_v49  ;;  %2167 = vmatmul.f32.gmra.mxu1 %v4912_v40  ;;  %v1579_v53 = vadd.f32 %v1578_v26, %v1470_v46  ;;  %v2064_v49 = vand.u32 4294901760, %v2063_v60  ;;  %v1806_v26 = vsel %vm233_vm2, %v4780_v12, 0.0  ;;  %v1950_v60 = vsel %vm330_vm0, %v4906_v0, 0 }
 0x2aa   : > { %v1821_v4 = vsel %vm4467_vm11, %v1751_v25, 0.0  ;;  %2257 = vmatmul.f32.gmra.mxu2 %v2053_v58  ;;  %v2070_v58 = vand.u32 4294901760, %v2069_v61 }
 0x2ab   : > { %v1837_v31 = vadd.f32 %v1821_v4, %v1805_v39 }
 0x2ac   : > { %v2071_v4 = vsub.f32 %v2069_v61, %v2070_v58 }
 0x2ad   : > { %3623 = vst [vmem:[%s4396_s8 + $0xc8] sm:$0xff] %v1837_v31  ;;  %v1672_v38 = vpop.f32.mrf.mxu2  ;;  %2372 = vmatmul.f32.gmra.mxu3 %v2062_v54 }
 0x2ae   : > { %v1673_v50 = vadd.f32 %v1672_v38, %v1579_v53  ;;  %v1474_v43 = vpop.f32.mrf.mxu0  ;;  %v1590_v3 = vpop.f32.mrf.mxu1 }
 0x2af   : > { %v1475_v5 = vadd.f32 %v1474_v43, %v4661_v36  ;;  %v4954_v39 = vpop.trf.xlu1  ;;  %v4960_v43 = vand.u32 4294901760, %v1950_v60 }
 0x2b0   : > { %v1755_v25 = vadd.f32 %v1754_v18, %v1673_v50  ;;  %v1758_v55 = vpop.f32.mrf.mxu3  ;;  %v2077_v18 = vsub.f32 %v1947_v52, %v4944_v32 }
 0x2b1   : > { %2065 = vmatmul.f32.gmra.mxu0 %v2064_v49  ;;  %2171 = vmatmul.f32.gmra.mxu1 %v4928_v20  ;;  %v1585_v31 = vadd.f32 %v1584_v29, %v1475_v5  ;;  %v2072_v49 = vand.u32 4294901760, %v2071_v4  ;;  %v1807_v29 = vsel %vm5837_vm4, %v4780_v12, 0.0  ;;  %v1953_v4 = vsel %vm330_vm0, %v4922_v62, 0 }
 0x2b2   : > { %v1822_v54 = vsel %vm4467_vm11, %v1755_v25, 0.0  ;;  %2262 = vmatmul.f32.gmra.mxu2 %v2061_v44  ;;  %v2078_v44 = vand.u32 4294901760, %v2077_v18  ;;  %vm5838_vm4 = vcmp.eq.s32.totalorder %v4652_v41, %v4354_v56 }
 0x2b3   : > { %v1838_v46 = vadd.f32 %v1822_v54, %v1806_v26 }
 0x2b4   : > { %v2079_v54 = vsub.f32 %v2077_v18, %v2078_v44 }
 0x2b5   : > { %3624 = vst [vmem:[%s4396_s8 + $0xd0] sm:$0xff] %v1838_v46  ;;  %v1676_v36 = vpop.f32.mrf.mxu2  ;;  %2378 = vmatmul.f32.gmra.mxu3 %v2070_v58 }
 0x2b6   : > { %v1677_v53 = vadd.f32 %v1676_v36, %v1585_v31  ;;  %v1479_v38 = vpop.f32.mrf.mxu0  ;;  %v1596_v50 = vpop.f32.mrf.mxu1 }
 0x2b7   : > { %v1480_v52 = vadd.f32 %v1479_v38, %v4686_v23  ;;  %v4970_v26 = vpop.trf.xlu1  ;;  %v4976_v38 = vand.u32 4294901760, %v1953_v4 }
 0x2b8   : > { %v1759_v25 = vadd.f32 %v1758_v55, %v1677_v53  ;;  %v1762_v0 = vpop.f32.mrf.mxu3  ;;  %v2085_v55 = vsub.f32 %v1950_v60, %v4960_v43 }
 0x2b9   : > { %2073 = vmatmul.f32.gmra.mxu0 %v2072_v49  ;;  %2175 = vmatmul.f32.gmra.mxu1 %v4944_v32  ;;  %v1591_v46 = vadd.f32 %v1590_v3, %v1480_v52  ;;  %v2080_v49 = vand.u32 4294901760, %v2079_v54  ;;  %v1808_v3 = vsel %vm5838_vm4, %v4780_v12, 0.0  ;;  %v2697_v54 = vsel %vm330_vm0, %v4938_v11, 0 }
 0x2ba   : > { %v1823_v58 = vsel %vm4467_vm11, %v1759_v25, 0.0  ;;  %2267 = vmatmul.f32.gmra.mxu2 %v2069_v61  ;;  %v2086_v61 = vand.u32 4294901760, %v2085_v55  ;;  %vm5839_vm4 = vcmp.eq.s32.totalorder %v4675_v13, %v4354_v56 }
 0x2bb   : > { %v1839_v5 = vadd.f32 %v1823_v58, %v1807_v29 }
 0x2bc   : > { %v2087_v58 = vsub.f32 %v2085_v55, %v2086_v61 }
 0x2bd   : > { %3625 = vst [vmem:[%s4396_s8 + $0xd8] sm:$0xff] %v1839_v5  ;;  %v1680_v23 = vpop.f32.mrf.mxu2  ;;  %2384 = vmatmul.f32.gmra.mxu3 %v2078_v44 }
 0x2be   : > { %v1681_v31 = vadd.f32 %v1680_v23, %v1591_v46  ;;  %v1484_v36 = vpop.f32.mrf.mxu0  ;;  %v1602_v53 = vpop.f32.mrf.mxu1 }
 0x2bf   : > { %v1485_v60 = vadd.f32 %v1484_v36, %v4710_v21  ;;  %v4986_v29 = vpop.trf.xlu1  ;;  %v4992_v36 = vand.u32 4294901760, %v2697_v54 }
 0x2c0   : > { %v1763_v25 = vadd.f32 %v1762_v0, %v1681_v31  ;;  %v1766_v62 = vpop.f32.mrf.mxu3  ;;  %v2093_v0 = vsub.f32 %v1953_v4, %v4976_v38 }
 0x2c1   : > { %2081 = vmatmul.f32.gmra.mxu0 %v2080_v49  ;;  %2179 = vmatmul.f32.gmra.mxu1 %v4960_v43  ;;  %v1597_v5 = vadd.f32 %v1596_v50, %v1485_v60  ;;  %v1809_v50 = vsel %vm5839_vm4, %v4780_v12, 0.0  ;;  %v5003_v60 = vsub.f32 %v2697_v54, %v4992_v36  ;;  %vm5840_vm4 = vcmp.eq.s32.totalorder %v4700_v57, %v4354_v56 }
 0x2c2   : > { %v1824_v44 = vsel %vm4467_vm11, %v1763_v25, 0.0  ;;  %2272 = vmatmul.f32.gmra.mxu2 %v2077_v18  ;;  %v2088_v18 = vand.u32 4294901760, %v2087_v58  ;;  %v2094_v49 = vand.u32 4294901760, %v2093_v0  ;;  %v1810_v54 = vsel %vm5840_vm4, %v4780_v12, 0.0 }
 0x2c3   : > { %v1840_v52 = vadd.f32 %v1824_v44, %v1808_v3 }
 0x2c5   : > { %3626 = vst [vmem:[%s4396_s8 + $0xe0] sm:$0xff] %v1840_v52  ;;  %v1684_v21 = vpop.f32.mrf.mxu2  ;;  %2390 = vmatmul.f32.gmra.mxu3 %v2086_v61 }
 0x2c6   : > { %v1685_v46 = vadd.f32 %v1684_v21, %v1597_v5  ;;  %v1489_v23 = vpop.f32.mrf.mxu0  ;;  %v1608_v31 = vpop.f32.mrf.mxu1 }
 0x2c7   : > { %v1490_v4 = vadd.f32 %v1489_v23, %v4741_v14  ;;  %v5005_v44 = vpop.trf.xlu1  ;;  %v2700_v14 = vsel %vm330_vm0, %v4954_v39, 0 }
 0x2c8   : > { %v1767_v25 = vadd.f32 %v1766_v62, %v1685_v46  ;;  %v1770_v11 = vpop.f32.mrf.mxu3  ;;  %v2095_v62 = vsub.f32 %v2093_v0, %v2094_v49 }
 0x2c9   : > { %2089 = vmatmul.f32.gmra.mxu0 %v2088_v18  ;;  %2183 = vmatmul.f32.gmra.mxu1 %v4976_v38  ;;  %v1603_v52 = vadd.f32 %v1602_v53, %v1490_v4 }
 0x2ca   : > { %v1825_v61 = vsel %vm4467_vm11, %v1767_v25, 0.0  ;;  %2277 = vmatmul.f32.gmra.mxu2 %v2085_v55  ;;  %v5738_v55 = vand.u32 4294901760, %v5003_v60  ;;  %v2096_v23 = vand.u32 4294901760, %v2095_v62 }
 0x2cb   : > { %v1841_v3 = vadd.f32 %v1825_v61, %v1809_v50 }
 0x2cc   : > { %v2764_v50 = vsub.f32 %v5003_v60, %v5738_v55 }
 0x2cd   : > { %3627 = vst [vmem:[%s4396_s8 + $0xe8] sm:$0xff] %v1841_v3  ;;  %v1688_v58 = vpop.f32.mrf.mxu2  ;;  %2396 = vmatmul.f32.gmra.mxu3 %v2094_v49  ;;  %v5016_v49 = vand.u32 4294901760, %v2700_v14  ;;  %v2703_v3 = vsel %vm330_vm0, %v4970_v26, 0 }
 0x2ce   : > { %v1689_v5 = vadd.f32 %v1688_v58, %v1603_v52  ;;  %v1494_v21 = vpop.f32.mrf.mxu0  ;;  %v2124_v46 = vpop.f32.mrf.mxu1 }
 0x2cf   : > { %v1495_v53 = vadd.f32 %v1494_v21, %v4767_v63  ;;  %v2685_v62 = vpop.trf.xlu1 }
 0x2d0   : > { %v1771_v18 = vadd.f32 %v1770_v11, %v1689_v5  ;;  %v1774_v25 = vpop.f32.mrf.mxu3  ;;  %v5025_v11 = vsub.f32 %v2700_v14, %v5016_v49  ;;  %v2765_v5 = vand.u32 4294901760, %v2764_v50 }
 0x2d1   : > { %2097 = vmatmul.f32.gmra.mxu0 %v2096_v23  ;;  %2502 = vmatmul.f32.vlgmr.msra.gmra.mxu1 %v4715_v17  ;;  %v1609_v61 = vadd.f32 %v1608_v31, %v1495_v53  ;;  %v1811_v31 = vsel %vm238_vm3, %v4780_v12, 0.0 }
 0x2d2   : > { %v1826_v39 = vsel %vm4467_vm11, %v1771_v18, 0.0  ;;  %2282 = vmatmul.f32.gmra.mxu2 %v2093_v0  ;;  %v5736_v21 = vand.u32 4294901760, %v5025_v11  ;;  %v5036_v18 = vand.u32 4294901760, %v2703_v3 }
 0x2d3   : > { %v1842_v4 = vadd.f32 %v1826_v39, %v1810_v54 }
 0x2d4   : > { %v2772_v12 = vsub.f32 %v5025_v11, %v5736_v21 }
 0x2d5   : > { %3628 = vst [vmem:[%s4396_s8 + $0xf0] sm:$0xff] %v1842_v4  ;;  %v1692_v63 = vpop.f32.mrf.mxu2  ;;  %2912 = vmatmul.f32.vlgmr.msra.gmra.mxu3 %v4992_v36 }
 0x2d6   : > { %v1693_v52 = vadd.f32 %v1692_v63, %v1609_v61  ;;  %v1978_v58 = vpop.f32.mrf.mxu0  ;;  %v2128_v0 = vpop.f32.mrf.mxu1 }
 0x2d7   : > { %v2125_v53 = vadd.f32 %v2124_v46, %v1978_v58  ;;  %v2686_v63 = vpop.trf.xlu1  ;;  %v2773_v58 = vand.u32 4294901760, %v2772_v12 }
 0x2d8   : > { %v1775_v23 = vadd.f32 %v1774_v25, %v1693_v52  ;;  %v2307_v14 = vpop.f32.mrf.mxu3  ;;  %v5043_v25 = vsub.f32 %v2703_v3, %v5036_v18 }
 0x2d9   : > { %2420 = vmatmul.f32.vlgmr.msra.gmra.mxu0 %v4715_v17  ;;  %2506 = vmatmul.f32.gmra.mxu1 %v4746_v33  ;;  %v2706_v17 = vsel %vm330_vm0, %v4986_v29, 0 }
 0x2da   : > { %v1827_v26 = vsel %vm4467_vm11, %v1775_v23, 0.0  ;;  %2766 = vmatmul.f32.vlgmr.msra.gmra.mxu2 %v2765_v5  ;;  %v5735_v46 = vand.u32 4294901760, %v5043_v25  ;;  %v5053_v3 = vand.u32 4294901760, %v2706_v17 }
 0x2db   : > { %v1843_v54 = vadd.f32 %v1827_v26, %v1811_v31 }
 0x2dc   : > { %v5060_v29 = vsub.f32 %v2706_v17, %v5053_v3  ;;  %v2780_v31 = vsub.f32 %v5043_v25, %v5735_v46 }
 0x2dd   : > { %3629 = vst [vmem:[%s4396_s8 + $0xf8] sm:$0xff] %v1843_v54  ;;  %v2208_v39 = vpop.f32.mrf.mxu2  ;;  %2916 = vmatmul.f32.gmra.mxu3 %v5016_v49 }
 0x2de   : > { %v2209_v50 = vadd.f32 %v2208_v39, %v2125_v53  ;;  %v1986_v4 = vpop.f32.mrf.mxu0  ;;  %v2132_v61 = vpop.f32.mrf.mxu1  ;;  %v5737_v12 = vand.u32 4294901760, %v5060_v29  ;;  %v2781_v17 = vand.u32 4294901760, %v2780_v31 }
 0x2df   : > { %v2129_v23 = vadd.f32 %v2128_v0, %v1986_v4  ;;  %v2687_v4 = vpop.trf.xlu1 }
 0x2e0   : > { %v2313_v52 = vpop.f32.mrf.mxu3  ;;  %v5055_v5 = vadd.f32 %v2307_v14, %v2209_v50  ;;  %v2709_v14 = vsel %vm330_vm0, %v5005_v44, 0 }
 0x2e1   : > { %2424 = vmatmul.f32.gmra.mxu0 %v4746_v33  ;;  %2510 = vmatmul.f32.gmra.mxu1 %v4770_v6  ;;  %v5069_v0 = vand.u32 4294901760, %v2709_v14 }
 0x2e2   : > { %2774 = vmatmul.f32.gmra.mxu2 %v2773_v58 }
 0x2e3   : > { %v5076_v44 = vsub.f32 %v2709_v14, %v5069_v0 }
 0x2e5   : > { %v2213_v26 = vpop.f32.mrf.mxu2  ;;  %2920 = vmatmul.f32.gmra.mxu3 %v5036_v18  ;;  %v5741_v46 = vand.u32 4294901760, %v5076_v44 }
 0x2e6   : > { %v2214_v54 = vadd.f32 %v2213_v26, %v2129_v23  ;;  %v1994_v53 = vpop.f32.mrf.mxu0  ;;  %v2136_v33 = vpop.f32.mrf.mxu1  ;;  %v2788_v23 = vsub.f32 %v5060_v29, %v5737_v12 }
 0x2e7   : > { %v2133_v58 = vadd.f32 %v2132_v61, %v1994_v53  ;;  %v2688_v53 = vpop.trf.xlu1 }
 0x2e8   : > { %v2319_v39 = vpop.f32.mrf.mxu3  ;;  %v5071_v50 = vadd.f32 %v2313_v52, %v2214_v54  ;;  %v2712_v52 = vsel %vm330_vm0, %v2685_v62, 0  ;;  %v2789_v61 = vand.u32 4294901760, %v2788_v23 }
 0x2e9   : > { %2428 = vmatmul.f32.gmra.mxu0 %v4770_v6  ;;  %2514 = vmatmul.f32.gmra.mxu1 %v4784_v1 }
 0x2ea   : > { %2782 = vmatmul.f32.gmra.mxu2 %v2781_v17  ;;  %v5084_v17 = vand.u32 4294901760, %v2712_v52 }
 0x2ec   : > { %v5091_v62 = vsub.f32 %v2712_v52, %v5084_v17 }
 0x2ed   : > { %v2218_v26 = vpop.f32.mrf.mxu2  ;;  %2924 = vmatmul.f32.gmra.mxu3 %v5053_v3 }
 0x2ee   : > { %v2219_v31 = vadd.f32 %v2218_v26, %v2133_v58  ;;  %v2002_v54 = vpop.f32.mrf.mxu0  ;;  %v2140_v6 = vpop.f32.mrf.mxu1  ;;  %v2796_v58 = vsub.f32 %v5076_v44, %v5741_v46  ;;  %v5744_v55 = vand.u32 4294901760, %v5091_v62 }
 0x2ef   : > { %v2137_v12 = vadd.f32 %v2136_v33, %v2002_v54 }
 0x2f0   : > { %v2325_v21 = vpop.f32.mrf.mxu3  ;;  %v5086_v14 = vadd.f32 %v2319_v39, %v2219_v31  ;;  %v2715_v39 = vsel %vm330_vm0, %v2686_v63, 0  ;;  %v2797_v33 = vand.u32 4294901760, %v2796_v58  ;;  %v2804_v63 = vsub.f32 %v5091_v62, %v5744_v55 }
 0x2f1   : > { %2432 = vmatmul.f32.gmra.mxu0 %v4784_v1  ;;  %2518 = vmatmul.f32.gmra.mxu1 %v4800_v10  ;;  %v5099_v7 = vand.u32 4294901760, %v2715_v39  ;;  %v2718_v58 = vsel %vm330_vm0, %v2687_v4, 0 }
 0x2f2   : > { %2790 = vmatmul.f32.gmra.mxu2 %v2789_v61 }
 0x2f3   : > { %v5106_v46 = vsub.f32 %v2715_v39, %v5099_v7  ;;  %v2805_v39 = vand.u32 4294901760, %v2804_v63  ;;  %v2721_v63 = vsel %vm330_vm0, %v2688_v53, 0 }
 0x2f5   : > { %v2223_v26 = vpop.f32.mrf.mxu2  ;;  %2928 = vmatmul.f32.gmra.mxu3 %v5069_v0  ;;  %v5749_v57 = vand.u32 4294901760, %v5106_v46 }
 0x2f6   : > { %v2224_v23 = vadd.f32 %v2223_v26, %v2137_v12  ;;  %v2010_v31 = vpop.f32.mrf.mxu0  ;;  %v2144_v1 = vpop.f32.mrf.mxu1 }
 0x2f7   : > { %v2141_v54 = vadd.f32 %v2140_v6, %v2010_v31  ;;  %v5114_v6 = vand.u32 4294901760, %v2718_v58 }
 0x2f8   : > { %v2331_v61 = vpop.f32.mrf.mxu3  ;;  %v5101_v52 = vadd.f32 %v2325_v21, %v2224_v23  ;;  %v2689_v21 = vpop.trf.xlu1 }
 0x2f9   : > { %2436 = vmatmul.f32.gmra.mxu0 %v4800_v10  ;;  %2522 = vmatmul.f32.gmra.mxu1 %v4816_v16  ;;  %v5121_v4 = vsub.f32 %v2718_v58, %v5114_v6 }
 0x2fa   : > { %2798 = vmatmul.f32.gmra.mxu2 %v2797_v33 }
 0x2fb   : > { %v5754_v41 = vand.u32 4294901760, %v5121_v4 }
 0x2fd   : > { %v2228_v12 = vpop.f32.mrf.mxu2  ;;  %2932 = vmatmul.f32.gmra.mxu3 %v5084_v17 }
 0x2fe   : > { %v2229_v26 = vadd.f32 %v2228_v12, %v2141_v54  ;;  %v2018_v23 = vpop.f32.mrf.mxu0  ;;  %v2148_v10 = vpop.f32.mrf.mxu1  ;;  %v2812_v54 = vsub.f32 %v5106_v46, %v5749_v57 }
 0x2ff   : > { %v2145_v55 = vadd.f32 %v2144_v1, %v2018_v23  ;;  %v5129_v1 = vand.u32 4294901760, %v2721_v63 }
 0x300   : > { %v2337_v33 = vpop.f32.mrf.mxu3  ;;  %v5116_v31 = vadd.f32 %v2331_v61, %v2229_v26  ;;  %v2813_v58 = vand.u32 4294901760, %v2812_v54  ;;  %v2724_v54 = vsel %vm330_vm0, %v2689_v21, 0 }
 0x301   : > { %2440 = vmatmul.f32.gmra.mxu0 %v4816_v16  ;;  %2526 = vmatmul.f32.gmra.mxu1 %v4832_v8  ;;  %v2690_v16 = vpop.trf.xlu1  ;;  %5841 = vst [vmem:[#allocation17_spill] sm:$0xff] %v5129_v1  ;;  %v5136_v53 = vsub.f32 %v2721_v63, %v5129_v1 }
 0x302   : > { %2806 = vmatmul.f32.gmra.mxu2 %v2805_v39 }
 0x303   : > { %5842 = vst [vmem:[#allocation16_spill] sm:$0xff] %v5136_v53 }
 0x305   : > { %v2233_v12 = vpop.f32.mrf.mxu2  ;;  %2936 = vmatmul.f32.gmra.mxu3 %v5099_v7 }
 0x306   : > { %v2234_v61 = vadd.f32 %v2233_v12, %v2145_v55  ;;  %v2026_v26 = vpop.f32.mrf.mxu0  ;;  %v2152_v13 = vpop.f32.mrf.mxu1  ;;  %v2820_v55 = vsub.f32 %v5121_v4, %v5754_v41 }
 0x307   : > { %v2149_v57 = vadd.f32 %v2148_v10, %v2026_v26 }
 0x308   : > { %v2343_v39 = vpop.f32.mrf.mxu3  ;;  %v5131_v23 = vadd.f32 %v2337_v33, %v2234_v61  ;;  %v2821_v10 = vand.u32 4294901760, %v2820_v55 }
 0x309   : > { %2444 = vmatmul.f32.gmra.mxu0 %v4832_v8  ;;  %2530 = vmatmul.f32.gmra.mxu1 %v4848_v47  ;;  %v5757_v8 = vand.u32 4294901760, %v5136_v53  ;;  %v2691_v26 = vpop.trf.xlu1 }
 0x30a   : > { %2814 = vmatmul.f32.gmra.mxu2 %v2813_v58  ;;  %v5144_v58 = vand.u32 4294901760, %v2724_v54 }
 0x30c   : > { %5843 = vst [vmem:[#allocation24_spill] sm:$0xff] %v5144_v58  ;;  %v5151_v21 = vsub.f32 %v2724_v54, %v5144_v58 }
 0x30d   : > { %v2238_v12 = vpop.f32.mrf.mxu2  ;;  %2940 = vmatmul.f32.gmra.mxu3 %v5114_v6 }
 0x30e   : > { %v2239_v33 = vadd.f32 %v2238_v12, %v2149_v57  ;;  %v2034_v61 = vpop.f32.mrf.mxu0  ;;  %v2156_v2 = vpop.f32.mrf.mxu1  ;;  %5844 = vst [vmem:[#allocation25_spill] sm:$0xff] %v5151_v21  ;;  %v2828_v57 = vsub.f32 %v5136_v53, %v5757_v8  ;;  %v5760_v28 = vand.u32 4294901760, %v5151_v21 }
 0x30f   : > { %v2153_v41 = vadd.f32 %v2152_v13, %v2034_v61 }
 0x310   : > { %v2349_v48 = vpop.f32.mrf.mxu3  ;;  %v5146_v63 = vadd.f32 %v2343_v39, %v2239_v33  ;;  %v2727_v39 = vsel %vm330_vm0, %v2690_v16, 0  ;;  %v2829_v54 = vand.u32 4294901760, %v2828_v57 }
 0x311   : > { %2448 = vmatmul.f32.gmra.mxu0 %v4848_v47  ;;  %2534 = vmatmul.f32.gmra.mxu1 %v4864_v37  ;;  %v5159_v13 = vand.u32 4294901760, %v2727_v39  ;;  %v2692_v8 = vpop.trf.xlu1 }
 0x312   : > { %2822 = vmatmul.f32.gmra.mxu2 %v2821_v10 }
 0x313   : > { %5845 = vst [vmem:[#allocation26_spill] sm:$0xff] %v5159_v13  ;;  %v5166_v16 = vsub.f32 %v2727_v39, %v5159_v13 }
 0x315   : > { %v2243_v12 = vpop.f32.mrf.mxu2  ;;  %2944 = vmatmul.f32.gmra.mxu3 %v5129_v1  ;;  %v5771_v39 = vand.u32 4294901760, %v5166_v16 }
 0x316   : > { %v2244_v55 = vadd.f32 %v2243_v12, %v2153_v41  ;;  %v2042_v47 = vpop.f32.mrf.mxu0  ;;  %v2160_v33 = vpop.f32.mrf.mxu1  ;;  %v2836_v41 = vsub.f32 %v5151_v21, %v5760_v28 }
 0x317   : > { %v2157_v22 = vadd.f32 %v2156_v2, %v2042_v47  ;;  %v5177_v2 = vld [vmem:[%s1873_s26] sm:$0x1] }
 0x318   : > { %v2355_v10 = vpop.f32.mrf.mxu3  ;;  %v5161_v61 = vadd.f32 %v2349_v48, %v2244_v55  ;;  %v2837_v28 = vand.u32 4294901760, %v2836_v41 }
 0x319   : > { %2452 = vmatmul.f32.gmra.mxu0 %v4864_v37  ;;  %2538 = vmatmul.f32.gmra.mxu1 %v4880_v19  ;;  %v2730_v37 = vsel %vm330_vm0, %v2691_v26, 0  ;;  %v2567_v26 = vand.u32 2147483647, %v5177_v2  ;;  %v2693_v41 = vpop.trf.xlu1 }
 0x31a   : > { %2830 = vmatmul.f32.gmra.mxu2 %v2829_v54  ;;  %v5180_v54 = vand.u32 4294901760, %v2730_v37 }
 0x31c   : > { %5846 = vst [vmem:[#allocation27_spill] sm:$0xff] %v5180_v54 }
 0x31d   : > { %v2248_v48 = vpop.f32.mrf.mxu2  ;;  %2948 = vmatmul.f32.gmra.mxu3 %v5144_v58  ;;  %v2844_v58 = vsub.f32 %v5166_v16, %v5771_v39 }
 0x31e   : > { %v2249_v57 = vadd.f32 %v2248_v48, %v2157_v22  ;;  %v2050_v12 = vpop.f32.mrf.mxu0  ;;  %v2164_v55 = vpop.f32.mrf.mxu1  ;;  %v5188_v48 = vsub.f32 %v2730_v37, %v5180_v54 }
 0x31f   : > { %v2161_v22 = vadd.f32 %v2160_v33, %v2050_v12  ;;  %v2845_v37 = vand.u32 4294901760, %v2844_v58  ;;  %v2736_v58 = vsel %vm330_vm0, %v2693_v41, 0 }
 0x320   : > { %v2361_v47 = vpop.f32.mrf.mxu3  ;;  %v5182_v21 = vadd.f32 %v2355_v10, %v2249_v57  ;;  %5848 = vst [vmem:[#allocation29_spill] sm:$0xff] %v5188_v48  ;;  %v2733_v10 = vsel %vm330_vm0, %v2692_v8, 0  ;;  %v5774_v1 = vand.u32 4294901760, %v5188_v48 }
 0x321   : > { %2456 = vmatmul.f32.gmra.mxu0 %v4880_v19  ;;  %2542 = vmatmul.f32.gmra.mxu1 %v4896_v27  ;;  %v5196_v12 = vand.u32 4294901760, %v2733_v10 }
 0x322   : > { %5847 = vst [vmem:[#allocation28_spill] sm:$0xff] %v5182_v21  ;;  %2838 = vmatmul.f32.gmra.mxu2 %v2837_v28  ;;  %v2568_v28 = vsub.f32 0.0, %v2567_v26  ;;  %v2852_v26 = vsub.f32 %v5188_v48, %v5774_v1 }
 0x323   : > { %5849 = vst [vmem:[#allocation30_spill] sm:$0xff] %v5196_v12 }
 0x324   : > { %v2569_v39 = vmul.f32 1.442695, %v2568_v28 }
 0x325   : > { %v2253_v42 = vpop.f32.mrf.mxu2  ;;  %2952 = vmatmul.f32.gmra.mxu3 %v5159_v13 }
 0x326   : > { %v2254_v19 = vadd.f32 %v2253_v42, %v2161_v22  ;;  %v2058_v57 = vpop.f32.mrf.mxu0  ;;  %v2168_v21 = vpop.f32.mrf.mxu1  ;;  %v5203_v42 = vsub.f32 %v2733_v10, %v5196_v12  ;;  %3739 = vpow2.f32 %v2569_v39  ;;  %v2853_v10 = vand.u32 4294901760, %v2852_v26 }
 0x327   : > { %v2165_v8 = vadd.f32 %v2164_v55, %v2058_v57  ;;  %v5211_v55 = vand.u32 4294901760, %v2736_v58  ;;  %v2694_v57 = vpop.trf.xlu1 }
 0x328   : > { %v2367_v33 = vpop.f32.mrf.mxu3  ;;  %v5198_v53 = vadd.f32 %v2361_v47, %v2254_v19  ;;  %5850 = vst [vmem:[#allocation31_spill] sm:$0xff] %v5203_v42 }
 0x329   : > { %2460 = vmatmul.f32.gmra.mxu0 %v4896_v27  ;;  %2546 = vmatmul.f32.gmra.mxu1 %v4912_v40  ;;  %5851 = vst [vmem:[#allocation32_spill] sm:$0xff] %v5211_v55  ;;  %v5218_v41 = vsub.f32 %v2736_v58, %v5211_v55 }
 0x32a   : > { %2846 = vmatmul.f32.gmra.mxu2 %v2845_v37  ;;  %v5779_v37 = vand.u32 4294901760, %v5203_v42 }
 0x32b   : > { %5852 = vst [vmem:[#allocation33_spill] sm:$0xff] %v5218_v41 }
 0x32c   : > { %v2860_v39 = vsub.f32 %v5203_v42, %v5779_v37 }
 0x32d   : > { %v2258_v22 = vpop.f32.mrf.mxu2  ;;  %2956 = vmatmul.f32.gmra.mxu3 %v5180_v54  ;;  %v5784_v54 = vand.u32 4294901760, %v5218_v41 }
 0x32e   : > { %v2259_v47 = vadd.f32 %v2258_v22, %v2165_v8  ;;  %v2066_v19 = vpop.f32.mrf.mxu0  ;;  %v2172_v27 = vpop.f32.mrf.mxu1  ;;  %v2861_v58 = vand.u32 4294901760, %v2860_v39 }
 0x32f   : > { %v2169_v1 = vadd.f32 %v2168_v21, %v2066_v19  ;;  %v3740_v8 = vpop.eup %3739  ;;  %v2695_v37 = vpop.trf.xlu1 }
 0x330   : > { %v2373_v28 = vpop.f32.mrf.mxu3  ;;  %v5213_v13 = vadd.f32 %v2367_v33, %v2259_v47  ;;  %v2739_v33 = vsel %vm330_vm0, %v2694_v57, 0  ;;  %v2571_v48 = vadd.f32 1.0, %v3740_v8  ;;  %v2868_v57 = vsub.f32 %v5218_v41, %v5784_v54 }
 0x331   : > { %2464 = vmatmul.f32.gmra.mxu0 %v4912_v40  ;;  %2550 = vmatmul.f32.gmra.mxu1 %v4928_v20  ;;  %v5226_v21 = vand.u32 4294901760, %v2739_v33  ;;  %v2574_v39 = vmul.f32 -0.5, %v3740_v8 }
 0x332   : > { %2854 = vmatmul.f32.gmra.mxu2 %v2853_v10  ;;  %3741 = vlog2.f32 %v2571_v48 }
 0x333   : > { %v2575_v48 = vadd.f32 1.0, %v2574_v39 }
 0x335   : > { %v2263_v22 = vpop.f32.mrf.mxu2  ;;  %2960 = vmatmul.f32.gmra.mxu3 %v5196_v12 }
 0x336   : > { %v2264_v26 = vadd.f32 %v2263_v22, %v2169_v1  ;;  %v2074_v47 = vpop.f32.mrf.mxu0  ;;  %v2176_v40 = vpop.f32.mrf.mxu1  ;;  %v5233_v1 = vsub.f32 %v2739_v33, %v5226_v21  ;;  %v2869_v33 = vand.u32 4294901760, %v2868_v57  ;;  %v2576_v57 = vmul.f32 %v3740_v8, %v2575_v48 }
 0x337   : > { %v2173_v12 = vadd.f32 %v2172_v27, %v2074_v47 }
 0x338   : > { %v2379_v10 = vpop.f32.mrf.mxu3  ;;  %v5228_v19 = vadd.f32 %v2373_v28, %v2264_v26  ;;  %v2742_v28 = vsel %vm330_vm0, %v2695_v37, 0  ;;  %v3742_v54 = vpop.eup %3741  ;;  %v2577_v37 = vand.u32 2147483647, %v3740_v8 }
 0x339   : > { %2468 = vmatmul.f32.gmra.mxu0 %v4928_v20  ;;  %2554 = vmatmul.f32.gmra.mxu1 %v4944_v32  ;;  %v5241_v47 = vand.u32 4294901760, %v2742_v28 }
 0x33a   : > { %5853 = vst [vmem:[#allocation34_spill] sm:$0xff] %v5228_v19  ;;  %2862 = vmatmul.f32.gmra.mxu2 %v2861_v58  ;;  %v5789_v58 = vand.u32 4294901760, %v5233_v1  ;;  %vm2578_vm0 = vcmp.lt.f32.partialorder %v2577_v37, 0.0004427343 }
 0x33d   : > { %v2268_v22 = vpop.f32.mrf.mxu2  ;;  %2964 = vmatmul.f32.gmra.mxu3 %v5211_v55 }
 0x33e   : > { %v2269_v20 = vadd.f32 %v2268_v22, %v2173_v12  ;;  %v2082_v26 = vpop.f32.mrf.mxu0  ;;  %v2180_v42 = vpop.f32.mrf.mxu1  ;;  %v5248_v12 = vsub.f32 %v2742_v28, %v5241_v47  ;;  %v2876_v22 = vsub.f32 %v5233_v1, %v5789_v58  ;;  %v2566_v28 = vmax.f32 %v5177_v2, 0.0 }
 0x33f   : > { %v2177_v55 = vadd.f32 %v2176_v40, %v2082_v26 }
 0x340   : > { %v2385_v27 = vpop.f32.mrf.mxu3  ;;  %v5243_v19 = vadd.f32 %v2379_v10, %v2269_v20  ;;  %v2573_v10 = vmul.f32 0.6931472, %v3742_v54  ;;  %v2883_v39 = vand.u32 4294901760, %v5248_v12  ;;  %v2877_v40 = vand.u32 4294901760, %v2876_v22 }
 0x341   : > { %2472 = vmatmul.f32.gmra.mxu0 %v4944_v32  ;;  %2558 = vmatmul.f32.gmra.mxu1 %v4960_v43 }
 0x342   : > { %5854 = vst [vmem:[#allocation35_spill] sm:$0xff] %v5243_v19  ;;  %2870 = vmatmul.f32.gmra.mxu2 %v2869_v33  ;;  %v2579_v58 = vsel %vm2578_vm0, %v2576_v57, %v2573_v10 }
 0x345   : > { %v2273_v41 = vpop.f32.mrf.mxu2  ;;  %2968 = vmatmul.f32.gmra.mxu3 %v5226_v21 }
 0x346   : > { %v2274_v32 = vadd.f32 %v2273_v41, %v2177_v55  ;;  %v2090_v20 = vpop.f32.mrf.mxu0  ;;  %v2184_v19 = vpop.f32.mrf.mxu1  ;;  %v2884_v55 = vsub.f32 %v5248_v12, %v2883_v39  ;;  %v2580_v41 = vadd.f32 %v2579_v58, %v2566_v28 }
 0x347   : > { %v2181_v54 = vadd.f32 %v2180_v42, %v2090_v20  ;;  %v5855_v42 = vand.u32 4294901760, %v5003_v60 }
 0x348   : > { %v2391_v33 = vpop.f32.mrf.mxu3  ;;  %v5255_v26 = vadd.f32 %v2385_v27, %v2274_v32  ;;  %v2885_v2 = vand.u32 4294901760, %v2884_v55 }
 0x349   : > { %2476 = vmatmul.f32.gmra.mxu0 %v4960_v43  ;;  %2562 = vmatmul.f32.gmra.mxu1 %v4976_v38  ;;  %v2581_v43 = vadd.f32 1.1920929e-07, %v2580_v41  ;;  %v5856_v41 = vand.u32 4294901760, %v5025_v11 }
 0x34a   : > { %2878 = vmatmul.f32.gmra.mxu2 %v2877_v40 }
 0x34b   : > { %v5269_v57 = vperm.slane %v2581_v43, 0 }
 0x34d   : > { %v2278_v8 = vpop.f32.mrf.mxu2  ;;  %2972 = vmatmul.f32.gmra.mxu3 %v5241_v47 }
 0x34e   : > { %v2279_v48 = vadd.f32 %v2278_v8, %v2181_v54  ;;  %v2098_v27 = vpop.f32.mrf.mxu0  ;;  %v2503_v37 = vpop.f32.mrf.mxu1 }
 0x34f   : > { %v2185_v10 = vadd.f32 %v2184_v19, %v2098_v27  ;;  %v2585_v19 = vsel %vm223_vm5, %v5269_v57, 0.0 }
 0x350   : > { %v2397_v22 = vpop.f32.mrf.mxu3  ;;  %v5264_v32 = vadd.f32 %v2391_v33, %v2279_v48 }
 0x351   : > { %2480 = vmatmul.f32.gmra.mxu0 %v4976_v38  ;;  %3095 = vmatmul.f32.vlgmr.msrb.gmra.mxu1 %v5855_v42  ;;  %v5857_v42 = vand.u32 4294901760, %v5043_v25 }
 0x352   : > { %2886 = vmatmul.f32.gmra.mxu2 %v2885_v2 }
 0x355   : > { %v2283_v58 = vpop.f32.mrf.mxu2  ;;  %3291 = vmatmul.f32.vlgmr.msrb.gmra.mxu3 %v4992_v36 }
 0x356   : > { %v2284_v20 = vadd.f32 %v2283_v58, %v2185_v10  ;;  %v2421_v40 = vpop.f32.mrf.mxu0  ;;  %v2507_v28 = vpop.f32.mrf.mxu1 }
 0x357   : > { %v2422_v33 = vadd.f32 %v2421_v40, %v5055_v5 }
 0x358   : > { %v2913_v54 = vpop.f32.mrf.mxu3  ;;  %v5273_v55 = vadd.f32 %v2397_v22, %v2284_v20 }
 0x359   : > { %v2504_v38 = vadd.f32 %v2503_v37, %v2422_v33  ;;  %2996 = vmatmul.f32.vlgmr.msrb.gmra.mxu0 %v5003_v60  ;;  %3101 = vmatmul.f32.gmra.mxu1 %v5856_v41 }
 0x35a   : > { %3209 = vmatmul.f32.vlgmr.msrb.gmra.mxu2 %v4992_v36  ;;  %v2586_v36 = vsel %vm224_vm7, %v5269_v57, 0.0 }
 0x35b   : > { %v2601_v8 = vsel %vm4376_vm6, %v2504_v38, 0.0  ;;  %v5858_v38 = vand.u32 4294901760, %v5060_v29 }
 0x35c   : > { %v2617_v5 = vadd.f32 %v2601_v8, %v2585_v19 }
 0x35d   : > { %v2767_v48 = vpop.f32.mrf.mxu2  ;;  %3295 = vmatmul.f32.gmra.mxu3 %v5016_v49 }
 0x35e   : > { %3633 = vst [vmem:[%s4396_s8 + $0x100] sm:$0xff] %v2617_v5  ;;  %v5287_v27 = vadd.f32 %v2913_v54, %v2767_v48  ;;  %v2425_v37 = vpop.f32.mrf.mxu0  ;;  %v2511_v22 = vpop.f32.mrf.mxu1 }
 0x35f   : > { %v2426_v60 = vadd.f32 %v2425_v37, %v5071_v50 }
 0x360   : > { %v2917_v2 = vpop.f32.mrf.mxu3 }
 0x361   : > { %v2508_v43 = vadd.f32 %v2507_v28, %v2426_v60  ;;  %3001 = vmatmul.f32.gmra.mxu0 %v5025_v11  ;;  %3107 = vmatmul.f32.gmra.mxu1 %v5857_v42  ;;  %v5859_v60 = vand.u32 4294901760, %v5076_v44 }
 0x362   : > { %3213 = vmatmul.f32.gmra.mxu2 %v5016_v49  ;;  %v2587_v49 = vsel %vm225_vm8, %v5269_v57, 0.0 }
 0x363   : > { %v2602_v10 = vsel %vm4376_vm6, %v2508_v43, 0.0 }
 0x364   : > { %v2618_v58 = vadd.f32 %v2602_v10, %v2586_v36 }
 0x365   : > { %v2775_v20 = vpop.f32.mrf.mxu2  ;;  %3299 = vmatmul.f32.gmra.mxu3 %v5036_v18 }
 0x366   : > { %3634 = vst [vmem:[%s4396_s8 + $0x108] sm:$0xff] %v2618_v58  ;;  %v5302_v50 = vadd.f32 %v2917_v2, %v2775_v20  ;;  %v2429_v40 = vpop.f32.mrf.mxu0  ;;  %v2515_v28 = vpop.f32.mrf.mxu1 }
 0x367   : > { %v2430_v11 = vadd.f32 %v2429_v40, %v5086_v14  ;;  %v5860_v40 = vand.u32 4294901760, %v5091_v62 }
 0x368   : > { %v2921_v33 = vpop.f32.mrf.mxu3 }
 0x369   : > { %v2512_v54 = vadd.f32 %v2511_v22, %v2430_v11  ;;  %3006 = vmatmul.f32.gmra.mxu0 %v5043_v25  ;;  %3113 = vmatmul.f32.gmra.mxu1 %v5858_v38 }
 0x36a   : > { %3217 = vmatmul.f32.gmra.mxu2 %v5036_v18  ;;  %v2588_v18 = vsel %vm226_vm9, %v5269_v57, 0.0 }
 0x36b   : > { %v2603_v19 = vsel %vm4376_vm6, %v2512_v54, 0.0 }
 0x36c   : > { %v2619_v41 = vadd.f32 %v2603_v19, %v2587_v49 }
 0x36d   : > { %v2783_v8 = vpop.f32.mrf.mxu2  ;;  %3303 = vmatmul.f32.gmra.mxu3 %v5053_v3 }
 0x36e   : > { %3635 = vst [vmem:[%s4396_s8 + $0x110] sm:$0xff] %v2619_v41  ;;  %v5317_v14 = vadd.f32 %v2921_v33, %v2783_v8  ;;  %v2433_v5 = vpop.f32.mrf.mxu0  ;;  %v2519_v48 = vpop.f32.mrf.mxu1  ;;  %v5861_v41 = vand.u32 4294901760, %v5106_v46 }
 0x36f   : > { %v2434_v25 = vadd.f32 %v2433_v5, %v5101_v52 }
 0x370   : > { %v2925_v37 = vpop.f32.mrf.mxu3 }
 0x371   : > { %v2516_v22 = vadd.f32 %v2515_v28, %v2434_v25  ;;  %3011 = vmatmul.f32.gmra.mxu0 %v5060_v29  ;;  %3119 = vmatmul.f32.gmra.mxu1 %v5859_v60  ;;  %v5862_v60 = vand.u32 4294901760, %v5121_v4 }
 0x372   : > { %3221 = vmatmul.f32.gmra.mxu2 %v5053_v3  ;;  %v2589_v3 = vsel %vm227_vm10, %v5269_v57, 0.0 }
 0x373   : > { %v2604_v2 = vsel %vm4376_vm6, %v2516_v22, 0.0 }
 0x374   : > { %v2620_v43 = vadd.f32 %v2604_v2, %v2588_v18 }
 0x375   : > { %v2791_v36 = vpop.f32.mrf.mxu2  ;;  %3307 = vmatmul.f32.gmra.mxu3 %v5069_v0 }
 0x376   : > { %3636 = vst [vmem:[%s4396_s8 + $0x118] sm:$0xff] %v2620_v43  ;;  %v5332_v52 = vadd.f32 %v2925_v37, %v2791_v36  ;;  %v2437_v42 = vpop.f32.mrf.mxu0  ;;  %v2523_v10 = vpop.f32.mrf.mxu1 }
 0x377   : > { %v2438_v29 = vadd.f32 %v2437_v42, %v5116_v31 }
 0x378   : > { %v2929_v58 = vpop.f32.mrf.mxu3 }
 0x379   : > { %v2520_v20 = vadd.f32 %v2519_v48, %v2438_v29  ;;  %3016 = vmatmul.f32.gmra.mxu0 %v5076_v44  ;;  %3125 = vmatmul.f32.gmra.mxu1 %v5860_v40 }
 0x37a   : > { %3225 = vmatmul.f32.gmra.mxu2 %v5069_v0  ;;  %v2590_v0 = vsel %vm228_vm12, %v5269_v57, 0.0 }
 0x37b   : > { %v2605_v28 = vsel %vm4376_vm6, %v2520_v20, 0.0  ;;  %v5863_v20 = vld [vmem:[#allocation16_spill] sm:$0xff] }
 0x37c   : > { %v2621_v11 = vadd.f32 %v2605_v28, %v2589_v3  ;;  %v5864_v3 = vand.u32 4294901760, %v5863_v20 }
 0x37d   : > { %v2799_v33 = vpop.f32.mrf.mxu2  ;;  %3311 = vmatmul.f32.gmra.mxu3 %v5084_v17 }
 0x37e   : > { %3637 = vst [vmem:[%s4396_s8 + $0x120] sm:$0xff] %v2621_v11  ;;  %v5347_v31 = vadd.f32 %v2929_v58, %v2799_v33  ;;  %v2441_v54 = vpop.f32.mrf.mxu0  ;;  %v2527_v49 = vpop.f32.mrf.mxu1 }
 0x37f   : > { %v2442_v44 = vadd.f32 %v2441_v54, %v5131_v23 }
 0x380   : > { %v2933_v38 = vpop.f32.mrf.mxu3 }
 0x381   : > { %v2524_v19 = vadd.f32 %v2523_v10, %v2442_v44  ;;  %3021 = vmatmul.f32.gmra.mxu0 %v5091_v62  ;;  %3131 = vmatmul.f32.gmra.mxu1 %v5861_v41  ;;  %v5866_v44 = vld [vmem:[#allocation28_spill] sm:$0xff]  ;;  %v5868_v41 = vld [vmem:[#allocation25_spill] sm:$0xff] }
 0x382   : > { %3229 = vmatmul.f32.gmra.mxu2 %v5084_v17  ;;  %v2591_v17 = vsel %vm229_vm13, %v5269_v57, 0.0 }
 0x383   : > { %v2606_v8 = vsel %vm4376_vm6, %v2524_v19, 0.0 }
 0x384   : > { %v2622_v5 = vadd.f32 %v2606_v8, %v2590_v0  ;;  %v5869_v8 = vand.u32 4294901760, %v5868_v41 }
 0x385   : > { %v2807_v48 = vpop.f32.mrf.mxu2  ;;  %3315 = vmatmul.f32.gmra.mxu3 %v5099_v7 }
 0x386   : > { %3638 = vst [vmem:[%s4396_s8 + $0x128] sm:$0xff] %v2622_v5  ;;  %v5362_v23 = vadd.f32 %v2933_v38, %v2807_v48  ;;  %v2445_v25 = vpop.f32.mrf.mxu0  ;;  %v2531_v37 = vpop.f32.mrf.mxu1 }
 0x387   : > { %v2446_v62 = vadd.f32 %v2445_v25, %v5146_v63 }
 0x388   : > { %v2937_v22 = vpop.f32.mrf.mxu3 }
 0x389   : > { %v2528_v18 = vadd.f32 %v2527_v49, %v2446_v62  ;;  %3026 = vmatmul.f32.gmra.mxu0 %v5106_v46  ;;  %3137 = vmatmul.f32.gmra.mxu1 %v5862_v60  ;;  %v5871_v62 = vld [vmem:[#allocation24_spill] sm:$0xff] }
 0x38a   : > { %3233 = vmatmul.f32.gmra.mxu2 %v5099_v7  ;;  %v2592_v7 = vsel %vm230_vm14, %v5269_v57, 0.0 }
 0x38b   : > { %v2607_v2 = vsel %vm4376_vm6, %v2528_v18, 0.0 }
 0x38c   : > { %v2623_v43 = vadd.f32 %v2607_v2, %v2591_v17 }
 0x38d   : > { %v2815_v36 = vpop.f32.mrf.mxu2  ;;  %3319 = vmatmul.f32.gmra.mxu3 %v5114_v6 }
 0x38e   : > { %3639 = vst [vmem:[%s4396_s8 + $0x130] sm:$0xff] %v2623_v43  ;;  %v5377_v63 = vadd.f32 %v2937_v22, %v2815_v36  ;;  %v2449_v42 = vpop.f32.mrf.mxu0  ;;  %v2535_v10 = vpop.f32.mrf.mxu1 }
 0x38f   : > { %v2450_v46 = vadd.f32 %v2449_v42, %v5161_v61  ;;  %v5865_v61 = vld [vmem:[#allocation17_spill] sm:$0xff]  ;;  %v2594_v42 = vsel %vm232_vm1, %v5269_v57, 0.0 }
 0x390   : > { %v2941_v29 = vpop.f32.mrf.mxu3 }
 0x391   : > { %v2532_v58 = vadd.f32 %v2531_v37, %v2450_v46  ;;  %3031 = vmatmul.f32.gmra.mxu0 %v5121_v4  ;;  %3143 = vmatmul.f32.gmra.mxu1 %v5864_v3 }
 0x392   : > { %3237 = vmatmul.f32.gmra.mxu2 %v5114_v6  ;;  %v2593_v6 = vsel %vm231_vm15, %v5269_v57, 0.0 }
 0x393   : > { %v2608_v40 = vsel %vm4376_vm6, %v2532_v58, 0.0  ;;  %v5874_v58 = vld [vmem:[#allocation26_spill] sm:$0xff] }
 0x394   : > { %v2624_v28 = vadd.f32 %v2608_v40, %v2592_v7 }
 0x395   : > { %v2823_v11 = vpop.f32.mrf.mxu2  ;;  %3323 = vmatmul.f32.gmra.mxu3 %v5865_v61 }
 0x396   : > { %3640 = vst [vmem:[%s4396_s8 + $0x138] sm:$0xff] %v2624_v28  ;;  %v5392_v33 = vadd.f32 %v2941_v29, %v2823_v11  ;;  %v2453_v54 = vpop.f32.mrf.mxu0  ;;  %v2539_v49 = vpop.f32.mrf.mxu1  ;;  %v5429_v28 = vld [vmem:[%s2662_s28] sm:$0x1] }
 0x397   : > { %v2454_v4 = vadd.f32 %v2453_v54, %v5866_v44  ;;  %v5876_v44 = vld [vmem:[#allocation29_spill] sm:$0xff] }
 0x398   : > { %v2945_v38 = vpop.f32.mrf.mxu3 }
 0x399   : > { %v2536_v19 = vadd.f32 %v2535_v10, %v2454_v4  ;;  %3036 = vmatmul.f32.gmra.mxu0 %v5863_v20  ;;  %3149 = vmatmul.f32.gmra.mxu1 %v5869_v8  ;;  %v5873_v10 = vand.u32 4294901760, %v5166_v16  ;;  %v5877_v4 = vand.u32 4294901760, %v5876_v44 }
 0x39a   : > { %3241 = vmatmul.f32.gmra.mxu2 %v5865_v61 }
 0x39b   : > { %v2609_v48 = vsel %vm4467_vm11, %v2536_v19, 0.0 }
 0x39c   : > { %v2625_v25 = vadd.f32 %v2609_v48, %v2593_v6 }
 0x39d   : > { %v2831_v37 = vpop.f32.mrf.mxu2  ;;  %3327 = vmatmul.f32.gmra.mxu3 %v5871_v62 }
 0x39e   : > { %3641 = vst [vmem:[%s4396_s8 + $0x140] sm:$0xff] %v2625_v25  ;;  %v5407_v22 = vadd.f32 %v2945_v38, %v2831_v37  ;;  %v2457_v18 = vpop.f32.mrf.mxu0  ;;  %v2543_v17 = vpop.f32.mrf.mxu1  ;;  %v3356_v38 = vand.u32 2147483647, %v5429_v28  ;;  %v5879_v37 = vld [vmem:[#allocation34_spill] sm:$0xff] }
 0x39f   : > { %v2458_v60 = vadd.f32 %v2457_v18, %v5198_v53 }
 0x3a0   : > { %v2949_v2 = vpop.f32.mrf.mxu3  ;;  %v3357_v25 = vsub.f32 0.0, %v3356_v38 }
 0x3a1   : > { %v2540_v43 = vadd.f32 %v2539_v49, %v2458_v60  ;;  %3041 = vmatmul.f32.gmra.mxu0 %v5868_v41  ;;  %3155 = vmatmul.f32.gmra.mxu1 %v5873_v10  ;;  %v2595_v49 = vsel %vm233_vm2, %v5269_v57, 0.0  ;;  %v5878_v41 = vld [vmem:[#allocation27_spill] sm:$0xff]  ;;  %v5880_v60 = vld [vmem:[#allocation22_spill] sm:$0xff] }
 0x3a2   : > { %3245 = vmatmul.f32.gmra.mxu2 %v5871_v62  ;;  %vm5881_vm4 = vcmp.eq.s32.totalorder %v5880_v60, %v4354_v56  ;;  %v3358_v10 = vmul.f32 1.442695, %v3357_v25 }
 0x3a3   : > { %v2610_v46 = vsel %vm4467_vm11, %v2540_v43, 0.0  ;;  %v5882_v43 = vld [vmem:[#allocation31_spill] sm:$0xff] }
 0x3a4   : > { %v2626_v29 = vadd.f32 %v2610_v46, %v2594_v42  ;;  %v5883_v42 = vand.u32 4294901760, %v5882_v43  ;;  %3743 = vpow2.f32 %v3358_v10  ;;  %v5891_v10 = vld [vmem:[#allocation15_spill] sm:$0xff] }
 0x3a5   : > { %v2839_v53 = vpop.f32.mrf.mxu2  ;;  %3331 = vmatmul.f32.gmra.mxu3 %v5874_v58 }
 0x3a6   : > { %3642 = vst [vmem:[%s4396_s8 + $0x148] sm:$0xff] %v2626_v29  ;;  %v5426_v7 = vadd.f32 %v2949_v2, %v2839_v53  ;;  %v2461_v20 = vpop.f32.mrf.mxu0  ;;  %v2547_v3 = vpop.f32.mrf.mxu1  ;;  %v2596_v2 = vsel %vm5881_vm4, %v5269_v57, 0.0  ;;  %vm5892_vm4 = vcmp.eq.s32.totalorder %v5891_v10, %v4354_v56 }
 0x3a7   : > { %v2462_v40 = vadd.f32 %v2461_v20, %v5213_v13 }
 0x3a8   : > { %v2953_v11 = vpop.f32.mrf.mxu3 }
 0x3a9   : > { %v2544_v61 = vadd.f32 %v2543_v17, %v2462_v40  ;;  %3046 = vmatmul.f32.gmra.mxu0 %v5166_v16  ;;  %3161 = vmatmul.f32.gmra.mxu1 %v5877_v4  ;;  %v5886_v4 = vld [vmem:[#allocation23_spill] sm:$0xff] }
 0x3aa   : > { %3249 = vmatmul.f32.gmra.mxu2 %v5874_v58  ;;  %v5884_v58 = vld [vmem:[#allocation30_spill] sm:$0xff]  ;;  %vm5887_vm0 = vcmp.eq.s32.totalorder %v5886_v4, %v4354_v56 }
 0x3ab   : > { %v2611_v13 = vsel %vm4467_vm11, %v2544_v61, 0.0  ;;  %v2597_v38 = vsel %vm5887_vm0, %v5269_v57, 0.0 }
 0x3ac   : > { %v2627_v19 = vadd.f32 %v2611_v13, %v2595_v49  ;;  %v5888_v13 = vld [vmem:[#allocation33_spill] sm:$0xff] }
 0x3ad   : > { %v2847_v6 = vpop.f32.mrf.mxu2  ;;  %3335 = vmatmul.f32.gmra.mxu3 %v5878_v41 }
 0x3ae   : > { %3643 = vst [vmem:[%s4396_s8 + $0x150] sm:$0xff] %v2627_v19  ;;  %v5444_v8 = vadd.f32 %v2953_v11, %v2847_v6  ;;  %v2465_v48 = vpop.f32.mrf.mxu0  ;;  %v2551_v16 = vpop.f32.mrf.mxu1  ;;  %v5885_v11 = vld [vmem:[#allocation35_spill] sm:$0xff]  ;;  %v5889_v19 = vand.u32 4294901760, %v5888_v13 }
 0x3af   : > { %v2466_v62 = vadd.f32 %v2465_v48, %v5879_v37  ;;  %v3744_v48 = vpop.eup %3743  ;;  %v5890_v37 = vld [vmem:[#allocation32_spill] sm:$0xff] }
 0x3b0   : > { %v2957_v18 = vpop.f32.mrf.mxu3 }
 0x3b1   : > { %v2548_v17 = vadd.f32 %v2547_v3, %v2466_v62  ;;  %3051 = vmatmul.f32.gmra.mxu0 %v5876_v44  ;;  %3167 = vmatmul.f32.gmra.mxu1 %v5883_v42 }
 0x3b2   : > { %3253 = vmatmul.f32.gmra.mxu2 %v5878_v41 }
 0x3b3   : > { %v2612_v46 = vsel %vm4467_vm11, %v2548_v17, 0.0 }
 0x3b4   : > { %v2628_v29 = vadd.f32 %v2612_v46, %v2596_v2  ;;  %v3360_v2 = vadd.f32 1.0, %v3744_v48  ;;  %v2598_v46 = vsel %vm5892_vm4, %v5269_v57, 0.0 }
 0x3b5   : > { %v2855_v53 = vpop.f32.mrf.mxu2  ;;  %3339 = vmatmul.f32.gmra.mxu3 %v5884_v58 }
 0x3b6   : > { %3644 = vst [vmem:[%s4396_s8 + $0x158] sm:$0xff] %v2628_v29  ;;  %v5459_v20 = vadd.f32 %v2957_v18, %v2855_v53  ;;  %v2469_v3 = vpop.f32.mrf.mxu0  ;;  %v2555_v40 = vpop.f32.mrf.mxu1  ;;  %v5893_v29 = vand.u32 4294901760, %v5233_v1  ;;  %3745 = vlog2.f32 %v3360_v2 }
 0x3b7   : > { %v2470_v61 = vadd.f32 %v2469_v3, %v5885_v11 }
 0x3b8   : > { %v2961_v49 = vpop.f32.mrf.mxu3 }
 0x3b9   : > { %v2552_v44 = vadd.f32 %v2551_v16, %v2470_v61  ;;  %3056 = vmatmul.f32.gmra.mxu0 %v5882_v43  ;;  %3173 = vmatmul.f32.gmra.mxu1 %v5889_v19  ;;  %v5894_v19 = vld [vmem:[#allocation14_spill] sm:$0xff] }
 0x3ba   : > { %3257 = vmatmul.f32.gmra.mxu2 %v5884_v58  ;;  %v3363_v58 = vmul.f32 -0.5, %v3744_v48  ;;  %vm5895_vm0 = vcmp.eq.s32.totalorder %v5894_v19, %v4354_v56 }
 0x3bb   : > { %v2613_v6 = vsel %vm4467_vm11, %v2552_v44, 0.0 }
 0x3bc   : > { %v2629_v41 = vadd.f32 %v2613_v6, %v2597_v38  ;;  %v3364_v38 = vadd.f32 1.0, %v3363_v58  ;;  %v2599_v6 = vsel %vm5895_vm0, %v5269_v57, 0.0 }
 0x3bd   : > { %v2863_v25 = vpop.f32.mrf.mxu2  ;;  %3343 = vmatmul.f32.gmra.mxu3 %v5890_v37 }
 0x3be   : > { %3645 = vst [vmem:[%s4396_s8 + $0x160] sm:$0xff] %v2629_v41  ;;  %v5474_v16 = vadd.f32 %v2961_v49, %v2863_v25  ;;  %v2473_v62 = vpop.f32.mrf.mxu0  ;;  %v2559_v18 = vpop.f32.mrf.mxu1  ;;  %v3366_v25 = vand.u32 2147483647, %v3744_v48 }
 0x3bf   : > { %v2474_v17 = vadd.f32 %v2473_v62, %v5255_v26  ;;  %v3746_v41 = vpop.eup %3745 }
 0x3c0   : > { %v2965_v43 = vpop.f32.mrf.mxu3  ;;  %v3362_v62 = vmul.f32 0.6931472, %v3746_v41  ;;  %vm3367_vm4 = vcmp.lt.f32.partialorder %v3366_v25, 0.0004427343 }
 0x3c1   : > { %v2556_v42 = vadd.f32 %v2555_v40, %v2474_v17  ;;  %3061 = vmatmul.f32.gmra.mxu0 %v5888_v13  ;;  %3179 = vmatmul.f32.gmra.mxu1 %v5893_v29 }
 0x3c2   : > { %3261 = vmatmul.f32.gmra.mxu2 %v5890_v37 }
 0x3c3   : > { %v2614_v53 = vsel %vm4467_vm11, %v2556_v42, 0.0 }
 0x3c4   : > { %v2630_v26 = vadd.f32 %v2614_v53, %v2598_v46  ;;  %v2600_v53 = vsel %vm238_vm3, %v5269_v57, 0.0 }
 0x3c5   : > { %v2871_v3 = vpop.f32.mrf.mxu2  ;;  %3347 = vmatmul.f32.gmra.mxu3 %v5226_v21 }
 0x3c6   : > { %3646 = vst [vmem:[%s4396_s8 + $0x168] sm:$0xff] %v2630_v26  ;;  %v5489_v40 = vadd.f32 %v2965_v43, %v2871_v3  ;;  %v2477_v11 = vpop.f32.mrf.mxu0  ;;  %v2563_v61 = vpop.f32.mrf.mxu1 }
 0x3c7   : > { %v2478_v49 = vadd.f32 %v2477_v11, %v5264_v32 }
 0x3c8   : > { %v2969_v44 = vpop.f32.mrf.mxu3 }
 0x3c9   : > { %v2560_v13 = vadd.f32 %v2559_v18, %v2478_v49  ;;  %3066 = vmatmul.f32.gmra.mxu0 %v5233_v1  ;;  %3185 = vmatmul.f32.gmra.mxu1 %v2883_v39  ;;  %v3365_v18 = vmul.f32 %v3744_v48, %v3364_v38 }
 0x3ca   : > { %3265 = vmatmul.f32.gmra.mxu2 %v5226_v21  ;;  %v3355_v21 = vmax.f32 %v5429_v28, 0.0 }
 0x3cb   : > { %v2615_v32 = vsel %vm4467_vm11, %v2560_v13, 0.0  ;;  %v3368_v46 = vsel %vm3367_vm4, %v3365_v18, %v3362_v62 }
 0x3cc   : > { %v2631_v37 = vadd.f32 %v2615_v32, %v2599_v6 }
 0x3cd   : > { %v2879_v17 = vpop.f32.mrf.mxu2  ;;  %3351 = vmatmul.f32.gmra.mxu3 %v5241_v47 }
 0x3ce   : > { %3647 = vst [vmem:[%s4396_s8 + $0x170] sm:$0xff] %v2631_v37  ;;  %v5504_v1 = vadd.f32 %v2969_v44, %v2879_v17  ;;  %v2481_v2 = vpop.f32.mrf.mxu0  ;;  %v3096_v39 = vpop.f32.mrf.mxu1 }
 0x3cf   : > { %v2482_v43 = vadd.f32 %v2481_v2, %v5273_v55  ;;  %v3369_v55 = vadd.f32 %v3368_v46, %v3355_v21 }
 0x3d0   : > { %v2973_v42 = vpop.f32.mrf.mxu3 }
 0x3d1   : > { %v2564_v29 = vadd.f32 %v2563_v61, %v2482_v43  ;;  %3071 = vmatmul.f32.gmra.mxu0 %v5248_v12  ;;  %v3370_v49 = vadd.f32 1.1920929e-07, %v3369_v55 }
 0x3d2   : > { %3269 = vmatmul.f32.gmra.mxu2 %v5241_v47 }
 0x3d3   : > { %v2616_v26 = vsel %vm4467_vm11, %v2564_v29, 0.0  ;;  %v5524_v47 = vperm.slane %v3370_v49, 0 }
 0x3d4   : > { %v2632_v58 = vadd.f32 %v2616_v26, %v2600_v53 }
 0x3d5   : > { %v2887_v28 = vpop.f32.mrf.mxu2  ;;  %v3374_v25 = vsel %vm223_vm5, %v5524_v47, 0.0 }
 0x3d6   : > { %3648 = vst [vmem:[%s4396_s8 + $0x178] sm:$0xff] %v2632_v58  ;;  %v5517_v3 = vadd.f32 %v2973_v42, %v2887_v28  ;;  %v2997_v11 = vpop.f32.mrf.mxu0  ;;  %v3102_v61 = vpop.f32.mrf.mxu1 }
 0x3d7   : > { %v2998_v44 = vadd.f32 %v2997_v11, %v5287_v27 }
 0x3d8   : > { %v3292_v57 = vpop.f32.mrf.mxu3 }
 0x3d9   : > { %v3097_v12 = vadd.f32 %v3096_v39, %v2998_v44 }
 0x3dd   : > { %v3210_v38 = vpop.f32.mrf.mxu2 }
 0x3de   : > { %v3211_v13 = vadd.f32 %v3210_v38, %v3097_v12  ;;  %v3002_v6 = vpop.f32.mrf.mxu0  ;;  %v3108_v41 = vpop.f32.mrf.mxu1 }
 0x3df   : > { %v3003_v32 = vadd.f32 %v3002_v6, %v5302_v50 }
 0x3e0   : > { %v3293_v27 = vadd.f32 %v3292_v57, %v3211_v13  ;;  %v3296_v37 = vpop.f32.mrf.mxu3 }
 0x3e1   : > { %3798 = shalt.err (!%p3795_p2)
}
 0x3e2   : > { %s3872_s11 = smov 16   ;;  %s3873_s27 = smov 1   ;;  %v3390_v59 = vsel %vm4376_vm6, %v3293_v27, 0.0  ;;  %v3103_v62 = vadd.f32 %v3102_v61, %v3003_v32  ;;  %v3375_v21 = vsel %vm224_vm7, %v5524_v47, 0.0  ;;  %v3376_v30 = vsel %vm225_vm8, %v5524_v47, 0.0  ;;  %vm5900_vm8 = vmmov %vm5895_vm0 }
 0x3e3   : > { %3679 = dma.vmem_to_hbm [thread:$0]  (%p3955_p5), %s3461_s22, 64, %s3463_s24, %s3444_s12, %s3872_s11, %s3872_s11, %s3873_s27   ;;  %v3406_v50 = vadd.f32 %v3390_v59, %v3374_v25  ;;  %v3377_v51 = vsel %vm226_vm9, %v5524_v47, 0.0  ;;  %v3378_v35 = vsel %vm227_vm10, %v5524_v47, 0.0  ;;  %v3379_v34 = vsel %vm228_vm12, %v5524_v47, 0.0 }
 0x3e4   : > { %v3380_v9 = vsel %vm229_vm13, %v5524_v47, 0.0  ;;  %v3381_v24 = vsel %vm230_vm14, %v5524_v47, 0.0  ;;  %v3382_v45 = vsel %vm231_vm15, %v5524_v47, 0.0  ;;  %v3383_v0 = vsel %vm232_vm1, %v5524_v47, 0.0  ;;  %s3678_s28 = sshll.u32 %s3938_s7, 9  ;;  %s3478_s22 = sshll.u32 %s4396_s8, 4  ;;  %s3479_s22 = int_to_ptr.vmem [resolvable:$true] %s3478_s22 }
 0x3e5   : > { %3652 = vst [vmem:[%s4396_s8 + $0x180] sm:$0xff] %v3406_v50  ;;  %v3214_v18 = vpop.f32.mrf.mxu2  ;;  %v3384_v36 = vsel %vm233_vm2, %v5524_v47, 0.0  ;;  %vm5897_vm5 = vcmp.eq.s32.totalorder %v5880_v60, %v4354_v56  ;;  %vm5899_vm7 = vcmp.eq.s32.totalorder %v5891_v10, %v4354_v56  ;;  %v3388_v10 = vsel %vm5900_vm8, %v5524_v47, 0.0  ;;  %s3477_s20 = scalar_lea.hbm %s5706_s6, %s3678_s28  ;;  %s3449_s7 = scalar_lea.sflag [#allocation8], %s3972_s19 }
 0x3e6   : > { %v3215_v17 = vadd.f32 %v3214_v18, %v3103_v62  ;;  %v3007_v2 = vpop.f32.mrf.mxu0  ;;  %v3114_v39 = vpop.f32.mrf.mxu1  ;;  %v3385_v54 = vsel %vm5897_vm5, %v5524_v47, 0.0  ;;  %s3480_s24 = sshll.u32 %s3477_s20, 4  ;;  %s3819_s18 = scalar_lea.hbm %s5706_s6, 1024  ;;  %s3481_s24 = int_to_ptr.hbm [resolvable:$true] %s3480_s24 }
 0x3e7   : > { %v3008_v42 = vadd.f32 %v3007_v2, %v5317_v14  ;;  %s3813_s12 = sshra.s32 %s3481_s24, 4  ;;  %s3814_s12 = int_to_ptr.hbm [resolvable:$true] %s3813_s12 }
 0x3e8   : > { %v3297_v43 = vadd.f32 %v3296_v37, %v3215_v17  ;;  %v3300_v46 = vpop.f32.mrf.mxu3  ;;  %s3815_s15 = scalar_lea.hbm %s3814_s12, 512  ;;  %p3820_p8 = scmp.lt.s32.totalorder %s3814_s12, %s5706_s6 }
 0x3e9   : > { %v3109_v26 = vadd.f32 %v3108_v41, %v3008_v42  ;;  %p3816_p3 = scmp.ne.s32.totalorder %s3814_s12, %s3815_s15  ;;  %p3821_p9 = scmp.lt.s32.totalorder %s3819_s18, %s3815_s15 }
 0x3ea   : > { %v3391_v29 = vsel %vm4376_vm6, %v3297_v43, 0.0 }
 0x3eb   : > { %v3407_v53 = vadd.f32 %v3391_v29, %v3375_v21  ;;  %p3817_p4 = pnand %p3816_p3, %p3955_p5  ;;  %p3822_p10 = por %p3821_p9, %p3820_p8 }
 0x3ed   : > { %3653 = vst [vmem:[%s4396_s8 + $0x188] sm:$0xff] %v3407_v53  ;;  %v3218_v55 = vpop.f32.mrf.mxu2  ;;  %p3818_p7 = pneg %p3817_p4 }
 0x3ee   : > { %v3219_v58 = vadd.f32 %v3218_v55, %v3109_v26  ;;  %v3012_v28 = vpop.f32.mrf.mxu0  ;;  %v3120_v11 = vpop.f32.mrf.mxu1 }
 0x3ef   : > { %v3013_v14 = vadd.f32 %v3012_v28, %v5332_v52  ;;  %p3823_p11 = pnand %p3822_p10, %p3818_p7 }
 0x3f0   : > { %v3301_v61 = vadd.f32 %v3300_v46, %v3219_v58  ;;  %v3304_v49 = vpop.f32.mrf.mxu3 }
 0x3f1   : > { %v3115_v12 = vadd.f32 %v3114_v39, %v3013_v14 }
 0x3f2   : > { %v3392_v44 = vsel %vm4376_vm6, %v3301_v61, 0.0 }
 0x3f3   : > { %v3408_v57 = vadd.f32 %v3392_v44, %v3376_v30 }
 0x3f5   : > { %3654 = vst [vmem:[%s4396_s8 + $0x190] sm:$0xff] %v3408_v57  ;;  %v3222_v38 = vpop.f32.mrf.mxu2 }
 0x3f6   : > { %v3223_v13 = vadd.f32 %v3222_v38, %v3115_v12  ;;  %v3017_v6 = vpop.f32.mrf.mxu0  ;;  %v3126_v41 = vpop.f32.mrf.mxu1 }
 0x3f7   : > { %v3018_v52 = vadd.f32 %v3017_v6, %v5347_v31 }
 0x3f8   : > { %v3305_v27 = vadd.f32 %v3304_v49, %v3223_v13  ;;  %v3308_v25 = vpop.f32.mrf.mxu3 }
 0x3f9   : > { %v3121_v59 = vadd.f32 %v3120_v11, %v3018_v52 }
 0x3fa   : > { %v3393_v32 = vsel %vm4376_vm6, %v3305_v27, 0.0 }
 0x3fb   : > { %v3409_v37 = vadd.f32 %v3393_v32, %v3377_v51 }
 0x3fd   : > { %3655 = vst [vmem:[%s4396_s8 + $0x198] sm:$0xff] %v3409_v37  ;;  %v3226_v50 = vpop.f32.mrf.mxu2 }
 0x3fe   : > { %v3227_v62 = vadd.f32 %v3226_v50, %v3121_v59  ;;  %v3022_v18 = vpop.f32.mrf.mxu0  ;;  %v3132_v17 = vpop.f32.mrf.mxu1 }
 0x3ff   : > { %v3023_v31 = vadd.f32 %v3022_v18, %v5362_v23 }
 0x400   : > { %v3309_v2 = vadd.f32 %v3308_v25, %v3227_v62  ;;  %v3312_v39 = vpop.f32.mrf.mxu3 }
 0x401   : > { %v3127_v42 = vadd.f32 %v3126_v41, %v3023_v31 }
 0x402   : > { %v3394_v43 = vsel %vm4376_vm6, %v3309_v2, 0.0 }
 0x403   : > { %v3410_v21 = vadd.f32 %v3394_v43, %v3378_v35 }
 0x405   : > { %3656 = vst [vmem:[%s4396_s8 + $0x1a0] sm:$0xff] %v3410_v21  ;;  %v3230_v46 = vpop.f32.mrf.mxu2 }
 0x406   : > { %v3231_v29 = vadd.f32 %v3230_v46, %v3127_v42  ;;  %v3027_v53 = vpop.f32.mrf.mxu0  ;;  %v3138_v26 = vpop.f32.mrf.mxu1 }
 0x407   : > { %v3028_v23 = vadd.f32 %v3027_v53, %v5377_v63 }
 0x408   : > { %v3313_v55 = vadd.f32 %v3312_v39, %v3231_v29  ;;  %v3316_v58 = vpop.f32.mrf.mxu3 }
 0x409   : > { %v3133_v61 = vadd.f32 %v3132_v17, %v3028_v23 }
 0x40a   : > { %v3395_v28 = vsel %vm4376_vm6, %v3313_v55, 0.0 }
 0x40b   : > { %v3411_v11 = vadd.f32 %v3395_v28, %v3379_v34 }
 0x40d   : > { %3657 = vst [vmem:[%s4396_s8 + $0x1a8] sm:$0xff] %v3411_v11  ;;  %v3234_v30 = vpop.f32.mrf.mxu2 }
 0x40e   : > { %v3235_v14 = vadd.f32 %v3234_v30, %v3133_v61  ;;  %v3032_v49 = vpop.f32.mrf.mxu0  ;;  %v3144_v44 = vpop.f32.mrf.mxu1 }
 0x40f   : > { %v3033_v63 = vadd.f32 %v3032_v49, %v5392_v33 }
 0x410   : > { %v3317_v57 = vadd.f32 %v3316_v58, %v3235_v14  ;;  %v3320_v12 = vpop.f32.mrf.mxu3 }
 0x411   : > { %v3139_v6 = vadd.f32 %v3138_v26, %v3033_v63 }
 0x412   : > { %v3396_v38 = vsel %vm4376_vm6, %v3317_v57, 0.0 }
 0x413   : > { %v3412_v13 = vadd.f32 %v3396_v38, %v3380_v9 }
 0x415   : > { %3658 = vst [vmem:[%s4396_s8 + $0x1b0] sm:$0xff] %v3412_v13  ;;  %v3238_v41 = vpop.f32.mrf.mxu2 }
 0x416   : > { %v3239_v27 = vadd.f32 %v3238_v41, %v3139_v6  ;;  %v3037_v51 = vpop.f32.mrf.mxu0  ;;  %v3150_v52 = vpop.f32.mrf.mxu1 }
 0x417   : > { %v3038_v33 = vadd.f32 %v3037_v51, %v5407_v22 }
 0x418   : > { %v3321_v25 = vadd.f32 %v3320_v12, %v3239_v27  ;;  %v3324_v32 = vpop.f32.mrf.mxu3 }
 0x419   : > { %v3145_v50 = vadd.f32 %v3144_v44, %v3038_v33 }
 0x41a   : > { %v3397_v37 = vsel %vm4376_vm6, %v3321_v25, 0.0  ;;  %vm5898_vm6 = vcmp.eq.s32.totalorder %v5886_v4, %v4354_v56  ;;  %v3387_v4 = vsel %vm5899_vm7, %v5524_v47, 0.0 }
 0x41b   : > { %v3413_v59 = vadd.f32 %v3397_v37, %v3381_v24  ;;  %v3386_v60 = vsel %vm5898_vm6, %v5524_v47, 0.0 }
 0x41d   : > { %3659 = vst [vmem:[%s4396_s8 + $0x1b8] sm:$0xff] %v3413_v59  ;;  %v3242_v62 = vpop.f32.mrf.mxu2 }
 0x41e   : > { %v3243_v18 = vadd.f32 %v3242_v62, %v3145_v50  ;;  %v3042_v17 = vpop.f32.mrf.mxu0  ;;  %v3156_v31 = vpop.f32.mrf.mxu1 }
 0x41f   : > { %v3043_v35 = vadd.f32 %v3042_v17, %v5426_v7 }
 0x420   : > { %v3325_v2 = vadd.f32 %v3324_v32, %v3243_v18  ;;  %v3328_v22 = vpop.f32.mrf.mxu3 }
 0x421   : > { %v3151_v43 = vadd.f32 %v3150_v52, %v3043_v35 }
 0x422   : > { %v3398_v15 = vsel %vm4467_vm11, %v3325_v2, 0.0 }
 0x423   : > { %v3414_v39 = vadd.f32 %v3398_v15, %v3382_v45 }
 0x425   : > { %3660 = vst [vmem:[%s4396_s8 + $0x1c0] sm:$0xff] %v3414_v39  ;;  %v3246_v21 = vpop.f32.mrf.mxu2 }
 0x426   : > { %v3247_v42 = vadd.f32 %v3246_v21, %v3151_v43  ;;  %v3047_v46 = vpop.f32.mrf.mxu0  ;;  %v3162_v34 = vpop.f32.mrf.mxu1 }
 0x427   : > { %v3048_v7 = vadd.f32 %v3047_v46, %v5444_v8 }
 0x428   : > { %v3329_v29 = vadd.f32 %v3328_v22, %v3247_v42  ;;  %v3332_v53 = vpop.f32.mrf.mxu3 }
 0x429   : > { %v3157_v23 = vadd.f32 %v3156_v31, %v3048_v7 }
 0x42a   : > { %v3399_v26 = vsel %vm4467_vm11, %v3329_v29, 0.0 }
 0x42b   : > { %v3415_v55 = vadd.f32 %v3399_v26, %v3383_v0 }
 0x42d   : > { %3661 = vst [vmem:[%s4396_s8 + $0x1c8] sm:$0xff] %v3415_v55  ;;  %v3250_v58 = vpop.f32.mrf.mxu2  ;;  %v3389_v55 = vsel %vm238_vm3, %v5524_v47, 0.0 }
 0x42e   : > { %v3251_v28 = vadd.f32 %v3250_v58, %v3157_v23  ;;  %v3052_v11 = vpop.f32.mrf.mxu0  ;;  %v3168_v57 = vpop.f32.mrf.mxu1 }
 0x42f   : > { %v3053_v8 = vadd.f32 %v3052_v11, %v5459_v20 }
 0x430   : > { %v3333_v61 = vadd.f32 %v3332_v53, %v3251_v28  ;;  %v3336_v30 = vpop.f32.mrf.mxu3 }
 0x431   : > { %v3163_v44 = vadd.f32 %v3162_v34, %v3053_v8 }
 0x432   : > { %v3400_v14 = vsel %vm4467_vm11, %v3333_v61, 0.0 }
 0x433   : > { %v3416_v49 = vadd.f32 %v3400_v14, %v3384_v36 }
 0x435   : > { %3662 = vst [vmem:[%s4396_s8 + $0x1d0] sm:$0xff] %v3416_v49  ;;  %v3254_v9 = vpop.f32.mrf.mxu2 }
 0x436   : > { %v3255_v63 = vadd.f32 %v3254_v9, %v3163_v44  ;;  %v3057_v12 = vpop.f32.mrf.mxu0  ;;  %v3174_v24 = vpop.f32.mrf.mxu1 }
 0x437   : > { %v3058_v20 = vadd.f32 %v3057_v12, %v5474_v16 }
 0x438   : > { %v3337_v38 = vadd.f32 %v3336_v30, %v3255_v63  ;;  %v3340_v13 = vpop.f32.mrf.mxu3 }
 0x439   : > { %v3169_v27 = vadd.f32 %v3168_v57, %v3058_v20 }
 0x43a   : > { %v3401_v6 = vsel %vm4467_vm11, %v3337_v38, 0.0 }
 0x43b   : > { %v3417_v41 = vadd.f32 %v3401_v6, %v3385_v54 }
 0x43d   : > { %3663 = vst [vmem:[%s4396_s8 + $0x1d8] sm:$0xff] %v3417_v41  ;;  %v3258_v51 = vpop.f32.mrf.mxu2 }
 0x43e   : > { %v3259_v52 = vadd.f32 %v3258_v51, %v3169_v27  ;;  %v3062_v25 = vpop.f32.mrf.mxu0  ;;  %v3180_v45 = vpop.f32.mrf.mxu1 }
 0x43f   : > { %v3063_v16 = vadd.f32 %v3062_v25, %v5489_v40 }
 0x440   : > { %v3341_v33 = vadd.f32 %v3340_v13, %v3259_v52  ;;  %v3344_v59 = vpop.f32.mrf.mxu3 }
 0x441   : > { %v3175_v50 = vadd.f32 %v3174_v24, %v3063_v16 }
 0x442   : > { %v3402_v32 = vsel %vm4467_vm11, %v3341_v33, 0.0 }
 0x443   : > { %v3418_v37 = vadd.f32 %v3402_v32, %v3386_v60 }
 0x445   : > { %3664 = vst [vmem:[%s4396_s8 + $0x1e0] sm:$0xff] %v3418_v37  ;;  %v3262_v62 = vpop.f32.mrf.mxu2 }
 0x446   : > { %v3263_v18 = vadd.f32 %v3262_v62, %v3175_v50  ;;  %v3067_v17 = vpop.f32.mrf.mxu0  ;;  %v3186_v29 = vpop.f32.mrf.mxu1 }
 0x447   : > { %v3068_v40 = vadd.f32 %v3067_v17, %v5504_v1 }
 0x448   : > { %v3345_v2 = vadd.f32 %v3344_v59, %v3263_v18  ;;  %v3348_v15 = vpop.f32.mrf.mxu3 }
 0x449   : > { %v3181_v31 = vadd.f32 %v3180_v45, %v3068_v40 }
 0x44a   : > { %v3403_v35 = vsel %vm4467_vm11, %v3345_v2, 0.0 }
 0x44b   : > { %v3419_v22 = vadd.f32 %v3403_v35, %v3387_v4 }
 0x44d   : > { %3665 = vst [vmem:[%s4396_s8 + $0x1e8] sm:$0xff] %v3419_v22  ;;  %v3266_v39 = vpop.f32.mrf.mxu2 }
 0x44e   : > { %v3267_v43 = vadd.f32 %v3266_v39, %v3181_v31  ;;  %v3072_v21 = vpop.f32.mrf.mxu0 }
 0x44f   : > { %v3073_v1 = vadd.f32 %v3072_v21, %v5517_v3 }
 0x450   : > { %v3349_v42 = vadd.f32 %v3348_v15, %v3267_v43  ;;  %v3352_v19 = vpop.f32.mrf.mxu3 }
 0x451   : > { %v3187_v7 = vadd.f32 %v3186_v29, %v3073_v1 }
 0x452   : > { %v3404_v46 = vsel %vm4467_vm11, %v3349_v42, 0.0 }
 0x453   : > { %v3420_v0 = vadd.f32 %v3404_v46, %v3388_v10 }
 0x455   : > { %3666 = vst [vmem:[%s4396_s8 + $0x1f0] sm:$0xff] %v3420_v0  ;;  %v3270_v53 = vpop.f32.mrf.mxu2 }
 0x456   : > { %v3271_v26 = vadd.f32 %v3270_v53, %v3187_v7 }
 0x458   : > { %v3353_v3 = vadd.f32 %v3352_v19, %v3271_v26 }
 0x45a   : > { %v3405_v34 = vsel %vm4467_vm11, %v3353_v3, 0.0 }
 0x45b   : > { %v3421_v23 = vadd.f32 %v3405_v34, %v3389_v55 }
 0x45d   : > { %3667 = vst [vmem:[%s4396_s8 + $0x1f8] sm:$0xff] %v3421_v23 }
 0x45e   : > { %3826 = shalt.err (!%p3823_p11)
}
 0x45f   : > { %s3874_s19 = smov 128   ;;  %s3875_s8 = smov 8  }
 0x460   : > { %3680 = dma.vmem_to_hbm [thread:$0]  (%p3955_p5), %s3479_s22, 8192, %s3481_s24, %s3449_s7, %s3874_s19, %s3874_s19, %s3875_s8  }
 0x461 PF: > { %p3690_p12 = scmp.ge.s32.totalorder %s3867_s1, 2  ;;  %s3495_s26 = sand.u32 1, %s3855_s29  }
 0x462   : > { %s3496_s11 = scalar_lea.sflag [#allocation6], %s3495_s26 }
 0x463   : > { %p3684_p13 = pnand %p3690_p12, %p3959_p6 }
 0x465   : > { %p3685_p0 = pneg %p3684_p13 }
 0x467   : > { %3846 = dma.done.wait (%p3685_p0), %s3496_s11, 64  }
 0x468   : > { %3848 = vsyncadd (%p3685_p0), %s3496_s11, 4294967232  ;;  %s3506_s27 = scalar_lea.sflag [#allocation8], %s3495_s26 }
 0x469   : > { %3850 = dma.done.wait (%p3685_p0), %s3506_s27, 8192  }
 0x46a   : > { %3852 = vsyncadd (%p3685_p0), %s3506_s27, 4294959104  ;;  %s5901_s13 = sld [smem:[#allocation12_spill]]  ;;  %p33_p5 = scmp.ge.s32.totalorder %s3942_s9, 4  }
 0x46b   : > { %s5902_s29 = smov %s3859_s0  ;;  %s5903_s0 = smov %s3863_s30 }
 0x46c   : > { %s5905_s1 = smov %s3942_s9  ;;  %35 = sbr.rel (!%p33_p5) target bundleno = 12 (0xc), region = 99 }
 0x470   : > { %s5904_s30 = smov %s5901_s13 }
 0x471   :  { %3512 = vsyncpa [#allocation6], 1 }
 0x472   :  { %3514 = vsyncpa [#allocation6 + $0x1], 1 }
 0x473   :  { %3515 = vsyncpa [#allocation8], 1 }
 0x474   :  { %3517 = vsyncpa [#allocation8 + $0x1], 1 }

</bundles_post_ra>
